<compile_context>
chip_gen: v7x
topology: tpu7x:2x2x1
jax: 0.10.0
libtpu: 0.0.40
codegen_flags: <defaults>
</compile_context>

<pallas_src>
import functools

import jax
import jax.numpy as jnp
from jax.experimental import pallas as pl
from jax.experimental.pallas import tpu as pltpu


def _fused_mhsa_kernel(num_heads, head_dim, scale, share_x, *refs):
    """One (batch, q-tile) program: QKV proj + softmax(QK^T)V + out proj.

    Layout is channel-major: channels on sublanes, tokens on lanes, so all
    VMEM blocks / output stores are lane-dense and the torch weights are
    contracted over their last dim (no weight transposes anywhere).
    """
    if share_x:
        xq_ref, w_in_ref, w_out_ref, o_ref = refs
        xf_ref = xq_ref
    else:
        xq_ref, xf_ref, w_in_ref, w_out_ref, o_ref = refs

    c = num_heads * head_dim
    xq = xq_ref[0]                       # (C, tq)  tokens of this q tile
    xf = xf_ref[0]                       # (C, L)   all tokens (keys / values)

    # Fused projections (bias=False).  Default MXU precision, f32 accumulation.
    # Softmax scale folded onto q (C*tq multiplies, not tq*L per kv block).
    q_t = jnp.dot(w_in_ref[0:c, :], xq,
                  preferred_element_type=jnp.float32) * scale        # (C, tq)
    k_t = jnp.dot(w_in_ref[c:2 * c, :], xf,
                  preferred_element_type=jnp.float32)                # (C, L)
    v_t = jnp.dot(w_in_ref[2 * c:3 * c, :], xf,
                  preferred_element_type=jnp.float32)                # (C, L)

    head_outs = []
    for h in range(num_heads):           # num_heads is small & static
        lo, hi = h * head_dim, (h + 1) * head_dim
        qh = q_t[lo:hi, :]               # (dh, tq)  sublane-aligned slice
        kh = k_t[lo:hi, :]               # (dh, L)
        vh = v_t[lo:hi, :]               # (dh, L)

        # scores (tq, L) = qh^T @ kh ; tiny (dh, tq) transpose runs on the XLU.
        s = jnp.dot(qh.T, kh, preferred_element_type=jnp.float32)
        m = jnp.max(s, axis=-1, keepdims=True)
        p = jnp.exp(s - m)
        l = jnp.sum(p, axis=-1, keepdims=True)
        p = p * pl.reciprocal(l, approx=True)        # EUP reciprocal, VPU mul

        # (dh, tq) = vh @ p^T  (contract both over the key dim L)
        oh = jax.lax.dot_general(vh, p, (((1,), (1,)), ((), ())),
                                 preferred_element_type=jnp.float32)
        head_outs.append(oh)

    o_t = jnp.concatenate(head_outs, axis=0)                         # (C, tq)
    y_t = jnp.dot(w_out_ref[...], o_t, preferred_element_type=jnp.float32)
    o_ref[0] = y_t.astype(o_ref.dtype)                               # lane-dense store


def multi_head_self_attention_forward(x, w_in, w_out, num_heads, *, max_q_tile=512):
    """x: (B,C,H,W); w_in: (3C,C) = in_proj_weight; w_out: (C,C) = out_proj.weight."""
    b, c, h, w = x.shape
    assert c % num_heads == 0, "embed_dim must be divisible by num_heads"
    dh = c // num_heads
    L = h * w
    scale = 1.0 / float(dh) ** 0.5

    # (B,C,H,W) -> (B,C,L) is a pure reshape (tokens stay on the minor/lane
    # axis) -> zero wrapper transposes / extra HBM passes.
    x3 = x.reshape(b, c, L)

    # q tile: the whole sequence when small (single-pass softmax, no kv grid
    # axis); otherwise a 128-multiple divisor of L to bound the (tq, L) score
    # slab in VMEM.  K/V projections are recomputed per q tile in that case
    # (deliberate fusion tradeoff; only hit for long sequences).
    if L <= max_q_tile:
        tq = L
    else:
        tq = L
        for cand in (512, 384, 256, 128):
            if L % cand == 0:
                tq = cand
                break
    n_qt = L // tq
    share_x = n_qt == 1

    kernel = functools.partial(_fused_mhsa_kernel, num_heads, dh, scale, share_x)

    x_tile_spec = pl.BlockSpec((1, c, tq), lambda bi, qi: (bi, 0, qi))
    x_full_spec = pl.BlockSpec((1, c, L), lambda bi, qi: (bi, 0, 0))
    w_in_spec = pl.BlockSpec((3 * c, c), lambda bi, qi: (0, 0))   # VMEM-resident
    w_out_spec = pl.BlockSpec((c, c), lambda bi, qi: (0, 0))      # VMEM-resident

    if share_x:
        in_specs = [x_full_spec, w_in_spec, w_out_spec]
        operands = (x3, w_in, w_out)
    else:
        in_specs = [x_tile_spec, x_full_spec, w_in_spec, w_out_spec]
        operands = (x3, x3, w_in, w_out)

    out = pl.pallas_call(
        kernel,
        out_shape=jax.ShapeDtypeStruct((b, c, L), x.dtype),
        grid=(b, n_qt),
        in_specs=in_specs,
        out_specs=pl.BlockSpec((1, c, tq), lambda bi, qi: (bi, 0, qi)),
        compiler_params=pltpu.CompilerParams(
            dimension_semantics=("parallel", "parallel")),
    )(*operands)

    return out.reshape(b, c, h, w)


# ---------------------------------------------------------------------------
# Pure-JAX reference mirroring torch.nn.MultiheadAttention (bias=False),
# default matmul precision (same single-pass MXU behavior as the kernel).
# ---------------------------------------------------------------------------
def _reference(x, w_in, w_out, num_heads):
    b, c, hh, ww = x.shape
    L = hh * ww
    dh = c // num_heads
    xs = jnp.transpose(x, (0, 2, 3, 1)).reshape(b, L, c)
    qkv = jnp.einsum("blc,dc->bld", xs, w_in)                    # (b, L, 3c)
    q, k, v = jnp.split(qkv, 3, axis=-1)

    def heads(t):
        return jnp.transpose(t.reshape(b, L, num_heads, dh), (0, 2, 1, 3))

    q, k, v = heads(q), heads(k), heads(v)
    s = jnp.einsum("bhqd,bhkd->bhqk", q, k) / jnp.sqrt(jnp.float32(dh))
    p = jax.nn.softmax(s, axis=-1)
    o = jnp.einsum("bhqk,bhkd->bhqd", p, v)
    o = jnp.transpose(o, (0, 2, 1, 3)).reshape(b, L, c)
    y = jnp.einsum("blc,dc->bld", o, w_out)
    return jnp.transpose(y.reshape(b, hh, ww, c), (0, 3, 1, 2))


if __name__ == "__main__":
    key = jax.random.PRNGKey(0)
    kx, kin, kout = jax.random.split(key, 3)

    batch, embed_dim, spatial, num_heads = 2, 32, 16, 4   # L = 256, head_dim = 8
    x = jax.random.normal(kx, (batch, embed_dim, spatial, spatial), jnp.float32)
    # nn.MultiheadAttention params with bias=False: in_proj_weight (3E,E), out_proj.weight (E,E)
    w_in = jax.random.normal(kin, (3 * embed_dim, embed_dim), jnp.float32) / jnp.sqrt(
        jnp.float32(embed_dim))
    w_out = jax.random.normal(kout, (embed_dim, embed_dim), jnp.float32) / jnp.sqrt(
        jnp.float32(embed_dim))

    out = multi_head_self_attention_forward(x, w_in, w_out, num_heads)
    out = jax.block_until_ready(out)

    ref = _reference(x, w_in, w_out, num_heads)
    assert out.shape == x.shape
    max_err = float(jnp.max(jnp.abs(out - ref)))
    # Default (single-pass) MXU precision in kernel and reference + approx
    # reciprocal -> looser tolerance than the old f32/HIGHEST compare.
    assert jnp.allclose(out, ref, atol=3e-2, rtol=3e-2), max_err

    print("KERNEL_OK")
</pallas_src>

<mosaic_0001>
module attributes {stable_mosaic.version = 11 : i64} {
  func.func @_fused_mhsa_kernel(%arg0: i32, %arg1: i32, %arg2: memref<1x32x256xf32, #tpu.memory_space<vmem>>, %arg3: memref<96x32xf32, #tpu.memory_space<vmem>>, %arg4: memref<32x32xf32, #tpu.memory_space<vmem>>, %arg5: memref<1x32x256xf32, #tpu.memory_space<vmem>>) attributes {dimension_semantics = [#tpu.dimension_semantics<parallel>, #tpu.dimension_semantics<parallel>], iteration_bounds = array<i64: 2, 1>, scalar_prefetch = 0 : i64, scratch_operands = 0 : i64, tpu.core_type = #tpu.core_type<tc>, window_params = [{transform_indices = @transform_0, window_bounds = array<i64: 1, 32, 256>}, {pipeline_mode = #tpu.pipeline_mode<synchronous>, transform_indices = @transform_1, window_bounds = array<i64: 96, 32>}, {pipeline_mode = #tpu.pipeline_mode<synchronous>, transform_indices = @transform_2, window_bounds = array<i64: 32, 32>}, {transform_indices = @transform_3, window_bounds = array<i64: 1, 32, 256>}]} {
    %c0 = arith.constant 0 : index
    %c0_0 = arith.constant 0 : index
    %c0_1 = arith.constant 0 : index
    %0 = vector.load %arg2[%c0, %c0_0, %c0_1] : memref<1x32x256xf32, #tpu.memory_space<vmem>>, vector<1x32x256xf32>
    %1 = vector.shape_cast %0 : vector<1x32x256xf32> to vector<32x256xf32>
    %c0_2 = arith.constant 0 : index
    %c0_3 = arith.constant 0 : index
    %c0_4 = arith.constant 0 : index
    %2 = vector.load %arg2[%c0_2, %c0_3, %c0_4] : memref<1x32x256xf32, #tpu.memory_space<vmem>>, vector<1x32x256xf32>
    %3 = vector.shape_cast %2 : vector<1x32x256xf32> to vector<32x256xf32>
    %c0_5 = arith.constant 0 : index
    %c0_6 = arith.constant 0 : index
    %4 = vector.load %arg3[%c0_5, %c0_6] : memref<96x32xf32, #tpu.memory_space<vmem>>, vector<32x32xf32>
    %cst = arith.constant dense<0.000000e+00> : vector<32x256xf32>
    %5 = tpu.matmul %4, %1, %cst {dimension_numbers = #tpu.dot_dimension_numbers<[1], [0], [0], [1], [0, 0, 1, 1], [], []>} : vector<32x32xf32>, vector<32x256xf32>, vector<32x256xf32> -> vector<32x256xf32>
    %cst_7 = arith.constant 0.353553385 : f32
    %6 = vector.broadcast %cst_7 : f32 to vector<32x256xf32>
    %7 = arith.mulf %5, %6 : vector<32x256xf32>
    %c32 = arith.constant 32 : index
    %c0_8 = arith.constant 0 : index
    %8 = vector.load %arg3[%c32, %c0_8] : memref<96x32xf32, #tpu.memory_space<vmem>>, vector<32x32xf32>
    %cst_9 = arith.constant dense<0.000000e+00> : vector<32x256xf32>
    %9 = tpu.matmul %8, %3, %cst_9 {dimension_numbers = #tpu.dot_dimension_numbers<[1], [0], [0], [1], [0, 0, 1, 1], [], []>} : vector<32x32xf32>, vector<32x256xf32>, vector<32x256xf32> -> vector<32x256xf32>
    %c64 = arith.constant 64 : index
    %c0_10 = arith.constant 0 : index
    %10 = vector.load %arg3[%c64, %c0_10] : memref<96x32xf32, #tpu.memory_space<vmem>>, vector<32x32xf32>
    %cst_11 = arith.constant dense<0.000000e+00> : vector<32x256xf32>
    %11 = tpu.matmul %10, %3, %cst_11 {dimension_numbers = #tpu.dot_dimension_numbers<[1], [0], [0], [1], [0, 0, 1, 1], [], []>} : vector<32x32xf32>, vector<32x256xf32>, vector<32x256xf32> -> vector<32x256xf32>
    %12 = vector.extract_strided_slice %7 {offsets = [0, 0], sizes = [8, 256], strides = [1, 1]} : vector<32x256xf32> to vector<8x256xf32>
    %13 = vector.extract_strided_slice %9 {offsets = [0, 0], sizes = [8, 256], strides = [1, 1]} : vector<32x256xf32> to vector<8x256xf32>
    %14 = vector.extract_strided_slice %11 {offsets = [0, 0], sizes = [8, 256], strides = [1, 1]} : vector<32x256xf32> to vector<8x256xf32>
    %15 = tpu.transpose %12, [1, 0] : vector<8x256xf32> -> vector<256x8xf32>
    %cst_12 = arith.constant dense<0.000000e+00> : vector<256x256xf32>
    %16 = tpu.matmul %15, %13, %cst_12 {dimension_numbers = #tpu.dot_dimension_numbers<[1], [0], [0], [1], [0, 0, 1, 1], [], []>} : vector<256x8xf32>, vector<8x256xf32>, vector<256x256xf32> -> vector<256x256xf32>
    %cst_13 = arith.constant dense<0xFF800000> : vector<256xf32>
    %17 = vector.multi_reduction <maximumf>, %16, %cst_13 [1] : vector<256x256xf32> to vector<256xf32>
    %18 = vector.shape_cast %17 : vector<256xf32> to vector<256x1xf32>
    %19 = vector.broadcast %18 : vector<256x1xf32> to vector<256x256xf32>
    %20 = arith.subf %16, %19 : vector<256x256xf32>
    %21 = math.exp %20 : vector<256x256xf32>
    %cst_14 = arith.constant dense<0.000000e+00> : vector<256xf32>
    %22 = vector.multi_reduction <add>, %21, %cst_14 [1] : vector<256x256xf32> to vector<256xf32>
    %23 = vector.shape_cast %22 : vector<256xf32> to vector<256x1xf32>
    %24 = tpu.reciprocal %23 {approx = true} : vector<256x1xf32> -> vector<256x1xf32>
    %25 = vector.broadcast %24 : vector<256x1xf32> to vector<256x256xf32>
    %26 = arith.mulf %21, %25 : vector<256x256xf32>
    %cst_15 = arith.constant dense<0.000000e+00> : vector<8x256xf32>
    %27 = tpu.matmul %14, %26, %cst_15 {dimension_numbers = #tpu.dot_dimension_numbers<[1], [1], [0], [0], [0, 0, 1, 0], [], []>} : vector<8x256xf32>, vector<256x256xf32>, vector<8x256xf32> -> vector<8x256xf32>
    %28 = vector.extract_strided_slice %7 {offsets = [8, 0], sizes = [8, 256], strides = [1, 1]} : vector<32x256xf32> to vector<8x256xf32>
    %29 = vector.extract_strided_slice %9 {offsets = [8, 0], sizes = [8, 256], strides = [1, 1]} : vector<32x256xf32> to vector<8x256xf32>
    %30 = vector.extract_strided_slice %11 {offsets = [8, 0], sizes = [8, 256], strides = [1, 1]} : vector<32x256xf32> to vector<8x256xf32>
    %31 = tpu.transpose %28, [1, 0] : vector<8x256xf32> -> vector<256x8xf32>
    %cst_16 = arith.constant dense<0.000000e+00> : vector<256x256xf32>
    %32 = tpu.matmul %31, %29, %cst_16 {dimension_numbers = #tpu.dot_dimension_numbers<[1], [0], [0], [1], [0, 0, 1, 1], [], []>} : vector<256x8xf32>, vector<8x256xf32>, vector<256x256xf32> -> vector<256x256xf32>
    %cst_17 = arith.constant dense<0xFF800000> : vector<256xf32>
    %33 = vector.multi_reduction <maximumf>, %32, %cst_17 [1] : vector<256x256xf32> to vector<256xf32>
    %34 = vector.shape_cast %33 : vector<256xf32> to vector<256x1xf32>
    %35 = vector.broadcast %34 : vector<256x1xf32> to vector<256x256xf32>
    %36 = arith.subf %32, %35 : vector<256x256xf32>
    %37 = math.exp %36 : vector<256x256xf32>
    %cst_18 = arith.constant dense<0.000000e+00> : vector<256xf32>
    %38 = vector.multi_reduction <add>, %37, %cst_18 [1] : vector<256x256xf32> to vector<256xf32>
    %39 = vector.shape_cast %38 : vector<256xf32> to vector<256x1xf32>
    %40 = tpu.reciprocal %39 {approx = true} : vector<256x1xf32> -> vector<256x1xf32>
    %41 = vector.broadcast %40 : vector<256x1xf32> to vector<256x256xf32>
    %42 = arith.mulf %37, %41 : vector<256x256xf32>
    %cst_19 = arith.constant dense<0.000000e+00> : vector<8x256xf32>
    %43 = tpu.matmul %30, %42, %cst_19 {dimension_numbers = #tpu.dot_dimension_numbers<[1], [1], [0], [0], [0, 0, 1, 0], [], []>} : vector<8x256xf32>, vector<256x256xf32>, vector<8x256xf32> -> vector<8x256xf32>
    %44 = vector.extract_strided_slice %7 {offsets = [16, 0], sizes = [8, 256], strides = [1, 1]} : vector<32x256xf32> to vector<8x256xf32>
    %45 = vector.extract_strided_slice %9 {offsets = [16, 0], sizes = [8, 256], strides = [1, 1]} : vector<32x256xf32> to vector<8x256xf32>
    %46 = vector.extract_strided_slice %11 {offsets = [16, 0], sizes = [8, 256], strides = [1, 1]} : vector<32x256xf32> to vector<8x256xf32>
    %47 = tpu.transpose %44, [1, 0] : vector<8x256xf32> -> vector<256x8xf32>
    %cst_20 = arith.constant dense<0.000000e+00> : vector<256x256xf32>
    %48 = tpu.matmul %47, %45, %cst_20 {dimension_numbers = #tpu.dot_dimension_numbers<[1], [0], [0], [1], [0, 0, 1, 1], [], []>} : vector<256x8xf32>, vector<8x256xf32>, vector<256x256xf32> -> vector<256x256xf32>
    %cst_21 = arith.constant dense<0xFF800000> : vector<256xf32>
    %49 = vector.multi_reduction <maximumf>, %48, %cst_21 [1] : vector<256x256xf32> to vector<256xf32>
    %50 = vector.shape_cast %49 : vector<256xf32> to vector<256x1xf32>
    %51 = vector.broadcast %50 : vector<256x1xf32> to vector<256x256xf32>
    %52 = arith.subf %48, %51 : vector<256x256xf32>
    %53 = math.exp %52 : vector<256x256xf32>
    %cst_22 = arith.constant dense<0.000000e+00> : vector<256xf32>
    %54 = vector.multi_reduction <add>, %53, %cst_22 [1] : vector<256x256xf32> to vector<256xf32>
    %55 = vector.shape_cast %54 : vector<256xf32> to vector<256x1xf32>
    %56 = tpu.reciprocal %55 {approx = true} : vector<256x1xf32> -> vector<256x1xf32>
    %57 = vector.broadcast %56 : vector<256x1xf32> to vector<256x256xf32>
    %58 = arith.mulf %53, %57 : vector<256x256xf32>
    %cst_23 = arith.constant dense<0.000000e+00> : vector<8x256xf32>
    %59 = tpu.matmul %46, %58, %cst_23 {dimension_numbers = #tpu.dot_dimension_numbers<[1], [1], [0], [0], [0, 0, 1, 0], [], []>} : vector<8x256xf32>, vector<256x256xf32>, vector<8x256xf32> -> vector<8x256xf32>
    %60 = vector.extract_strided_slice %7 {offsets = [24, 0], sizes = [8, 256], strides = [1, 1]} : vector<32x256xf32> to vector<8x256xf32>
    %61 = vector.extract_strided_slice %9 {offsets = [24, 0], sizes = [8, 256], strides = [1, 1]} : vector<32x256xf32> to vector<8x256xf32>
    %62 = vector.extract_strided_slice %11 {offsets = [24, 0], sizes = [8, 256], strides = [1, 1]} : vector<32x256xf32> to vector<8x256xf32>
    %63 = tpu.transpose %60, [1, 0] : vector<8x256xf32> -> vector<256x8xf32>
    %cst_24 = arith.constant dense<0.000000e+00> : vector<256x256xf32>
    %64 = tpu.matmul %63, %61, %cst_24 {dimension_numbers = #tpu.dot_dimension_numbers<[1], [0], [0], [1], [0, 0, 1, 1], [], []>} : vector<256x8xf32>, vector<8x256xf32>, vector<256x256xf32> -> vector<256x256xf32>
    %cst_25 = arith.constant dense<0xFF800000> : vector<256xf32>
    %65 = vector.multi_reduction <maximumf>, %64, %cst_25 [1] : vector<256x256xf32> to vector<256xf32>
    %66 = vector.shape_cast %65 : vector<256xf32> to vector<256x1xf32>
    %67 = vector.broadcast %66 : vector<256x1xf32> to vector<256x256xf32>
    %68 = arith.subf %64, %67 : vector<256x256xf32>
    %69 = math.exp %68 : vector<256x256xf32>
    %cst_26 = arith.constant dense<0.000000e+00> : vector<256xf32>
    %70 = vector.multi_reduction <add>, %69, %cst_26 [1] : vector<256x256xf32> to vector<256xf32>
    %71 = vector.shape_cast %70 : vector<256xf32> to vector<256x1xf32>
    %72 = tpu.reciprocal %71 {approx = true} : vector<256x1xf32> -> vector<256x1xf32>
    %73 = vector.broadcast %72 : vector<256x1xf32> to vector<256x256xf32>
    %74 = arith.mulf %69, %73 : vector<256x256xf32>
    %cst_27 = arith.constant dense<0.000000e+00> : vector<8x256xf32>
    %75 = tpu.matmul %62, %74, %cst_27 {dimension_numbers = #tpu.dot_dimension_numbers<[1], [1], [0], [0], [0, 0, 1, 0], [], []>} : vector<8x256xf32>, vector<256x256xf32>, vector<8x256xf32> -> vector<8x256xf32>
    %76 = tpu.concatenate %27, %43, %59, %75 in 0 : vector<8x256xf32>, vector<8x256xf32>, vector<8x256xf32>, vector<8x256xf32> -> vector<32x256xf32>
    %c0_28 = arith.constant 0 : index
    %c0_29 = arith.constant 0 : index
    %77 = vector.load %arg4[%c0_28, %c0_29] : memref<32x32xf32, #tpu.memory_space<vmem>>, vector<32x32xf32>
    %cst_30 = arith.constant dense<0.000000e+00> : vector<32x256xf32>
    %78 = tpu.matmul %77, %76, %cst_30 {dimension_numbers = #tpu.dot_dimension_numbers<[1], [0], [0], [1], [0, 0, 1, 1], [], []>} : vector<32x32xf32>, vector<32x256xf32>, vector<32x256xf32> -> vector<32x256xf32>
    %c0_31 = arith.constant 0 : index
    %c0_32 = arith.constant 0 : index
    %c0_33 = arith.constant 0 : index
    %79 = vector.load %arg5[%c0_31, %c0_32, %c0_33] : memref<1x32x256xf32, #tpu.memory_space<vmem>>, vector<1x32x256xf32>
    %80 = vector.shape_cast %79 : vector<1x32x256xf32> to vector<32x256xf32>
    %81 = vector.shape_cast %78 : vector<32x256xf32> to vector<1x32x256xf32>
    tpu.vector_store %arg5[%c0_31, %c0_32, %c0_33], %81 {strides = array<i32>} : memref<1x32x256xf32, #tpu.memory_space<vmem>>, vector<1x32x256xf32>,
    return
  }
  func.func @transform_0(%arg0: i32, %arg1: i32) -> (i32, i32, i32) {
    %c0_i32 = arith.constant 0 : i32
    %c0_i32_0 = arith.constant 0 : i32
    %c0_i32_1 = arith.constant 0 : i32
    return %arg0, %c0_i32, %c0_i32_0 : i32, i32, i32
  }
  func.func @transform_1(%arg0: i32, %arg1: i32) -> (i32, i32) {
    %c0_i32 = arith.constant 0 : i32
    %c0_i32_0 = arith.constant 0 : i32
    %c0_i32_1 = arith.constant 0 : i32
    return %c0_i32, %c0_i32_0 : i32, i32
  }
  func.func @transform_2(%arg0: i32, %arg1: i32) -> (i32, i32) {
    %c0_i32 = arith.constant 0 : i32
    %c0_i32_0 = arith.constant 0 : i32
    %c0_i32_1 = arith.constant 0 : i32
    return %c0_i32, %c0_i32_0 : i32, i32
  }
  func.func @transform_3(%arg0: i32, %arg1: i32) -> (i32, i32, i32) {
    %c0_i32 = arith.constant 0 : i32
    %c0_i32_0 = arith.constant 0 : i32
    return %arg0, %c0_i32, %arg1 : i32, i32, i32
  }
}

</mosaic_0001>

<bundles_post_ra>
// kernel: tpu_custom_call.1
= control target key start
LH: loop header
LB: loop body
LE: loop exit
PB: predicated region body
PF: predicated region fallthrough
CT: control target
= control target key end

     0   :  { %8 = vsyncpa [#allocation3], 0  ;;  %s8963_s0 = inlined_call_operand.vmem [shape: f32[2,32,256], index: 0, kind: input, shape index: {}]   ;;  %s8964_s1 = inlined_call_operand.vmem [shape: f32[96,32], index: 1, kind: input, shape index: {}]   ;;  %s8965_s2 = inlined_call_operand.hbm [shape: f32[32,32], index: 2, kind: input, shape index: {}]   ;;  %s8966_s3 = inlined_call_operand.hbm [shape: f32[2,32,256], index: 3, kind: output, shape index: {}]  }
   0x1   :  { %9 = vsyncpa [#allocation4], 0 }
   0x2   :  { %11 = vsyncpa [#allocation4 + $0x1], 0  ;;  %s6045_s12 = smov 0   ;;  %s6047_s13 = smov 0  }
   0x3   :  { %s6049_s14 = smov 0   ;;  %s6051_s15 = smov 0  }
   0x4   :  { %s6053_s16 = smov 0   ;;  %s6055_s17 = smov 0  }
   0x5 LB: > { %s4618_s18 = sadd.s32 4294967295, %s6016_s17   ;;  %s4619_s19 = sadd.s32 4294967294, %s6016_s17   ;;  %s6016_s17 = sphi %s6055_s17, %s17_s17   ;;  %s6012_s16 = sphi %s6053_s16, %s9829_s16   ;;  %s6008_s15 = sphi %s6051_s15, %s9828_s15   ;;  %s6004_s14 = sphi %s6049_s14, %s9827_s14   ;;  %s6000_s13 = sphi %s6047_s13, %s9826_s13   ;;  %s5996_s12 = sphi %s6045_s12, %s9825_s12  }
   0x6   : > { %s29_s20 = sadd.s32 1, %s6012_s16  ;;  %s106_s21 = sadd.s32 1, %s6004_s14 }
   0x7   : > { %p31_p0 = scmp.ge.s32.totalorder %s29_s20, 2  ;;  %p116_p1 = scmp.ne.s32.totalorder %s6004_s14, %s6000_s13 }
   0x8   : > { %p117_p2 = scmp.eq.s32.totalorder %s4618_s18, 1  ;;  %p122_p3 = scmp.ne.s32.totalorder %s6000_s13, %s5996_s12 }
   0x9   : > { %s9831_s20 = smov (%p31_p0, %s29_s20), 0  ;;  %p123_p5 = scmp.eq.s32.totalorder %s4619_s19, 1 }
   0xa   : > { %p6085_p4 = por %p117_p2, %p116_p1  ;;  %s101_s23 = ssub.s32 %s6012_s16, %s9831_s20 }
   0xb   : > { %p4620_p6 = scmp.ge.s32.totalorder %s6016_s17, 1  ;;  %p104_p7 = scmp.eq.s32.totalorder %s101_s23, 0 }
   0xc   : > { %s9238_s22 = scalar_select %p6085_p4, 1, 0 }
   0xd   : > { %p6092_p8 = por %p123_p5, %p122_p3  ;;  %p130_p9 = scmp.lt.s32.totalorder %s6016_s17, 3 }
   0xe   : > { %s6098_s25 = scalar_select %p104_p7, %s6004_s14, %s106_s21  }
   0xf   : > { %s9239_s24 = scalar_select %p6092_p8, 1, 0 }
  0x10   : > { %p6100_p10 = pnand %p4620_p6, %p130_p9  ;;  %p6104_p11 = scmp.eq.s32.totalorder %s4618_s18, 0 }
  0x11   : > { %s6018_s28 = smov [#allocation2]   ;;  %s5906_s6 = scalar_lea.hbm %s8965_s2, 512 }
  0x12   : > { %s9240_s26 = scalar_select %p6100_p10, 1, 0 }
  0x13   : > { %s9241_s27 = scalar_select %p6104_p11, 1, 0 }
  0x14   : > { %p5073_p12 = pneg %p6100_p10  ;;  %s145_s29 = sshll.u32 %s6018_s28, 4  ;;  %s146_s29 = int_to_ptr.vmem [resolvable:$true] %s145_s29 }
  0x15   : > { %p5907_p0 = scmp.ne.s32.totalorder %s8965_s2, %s5906_s6  ;;  %p5913_p5 = scmp.lt.u32.totalorder %s5906_s6, %s8965_s2 }
  0x16   : > { %p6112_p13 = pnand %p6104_p11, %p5073_p12 }
  0x18   : > { %p5908_p1 = pneg %p6112_p13 }
  0x1a   : > { %p5909_p2 = pnand %p5908_p1, %p5907_p0 }
  0x1c   : > { %p5910_p3 = pneg %p5909_p2 }
  0x1e   : > { %p5915_p6 = pnand %p5913_p5, %p5910_p3 }
  0x20   : > { %5918 = shalt.err (!%p5915_p6)
}
  0x21   : > { %s5919_s11 = scalar_lea.vmem %s146_s29, 512  ;;  %p5927_p8 = scmp.lt.s32.totalorder %s146_s29, %s146_s29 }
  0x22   : > { %p5920_p7 = scmp.ne.s32.totalorder %s146_s29, %s5919_s11  ;;  %p5928_p4 = scmp.lt.s32.totalorder %s5919_s11, %s5919_s11 }
  0x24   : > { %p5922_p9 = pnand %p5920_p7, %p5908_p1  ;;  %p5929_p11 = por %p5928_p4, %p5927_p8 }
  0x26   : > { %p5923_p12 = pneg %p5922_p9 }
  0x28   : > { %p5930_p10 = pnand %p5929_p11, %p5923_p12 }
  0x2a   : > { %5933 = shalt.err (!%p5930_p10)
}
  0x2b   : > { %s6019_s18 = smov 128   ;;  %s6020_s19 = smov 8  }
  0x2c   : > { %5076 = dma.hbm_to_vmem [thread:$0]  (!%p6112_p13), %s8965_s2, 512, %s146_s29, [#allocation3], %s6019_s18, %s6019_s18, %s6020_s19  }
  0x2d   : > { %p9243_p0 = scmp.ne.s32.totalorder %s9240_s26, 0 }
  0x2f   : > { %169 = sbr.rel (%p9243_p0) target bundleno = 2820 (0xb04), region = 32 }
  0x36   : > { %p9244_p2 = scmp.ne.s32.totalorder %s9241_s27, 0 }
  0x38   : > { %5987 = dma.done.wait (%p9244_p2), [#allocation3], 512  }
  0x39   : > { %5989 = vsyncadd (%p9244_p2), [#allocation3], 4294966784  ;;  %p193_p4 = scmp.lt.s32.totalorder %s6008_s15, 1  ;;  %v8971_v0 = vmov 0.0   ;;  %v207_v13 = vld [vmem:[%s8964_s1] sm:$0xff]  ;;  %vm211_vm0 = vcmask 261120  }
  0x3a   : > { %288 = vmatprep.mubr.f32.mxu0 %v8971_v0  ;;  %401 = vmatprep.mubr.f32.mxu1 %v8971_v0  ;;  %v321_v14 = vld [vmem:[%s8964_s1 + $0x20] sm:$0xff]  ;;  %v322_v15 = vld [vmem:[%s8964_s1 + $0x28] sm:$0xff]  ;;  %v323_v16 = vld [vmem:[%s8964_s1 + $0x30] sm:$0xff]  ;;  %vm595_vm1 = vcmask 64512   ;;  %s190_s11 = sand.u32 1, %s6000_s13   ;;  %s4778_s23 = sshll.u32 %s6008_s15, 10 }
  0x3b   : > { %s194_s28 = scalar_select %p193_p4, %s6008_s15, 1  ;;  %v324_v17 = vld [vmem:[%s8964_s1 + $0x38] sm:$0xff]  ;;  %v208_v24 = vld [vmem:[%s8964_s1 + $0x8] sm:$0xff]  ;;  %v209_v25 = vld [vmem:[%s8964_s1 + $0x10] sm:$0xff] }
  0x3c   : > { %v210_v27 = vld [vmem:[%s8964_s1 + $0x18] sm:$0xff]  ;;  %v426_v29 = vld [vmem:[%s8964_s1 + $0x40] sm:$0xff]  ;;  %s4625_s18 = sshll.u32 %s190_s11, 6  ;;  %s8915_s29 = scalar_lea.hbm %s8966_s3, %s4778_s23 }
  0x3d   : > { %s4777_s30 = sshll.u32 %s194_s28, 6  ;;  %s192_s19 = scalar_lea.vmem [#allocation5], %s4625_s18 }
  0x3e   : > { %s197_s26 = scalar_lea.vmem %s8963_s0, %s4777_s30  ;;  %s4533_s21 = sshll.u32 %s192_s19, 4  ;;  %s8910_s21 = int_to_ptr.vmem [resolvable:$true] %s4533_s21 }
  0x3f   : > { %v200_v1 = vld [vmem:[%s197_s26 + $0x8] sm:$0xff]  ;;  %v202_v2 = vld [vmem:[%s197_s26 + $0x18] sm:$0xff]  ;;  %v199_v3 = vld [vmem:[%s197_s26] sm:$0xff]  ;;  %s8917_s4 = scalar_lea.sflag [#allocation4], %s190_s11  ;;  %p9823_p10 = scmp.ne.s32.totalorder %s9238_s22, 0 }
  0x40   : > { %v4779_v4 = vpack.c.bf16 %v202_v2, %v200_v1  ;;  %v201_v5 = vld [vmem:[%s197_s26 + $0x10] sm:$0xff]  ;;  %v204_v6 = vld [vmem:[%s197_s26 + $0x28] sm:$0xff]  ;;  %v206_v7 = vld [vmem:[%s197_s26 + $0x38] sm:$0xff]  ;;  %s6022_s15 = smov [#allocation5]  }
  0x41   : > { %v4781_v8 = vpack.c.bf16 %v201_v5, %v199_v3  ;;  %v4783_v9 = vpack.c.bf16 %v206_v7, %v204_v6  ;;  %v203_v10 = vld [vmem:[%s197_s26 + $0x20] sm:$0xff]  ;;  %v205_v11 = vld [vmem:[%s197_s26 + $0x30] sm:$0xff]  ;;  %s5934_s26 = scalar_lea.vmem %s8910_s21, 1024  ;;  %s5938_s27 = sshll.u32 %s6022_s15, 4  ;;  %s5939_s27 = int_to_ptr.vmem [resolvable:$false] %s5938_s27 }
  0x42   : > { %4780 = vmatprep.subr.bf16.mxu0 %v4779_v4  ;;  %4788 = vmatprep.subr.bf16.mxu1 %v4779_v4  ;;  %v4785_v12 = vpack.c.bf16 %v205_v11, %v203_v10  ;;  %p5935_p8 = scmp.ne.s32.totalorder %s8910_s21, %s5934_s26  ;;  %s5940_s5 = scalar_lea.vmem %s5939_s27, 2048 }
  0x43   : > { %4782 = vmatpush1.bf16.msra.mxu0 %v4781_v8  ;;  %4790 = vmatpush1.bf16.msra.mxu1 %v4781_v8  ;;  %p5941_p1 = scmp.lt.s32.totalorder %s8910_s21, %s5939_s27  ;;  %p5942_p3 = scmp.lt.s32.totalorder %s5940_s5, %s5934_s26 }
  0x44   : > { %4784 = vmatprep.subr.bf16.mxu0 %v4783_v9  ;;  %4792 = vmatprep.subr.bf16.mxu1 %v4783_v9  ;;  %p5936_p11 = pnand %p5935_p8, %p9823_p10 }
  0x45   : > { %p5943_p5 = por %p5942_p3, %p5941_p1 }
  0x46   : > { %p5937_p13 = pneg %p5936_p11 }
  0x47   : > { %4786 = vmatpush1.bf16.msra.mxu0 %v4785_v12  ;;  %4794 = vmatpush1.bf16.msra.mxu1 %v4785_v12 }
  0x48   : > { %4796 = vmatprep.subr.bf16.mxu0 %v4779_v4  ;;  %p5944_p6 = pnand %p5943_p5, %p5937_p13 }
  0x4a   : > { %4628 = vmatmul.mubr.msk.f32.vlgmr.msra.gmra.mrb[0].mxu0 %vm211_vm0, %v207_v13  ;;  %4632 = vmatmul.mubr.msk.f32.vlgmr.msra.gmra.mrb[0].mxu1 %vm211_vm0, %v321_v14 }
  0x4b   : > { %407 = vmatprep.mubr.f32.mxu1 %v8971_v0  ;;  %294 = vmatprep.mubr.f32.mxu0 %v8971_v0 }
  0x4c   : > { %4798 = vmatpush1.bf16.msra.mxu0 %v4781_v8 }
  0x4d   : > { %4800 = vmatprep.subr.bf16.mxu0 %v4783_v9 }
  0x4e   : > { %4633 = vmatmul.mubr.msk.f32.gmra.mrb[2].mxu1 %vm211_vm0, %v322_v15  ;;  %4629 = vmatmul.mubr.msk.f32.gmra.mrb[2].mxu0 %vm211_vm0, %v208_v24 }
  0x4f   : > { %413 = vmatprep.mubr.f32.mxu1 %v8971_v0  ;;  %300 = vmatprep.mubr.f32.mxu0 %v8971_v0 }
  0x50   : > { %4802 = vmatpush1.bf16.msra.mxu0 %v4785_v12 }
  0x52   : > { %4634 = vmatmul.mubr.msk.f32.gmra.mrb[4].mxu1 %vm211_vm0, %v323_v16  ;;  %4630 = vmatmul.mubr.msk.f32.gmra.mrb[4].mxu0 %vm211_vm0, %v209_v25 }
  0x53   : > { %419 = vmatprep.mubr.f32.mxu1 %v8971_v0  ;;  %306 = vmatprep.mubr.f32.mxu0 %v8971_v0 }
  0x56   : > { %4635 = vmatmul.mubr.msk.f32.gmra.mrb[6].mxu1 %vm211_vm0, %v324_v17  ;;  %4631 = vmatmul.mubr.msk.f32.gmra.mrb[6].mxu0 %vm211_vm0, %v210_v27 }
  0x57   : > { %756 = vmatprep.mubr.f32.mxu1 %v8971_v0  ;;  %506 = vmatprep.mubr.f32.mxu0 %v8971_v0 }
  0x5a   : > { %4636 = vmatmul.mubr.msk.f32.vlgmr.msra.gmra.mrb[8].mxu0 %vm211_vm0, %v426_v29 }
  0x5b   : > { %512 = vmatprep.mubr.f32.mxu0 %v8971_v0 }
 0x11d   : > { %v290_v18 = vpop.f32.mrb[0].mxu0  ;;  %v403_v19 = vpop.f32.mrb[0].mxu1 }
 0x11e   : > { %v292_v20 = vpop.f32.mrb[1].mxu0  ;;  %v313_v21 = vmul.f32 0.35355338, %v290_v18  ;;  %v405_v22 = vpop.f32.mrb[1].mxu1 }
 0x11f   : > { %692 = vmatprep.subr.mxu1 %v405_v22  ;;  %v314_v23 = vmul.f32 0.35355338, %v292_v20 }
 0x120   : > { %531 = vxpose.xlu0.b32.start.end [1/1] (short) %v313_v21, 128  ;;  %693 = vmatpush1.msra.mxu1 %v403_v19 }
 0x121   : > { %v409_v33 = vpop.f32.mrb[2].mxu1 }
 0x122   : > { %v411_v34 = vpop.f32.mrb[3].mxu1 }
 0x123   : > { %1660 = vmatprep.subr.mxu0 %v411_v34 }
 0x124   : > { %1661 = vmatpush1.msra.mxu0 %v409_v33 }
 0x125   : > { %v6201_v36 = vpop.f32.mrb[4].mxu1 }
 0x126   : > { %9245 = vst [vmem:[#allocation8_spill] sm:$0xff] %v6201_v36  ;;  %v6204_v37 = vpop.f32.mrb[5].mxu1 }
 0x127   : > { %9246 = vst [vmem:[#allocation9_spill] sm:$0xff] %v6204_v37 }
 0x129   : > { %v6207_v39 = vpop.f32.mrb[6].mxu1 }
 0x12a   : > { %9247 = vst [vmem:[#allocation10_spill] sm:$0xff] %v6207_v39  ;;  %v6210_v40 = vpop.f32.mrb[7].mxu1 }
 0x12b   : > { %9248 = vst [vmem:[#allocation11_spill] sm:$0xff] %v6210_v40 }
 0x15d   : > { %563 = vxpose.xlu0.b32.start.end [1/1] (short) %v314_v23, 128 }
 0x1a0   : > { %v547_v26 = vpop.trf.xlu0 }
 0x1a1   : > { %4640 = vmatmul.mubr.msk.f32.vlgmr.msra.gmra.mrb[8].mxu1 %vm595_vm1, %v547_v26 }
 0x1a2   : > { %762 = vmatprep.mubr.f32.mxu1 %v8971_v0 }
 0x1a4   : > { %v548_v28 = vpop.trf.xlu0 }
 0x1a5   : > { %4641 = vmatmul.mubr.msk.f32.gmra.mrb[10].mxu1 %vm595_vm1, %v548_v28 }
 0x1a6   : > { %768 = vmatprep.mubr.f32.mxu1 %v8971_v0 }
 0x1a8   : > { %v549_v30 = vpop.trf.xlu0 }
 0x1a9   : > { %4642 = vmatmul.mubr.msk.f32.gmra.mrb[12].mxu1 %vm595_vm1, %v549_v30 }
 0x1aa   : > { %774 = vmatprep.mubr.f32.mxu1 %v8971_v0 }
 0x1ac   : > { %v550_v31 = vpop.trf.xlu0 }
 0x1ad   : > { %4643 = vmatmul.mubr.msk.f32.gmra.mrb[14].mxu1 %vm595_vm1, %v550_v31 }
 0x1ae   : > { %780 = vmatprep.mubr.f32.mxu1 %v8971_v0 }
 0x1b0   : > { %v551_v32 = vpop.trf.xlu0 }
 0x1b1   : > { %4644 = vmatmul.mubr.msk.f32.gmra.mrb[16].mxu1 %vm595_vm1, %v551_v32 }
 0x1b2   : > { %786 = vmatprep.mubr.f32.mxu1 %v8971_v0 }
 0x1b4   : > { %v552_v35 = vpop.trf.xlu0 }
 0x1b5   : > { %4645 = vmatmul.mubr.msk.f32.gmra.mrb[18].mxu1 %vm595_vm1, %v552_v35 }
 0x1b6   : > { %792 = vmatprep.mubr.f32.mxu1 %v8971_v0 }
 0x1b8   : > { %v553_v38 = vpop.trf.xlu0 }
 0x1b9   : > { %4646 = vmatmul.mubr.msk.f32.gmra.mrb[20].mxu1 %vm595_vm1, %v553_v38 }
 0x1ba   : > { %798 = vmatprep.mubr.f32.mxu1 %v8971_v0 }
 0x1bc   : > { %v554_v41 = vpop.trf.xlu0 }
 0x1bd   : > { %4647 = vmatmul.mubr.msk.f32.gmra.mrb[22].mxu1 %vm595_vm1, %v554_v41 }
 0x1be   : > { %804 = vmatprep.mubr.f32.mxu1 %v8971_v0 }
 0x1c0   : > { %v555_v42 = vpop.trf.xlu0 }
 0x1c1   : > { %4648 = vmatmul.mubr.msk.f32.gmra.mrb[24].mxu1 %vm595_vm1, %v555_v42 }
 0x1c2   : > { %810 = vmatprep.mubr.f32.mxu1 %v8971_v0 }
 0x1c4   : > { %v556_v43 = vpop.trf.xlu0 }
 0x1c5   : > { %4649 = vmatmul.mubr.msk.f32.gmra.mrb[26].mxu1 %vm595_vm1, %v556_v43 }
 0x1c6   : > { %816 = vmatprep.mubr.f32.mxu1 %v8971_v0 }
 0x1c8   : > { %v557_v44 = vpop.trf.xlu0 }
 0x1c9   : > { %4650 = vmatmul.mubr.msk.f32.gmra.mrb[28].mxu1 %vm595_vm1, %v557_v44 }
 0x1ca   : > { %822 = vmatprep.mubr.f32.mxu1 %v8971_v0 }
 0x1cc   : > { %v558_v45 = vpop.trf.xlu0 }
 0x1cd   : > { %4651 = vmatmul.mubr.msk.f32.gmra.mrb[30].mxu1 %vm595_vm1, %v558_v45 }
 0x1ce   : > { %828 = vmatprep.mubr.f32.mxu1 %v8971_v0 }
 0x1d0   : > { %v559_v46 = vpop.trf.xlu0 }
 0x1d1   : > { %4652 = vmatmul.mubr.msk.f32.gmra.mrb[32].mxu1 %vm595_vm1, %v559_v46 }
 0x1d2   : > { %834 = vmatprep.mubr.f32.mxu1 %v8971_v0 }
 0x1d4   : > { %v560_v47 = vpop.trf.xlu0 }
 0x1d5   : > { %4653 = vmatmul.mubr.msk.f32.gmra.mrb[34].mxu1 %vm595_vm1, %v560_v47 }
 0x1d6   : > { %840 = vmatprep.mubr.f32.mxu1 %v8971_v0 }
 0x1d8   : > { %v561_v48 = vpop.trf.xlu0 }
 0x1d9   : > { %4654 = vmatmul.mubr.msk.f32.gmra.mrb[36].mxu1 %vm595_vm1, %v561_v48 }
 0x1da   : > { %846 = vmatprep.mubr.f32.mxu1 %v8971_v0 }
 0x1dc   : > { %v562_v49 = vpop.trf.xlu0 }
 0x1dd   : > { %4655 = vmatmul.mubr.msk.f32.gmra.mrb[38].mxu1 %vm595_vm1, %v562_v49 }
 0x1de   : > { %852 = vmatprep.mubr.f32.mxu1 %v8971_v0 }
 0x1e0   : > { %v579_v50 = vpop.trf.xlu0 }
 0x1e1   : > { %4656 = vmatmul.mubr.msk.f32.gmra.mrb[40].mxu1 %vm595_vm1, %v579_v50 }
 0x1e2   : > { %858 = vmatprep.mubr.f32.mxu1 %v8971_v0 }
 0x1e4   : > { %v580_v51 = vpop.trf.xlu0 }
 0x1e5   : > { %4657 = vmatmul.mubr.msk.f32.gmra.mrb[42].mxu1 %vm595_vm1, %v580_v51 }
 0x1e6   : > { %864 = vmatprep.mubr.f32.mxu1 %v8971_v0 }
 0x1e8   : > { %v581_v52 = vpop.trf.xlu0 }
 0x1e9   : > { %4658 = vmatmul.mubr.msk.f32.gmra.mrb[44].mxu1 %vm595_vm1, %v581_v52 }
 0x1ea   : > { %870 = vmatprep.mubr.f32.mxu1 %v8971_v0 }
 0x1ec   : > { %v582_v53 = vpop.trf.xlu0 }
 0x1ed   : > { %4659 = vmatmul.mubr.msk.f32.gmra.mrb[46].mxu1 %vm595_vm1, %v582_v53 }
 0x1ee   : > { %876 = vmatprep.mubr.f32.mxu1 %v8971_v0 }
 0x1f0   : > { %v583_v54 = vpop.trf.xlu0 }
 0x1f1   : > { %4660 = vmatmul.mubr.msk.f32.gmra.mrb[48].mxu1 %vm595_vm1, %v583_v54 }
 0x1f2   : > { %882 = vmatprep.mubr.f32.mxu1 %v8971_v0 }
 0x1f4   : > { %v584_v55 = vpop.trf.xlu0 }
 0x1f5   : > { %4661 = vmatmul.mubr.msk.f32.gmra.mrb[50].mxu1 %vm595_vm1, %v584_v55 }
 0x1f6   : > { %888 = vmatprep.mubr.f32.mxu1 %v8971_v0 }
 0x1f8   : > { %v585_v56 = vpop.trf.xlu0 }
 0x1f9   : > { %4662 = vmatmul.mubr.msk.f32.gmra.mrb[52].mxu1 %vm595_vm1, %v585_v56 }
 0x1fa   : > { %894 = vmatprep.mubr.f32.mxu1 %v8971_v0 }
 0x1fc   : > { %v586_v57 = vpop.trf.xlu0 }
 0x1fd   : > { %4663 = vmatmul.mubr.msk.f32.gmra.mrb[54].mxu1 %vm595_vm1, %v586_v57 }
 0x1fe   : > { %900 = vmatprep.mubr.f32.mxu1 %v8971_v0 }
 0x200   : > { %v587_v58 = vpop.trf.xlu0 }
 0x201   : > { %4664 = vmatmul.mubr.msk.f32.gmra.mrb[56].mxu1 %vm595_vm1, %v587_v58 }
 0x202   : > { %906 = vmatprep.mubr.f32.mxu1 %v8971_v0 }
 0x204   : > { %v588_v59 = vpop.trf.xlu0 }
 0x205   : > { %4665 = vmatmul.mubr.msk.f32.gmra.mrb[58].mxu1 %vm595_vm1, %v588_v59 }
 0x206   : > { %912 = vmatprep.mubr.f32.mxu1 %v8971_v0 }
 0x208   : > { %v589_v60 = vpop.trf.xlu0 }
 0x209   : > { %4666 = vmatmul.mubr.msk.f32.gmra.mrb[60].mxu1 %vm595_vm1, %v589_v60 }
 0x20a   : > { %918 = vmatprep.mubr.f32.mxu1 %v8971_v0 }
 0x20c   : > { %v590_v61 = vpop.trf.xlu0 }
 0x20d   : > { %4667 = vmatmul.mubr.msk.f32.gmra.mrb[62].mxu1 %vm595_vm1, %v590_v61 }
 0x20e   : > { %924 = vmatprep.mubr.f32.mxu1 %v8971_v0 }
 0x210   : > { %v591_v62 = vpop.trf.xlu0 }
 0x211   : > { %4668 = vmatmul.mubr.msk.f32.gmra.mrb[64].mxu1 %vm595_vm1, %v591_v62 }
 0x212   : > { %930 = vmatprep.mubr.f32.mxu1 %v8971_v0 }
 0x214   : > { %v592_v63 = vpop.trf.xlu0 }
 0x215   : > { %4669 = vmatmul.mubr.msk.f32.gmra.mrb[66].mxu1 %vm595_vm1, %v592_v63 }
 0x216   : > { %936 = vmatprep.mubr.f32.mxu1 %v8971_v0 }
 0x218   : > { %v593_v1 = vpop.trf.xlu0 }
 0x219   : > { %4670 = vmatmul.mubr.msk.f32.gmra.mrb[68].mxu1 %vm595_vm1, %v593_v1 }
 0x21a   : > { %942 = vmatprep.mubr.f32.mxu1 %v8971_v0 }
 0x21c   : > { %v594_v2 = vpop.trf.xlu0 }
 0x21d   : > { %4671 = vmatmul.mubr.msk.f32.gmra.mrb[70].mxu1 %vm595_vm1, %v594_v2 }
 0x274   : > { %v6261_v3 = vpop.f32.mrb[8].mxu1 }
 0x275   : > { %v6263_v4 = vpop.f32.mrb[9].mxu1 }
 0x276   : > { %v949_v5 = vmax.f32 %v6261_v3, %v6263_v4 }
 0x278   : > { %950 = vmax.xlane.f32.xlu1 %v949_v5  ;;  %v6267_v6 = vpop.f32.mrb[10].mxu1 }
 0x279   : > { %v6269_v7 = vpop.f32.mrb[11].mxu1 }
 0x27a   : > { %v952_v8 = vmax.f32 %v6267_v6, %v6269_v7 }
 0x27c   : > { %953 = vmax.xlane.f32.xlu1 %v952_v8  ;;  %v6273_v9 = vpop.f32.mrb[12].mxu1 }
 0x27d   : > { %v6275_v10 = vpop.f32.mrb[13].mxu1 }
 0x27e   : > { %v955_v11 = vmax.f32 %v6273_v9, %v6275_v10 }
 0x280   : > { %956 = vmax.xlane.f32.xlu1 %v955_v11  ;;  %v6279_v12 = vpop.f32.mrb[14].mxu1 }
 0x281   : > { %v6281_v13 = vpop.f32.mrb[15].mxu1 }
 0x282   : > { %v958_v14 = vmax.f32 %v6279_v12, %v6281_v13 }
 0x284   : > { %959 = vmax.xlane.f32.xlu1 %v958_v14  ;;  %v6285_v15 = vpop.f32.mrb[16].mxu1 }
 0x285   : > { %v6287_v16 = vpop.f32.mrb[17].mxu1 }
 0x286   : > { %v961_v17 = vmax.f32 %v6285_v15, %v6287_v16 }
 0x288   : > { %962 = vmax.xlane.f32.xlu1 %v961_v17  ;;  %v6291_v18 = vpop.f32.mrb[18].mxu1 }
 0x289   : > { %v6293_v19 = vpop.f32.mrb[19].mxu1 }
 0x28a   : > { %v964_v20 = vmax.f32 %v6291_v18, %v6293_v19 }
 0x28c   : > { %965 = vmax.xlane.f32.xlu1 %v964_v20  ;;  %v6297_v21 = vpop.f32.mrb[20].mxu1 }
 0x28d   : > { %v6299_v22 = vpop.f32.mrb[21].mxu1 }
 0x28e   : > { %v967_v23 = vmax.f32 %v6297_v21, %v6299_v22 }
 0x290   : > { %968 = vmax.xlane.f32.xlu1 %v967_v23  ;;  %v6303_v24 = vpop.f32.mrb[22].mxu1 }
 0x291   : > { %v6305_v25 = vpop.f32.mrb[23].mxu1 }
 0x292   : > { %v970_v26 = vmax.f32 %v6303_v24, %v6305_v25 }
 0x294   : > { %971 = vmax.xlane.f32.xlu1 %v970_v26  ;;  %v6309_v27 = vpop.f32.mrb[24].mxu1 }
 0x295   : > { %v6311_v28 = vpop.f32.mrb[25].mxu1 }
 0x296   : > { %v973_v29 = vmax.f32 %v6309_v27, %v6311_v28 }
 0x298   : > { %974 = vmax.xlane.f32.xlu1 %v973_v29  ;;  %v6315_v30 = vpop.f32.mrb[26].mxu1 }
 0x299   : > { %v6317_v31 = vpop.f32.mrb[27].mxu1 }
 0x29a   : > { %v976_v32 = vmax.f32 %v6315_v30, %v6317_v31 }
 0x29c   : > { %977 = vmax.xlane.f32.xlu1 %v976_v32  ;;  %v6321_v33 = vpop.f32.mrb[28].mxu1 }
 0x29d   : > { %v6323_v34 = vpop.f32.mrb[29].mxu1 }
 0x29e   : > { %v979_v35 = vmax.f32 %v6321_v33, %v6323_v34 }
 0x2a0   : > { %980 = vmax.xlane.f32.xlu1 %v979_v35  ;;  %v6327_v38 = vpop.f32.mrb[30].mxu1 }
 0x2a1   : > { %v6329_v41 = vpop.f32.mrb[31].mxu1 }
 0x2a2   : > { %v982_v42 = vmax.f32 %v6327_v38, %v6329_v41 }
 0x2a4   : > { %983 = vmax.xlane.f32.xlu1 %v982_v42  ;;  %v6333_v43 = vpop.f32.mrb[32].mxu1 }
 0x2a5   : > { %v6335_v44 = vpop.f32.mrb[33].mxu1 }
 0x2a6   : > { %v985_v45 = vmax.f32 %v6333_v43, %v6335_v44 }
 0x2a8   : > { %986 = vmax.xlane.f32.xlu1 %v985_v45  ;;  %v6339_v46 = vpop.f32.mrb[34].mxu1 }
 0x2a9   : > { %v6341_v47 = vpop.f32.mrb[35].mxu1 }
 0x2aa   : > { %v988_v48 = vmax.f32 %v6339_v46, %v6341_v47 }
 0x2ac   : > { %989 = vmax.xlane.f32.xlu1 %v988_v48  ;;  %v6345_v49 = vpop.f32.mrb[36].mxu1 }
 0x2ad   : > { %v6347_v50 = vpop.f32.mrb[37].mxu1 }
 0x2ae   : > { %v991_v51 = vmax.f32 %v6345_v49, %v6347_v50 }
 0x2b0   : > { %992 = vmax.xlane.f32.xlu1 %v991_v51  ;;  %v6351_v52 = vpop.f32.mrb[38].mxu1 }
 0x2b1   : > { %v6353_v53 = vpop.f32.mrb[39].mxu1 }
 0x2b2   : > { %v994_v54 = vmax.f32 %v6351_v52, %v6353_v53 }
 0x2b4   : > { %995 = vmax.xlane.f32.xlu1 %v994_v54  ;;  %v6357_v55 = vpop.f32.mrb[40].mxu1 }
 0x2b5   : > { %v6359_v56 = vpop.f32.mrb[41].mxu1 }
 0x2b6   : > { %v997_v57 = vmax.f32 %v6357_v55, %v6359_v56 }
 0x2b8   : > { %998 = vmax.xlane.f32.xlu1 %v997_v57  ;;  %v6363_v58 = vpop.f32.mrb[42].mxu1 }
 0x2b9   : > { %v6365_v59 = vpop.f32.mrb[43].mxu1 }
 0x2ba   : > { %v1000_v60 = vmax.f32 %v6363_v58, %v6365_v59 }
 0x2bc   : > { %1001 = vmax.xlane.f32.xlu0 %v1000_v60  ;;  %v6369_v61 = vpop.f32.mrb[44].mxu1 }
 0x2bd   : > { %v6371_v62 = vpop.f32.mrb[45].mxu1 }
 0x2be   : > { %v1003_v63 = vmax.f32 %v6369_v61, %v6371_v62 }
 0x2c0   : > { %1004 = vmax.xlane.f32.xlu1 %v1003_v63  ;;  %v6375_v1 = vpop.f32.mrb[46].mxu1 }
 0x2c1   : > { %v6377_v2 = vpop.f32.mrb[47].mxu1 }
 0x2c2   : > { %v1006_v5 = vmax.f32 %v6375_v1, %v6377_v2 }
 0x2c4   : > { %1007 = vmax.xlane.f32.xlu1 %v1006_v5  ;;  %v6381_v8 = vpop.f32.mrb[48].mxu1 }
 0x2c5   : > { %v6383_v11 = vpop.f32.mrb[49].mxu1 }
 0x2c6   : > { %v1009_v14 = vmax.f32 %v6381_v8, %v6383_v11 }
 0x2c8   : > { %1010 = vmax.xlane.f32.xlu1 %v1009_v14  ;;  %v6387_v17 = vpop.f32.mrb[50].mxu1 }
 0x2c9   : > { %v6389_v20 = vpop.f32.mrb[51].mxu1 }
 0x2ca   : > { %v1012_v23 = vmax.f32 %v6387_v17, %v6389_v20 }
 0x2cc   : > { %1013 = vmax.xlane.f32.xlu1 %v1012_v23  ;;  %v6393_v26 = vpop.f32.mrb[52].mxu1 }
 0x2cd   : > { %v6395_v29 = vpop.f32.mrb[53].mxu1 }
 0x2ce   : > { %v1015_v32 = vmax.f32 %v6393_v26, %v6395_v29 }
 0x2d0   : > { %1016 = vmax.xlane.f32.xlu1 %v1015_v32  ;;  %v6399_v35 = vpop.f32.mrb[54].mxu1 }
 0x2d1   : > { %v6401_v42 = vpop.f32.mrb[55].mxu1 }
 0x2d2   : > { %v1018_v45 = vmax.f32 %v6399_v35, %v6401_v42 }
 0x2d4   : > { %1019 = vmax.xlane.f32.xlu1 %v1018_v45  ;;  %v6405_v48 = vpop.f32.mrb[56].mxu1 }
 0x2d5   : > { %v6407_v51 = vpop.f32.mrb[57].mxu1 }
 0x2d6   : > { %v1021_v54 = vmax.f32 %v6405_v48, %v6407_v51 }
 0x2d8   : > { %1022 = vmax.xlane.f32.xlu1 %v1021_v54  ;;  %v6411_v57 = vpop.f32.mrb[58].mxu1 }
 0x2d9   : > { %v6413_v60 = vpop.f32.mrb[59].mxu1 }
 0x2da   : > { %9249 = vst [vmem:[#allocation12_spill] sm:$0xff] %v6413_v60  ;;  %v1024_v63 = vmax.f32 %v6411_v57, %v6413_v60 }
 0x2dc   : > { %1025 = vmax.xlane.f32.xlu1 %v1024_v63  ;;  %v6417_v5 = vpop.f32.mrb[60].mxu1 }
 0x2dd   : > { %9250 = vst [vmem:[#allocation13_spill] sm:$0xff] %v6417_v5  ;;  %v6419_v14 = vpop.f32.mrb[61].mxu1 }
 0x2de   : > { %9251 = vst [vmem:[#allocation14_spill] sm:$0xff] %v6419_v14  ;;  %v1027_v23 = vmax.f32 %v6417_v5, %v6419_v14 }
 0x2e0   : > { %1028 = vmax.xlane.f32.xlu1 %v1027_v23  ;;  %v6423_v32 = vpop.f32.mrb[62].mxu1 }
 0x2e1   : > { %9252 = vst [vmem:[#allocation15_spill] sm:$0xff] %v6423_v32  ;;  %v6425_v45 = vpop.f32.mrb[63].mxu1 }
 0x2e2   : > { %9253 = vst [vmem:[#allocation16_spill] sm:$0xff] %v6425_v45  ;;  %v1030_v54 = vmax.f32 %v6423_v32, %v6425_v45 }
 0x2e4   : > { %1031 = vmax.xlane.f32.xlu1 %v1030_v54  ;;  %v6429_v0 = vpop.f32.mrb[64].mxu1 }
 0x2e5   : > { %9254 = vst [vmem:[#allocation17_spill] sm:$0xff] %v6429_v0  ;;  %v6431_v39 = vpop.f32.mrb[65].mxu1 }
 0x2e6   : > { %9255 = vst [vmem:[#allocation18_spill] sm:$0xff] %v6431_v39  ;;  %v1033_v63 = vmax.f32 %v6429_v0, %v6431_v39  ;;  %v6453_v0 = vpop.f32.mrb[2].mxu0 }
 0x2e7   : > { %9262 = vst [vmem:[#allocation25_spill] sm:$0xff] %v6453_v0 }
 0x2e8   : > { %1034 = vmax.xlane.f32.xlu1 %v1033_v63  ;;  %v6435_v40 = vpop.f32.mrb[66].mxu1 }
 0x2e9   : > { %9256 = vst [vmem:[#allocation19_spill] sm:$0xff] %v6435_v40  ;;  %v6437_v36 = vpop.f32.mrb[67].mxu1 }
 0x2ea   : > { %9257 = vst [vmem:[#allocation20_spill] sm:$0xff] %v6437_v36  ;;  %v1036_v23 = vmax.f32 %v6435_v40, %v6437_v36  ;;  %v6455_v36 = vpop.f32.mrb[3].mxu0 }
 0x2eb   : > { %9263 = vst [vmem:[#allocation26_spill] sm:$0xff] %v6455_v36 }
 0x2ec   : > { %1037 = vmax.xlane.f32.xlu1 %v1036_v23  ;;  %v6441_v37 = vpop.f32.mrb[68].mxu1 }
 0x2ed   : > { %9258 = vst [vmem:[#allocation21_spill] sm:$0xff] %v6441_v37  ;;  %v6443_v45 = vpop.f32.mrb[69].mxu1 }
 0x2ee   : > { %9259 = vst [vmem:[#allocation22_spill] sm:$0xff] %v6443_v45  ;;  %v1039_v54 = vmax.f32 %v6441_v37, %v6443_v45 }
 0x2f0   : > { %1040 = vmax.xlane.f32.xlu1 %v1039_v54  ;;  %v6447_v32 = vpop.f32.mrb[70].mxu1 }
 0x2f1   : > { %9260 = vst [vmem:[#allocation23_spill] sm:$0xff] %v6447_v32  ;;  %v6449_v39 = vpop.f32.mrb[71].mxu1 }
 0x2f2   : > { %9261 = vst [vmem:[#allocation24_spill] sm:$0xff] %v6449_v39  ;;  %v1042_v63 = vmax.f32 %v6447_v32, %v6449_v39 }
 0x2f4   : > { %1043 = vmax.xlane.f32.xlu1 %v1042_v63 }
 0x305   : > { %v951_v23 = vpop.xlane.xlu1 %950 }
 0x306   : > { %v1045_v40 = vsub.f32 %v6261_v3, %v951_v23  ;;  %v1046_v14 = vsub.f32 %v6263_v4, %v951_v23 }
 0x308   : > { %v1109_v5 = vmul.f32 1.442695, %v1045_v40  ;;  %v1111_v45 = vmul.f32 1.442695, %v1046_v14 }
 0x309   : > { %v954_v54 = vpop.xlane.xlu1 %953 }
 0x30a   : > { %5138 = vpow2.f32 %v1109_v5  ;;  %v1047_v37 = vsub.f32 %v6267_v6, %v954_v54  ;;  %v1048_v60 = vsub.f32 %v6269_v7, %v954_v54 }
 0x30b   : > { %5140 = vpow2.f32 %v1111_v45 }
 0x30c   : > { %v1113_v39 = vmul.f32 1.442695, %v1047_v37  ;;  %v1115_v63 = vmul.f32 1.442695, %v1048_v60 }
 0x30d   : > { %v957_v32 = vpop.xlane.xlu1 %956 }
 0x30e   : > { %5142 = vpow2.f32 %v1113_v39  ;;  %v1049_v36 = vsub.f32 %v6273_v9, %v957_v32  ;;  %v1050_v0 = vsub.f32 %v6275_v10, %v957_v32 }
 0x30f   : > { %5144 = vpow2.f32 %v1115_v63 }
 0x310   : > { %v1117_v3 = vmul.f32 1.442695, %v1049_v36  ;;  %v1119_v4 = vmul.f32 1.442695, %v1050_v0 }
 0x311   : > { %v960_v40 = vpop.xlane.xlu1 %959 }
 0x312   : > { %5146 = vpow2.f32 %v1117_v3  ;;  %v1051_v5 = vsub.f32 %v6279_v12, %v960_v40  ;;  %v1052_v6 = vsub.f32 %v6281_v13, %v960_v40 }
 0x313   : > { %5148 = vpow2.f32 %v1119_v4 }
 0x314   : > { %v6465_v7 = vpop.eup %5138  ;;  %v1121_v37 = vmul.f32 1.442695, %v1051_v5  ;;  %v1123_v60 = vmul.f32 1.442695, %v1052_v6 }
 0x315   : > { %v6467_v14 = vpop.eup %5140  ;;  %v963_v39 = vpop.xlane.xlu1 %962 }
 0x316   : > { %5150 = vpow2.f32 %v1121_v37  ;;  %v1053_v9 = vsub.f32 %v6285_v15, %v963_v39  ;;  %v1054_v36 = vsub.f32 %v6287_v16, %v963_v39  ;;  %v1237_v0 = vadd.f32 %v6467_v14, %v6465_v7 }
 0x317   : > { %5152 = vpow2.f32 %v1123_v60 }
 0x318   : > { %v6473_v10 = vpop.eup %5142  ;;  %v1125_v12 = vmul.f32 1.442695, %v1053_v9  ;;  %v1127_v13 = vmul.f32 1.442695, %v1054_v36  ;;  %1238 = vadd.xlane.f32.xlu1 %v1237_v0 }
 0x319   : > { %v6475_v32 = vpop.eup %5144  ;;  %v966_v45 = vpop.xlane.xlu1 %965 }
 0x31a   : > { %5154 = vpow2.f32 %v1125_v12  ;;  %v1055_v23 = vsub.f32 %v6291_v18, %v966_v45  ;;  %v1056_v54 = vsub.f32 %v6293_v19, %v966_v45  ;;  %v1240_v15 = vadd.f32 %v6475_v32, %v6473_v10 }
 0x31b   : > { %5156 = vpow2.f32 %v1127_v13 }
 0x31c   : > { %v6481_v16 = vpop.eup %5146  ;;  %v1129_v63 = vmul.f32 1.442695, %v1055_v23  ;;  %v1131_v3 = vmul.f32 1.442695, %v1056_v54  ;;  %1241 = vadd.xlane.f32.xlu1 %v1240_v15 }
 0x31d   : > { %v6483_v4 = vpop.eup %5148  ;;  %v969_v40 = vpop.xlane.xlu1 %968 }
 0x31e   : > { %5158 = vpow2.f32 %v1129_v63  ;;  %v1057_v5 = vsub.f32 %v6297_v21, %v969_v40  ;;  %v1058_v6 = vsub.f32 %v6299_v22, %v969_v40  ;;  %v1243_v18 = vadd.f32 %v6483_v4, %v6481_v16 }
 0x31f   : > { %5160 = vpow2.f32 %v1131_v3 }
 0x320   : > { %v6489_v19 = vpop.eup %5150  ;;  %v1133_v37 = vmul.f32 1.442695, %v1057_v5  ;;  %v1135_v60 = vmul.f32 1.442695, %v1058_v6  ;;  %1244 = vadd.xlane.f32.xlu1 %v1243_v18 }
 0x321   : > { %v6491_v39 = vpop.eup %5152  ;;  %v972_v9 = vpop.xlane.xlu1 %971 }
 0x322   : > { %5162 = vpow2.f32 %v1133_v37  ;;  %v1059_v36 = vsub.f32 %v6303_v24, %v972_v9  ;;  %v1060_v0 = vsub.f32 %v6305_v25, %v972_v9  ;;  %v1246_v21 = vadd.f32 %v6491_v39, %v6489_v19 }
 0x323   : > { %5164 = vpow2.f32 %v1135_v60 }
 0x324   : > { %v6497_v22 = vpop.eup %5154  ;;  %v1137_v12 = vmul.f32 1.442695, %v1059_v36  ;;  %v1139_v13 = vmul.f32 1.442695, %v1060_v0  ;;  %1247 = vadd.xlane.f32.xlu1 %v1246_v21 }
 0x325   : > { %v6499_v45 = vpop.eup %5156  ;;  %v975_v23 = vpop.xlane.xlu1 %974 }
 0x326   : > { %5166 = vpow2.f32 %v1137_v12  ;;  %v1061_v54 = vsub.f32 %v6309_v27, %v975_v23  ;;  %v1062_v15 = vsub.f32 %v6311_v28, %v975_v23  ;;  %v1249_v24 = vadd.f32 %v6499_v45, %v6497_v22 }
 0x327   : > { %5168 = vpow2.f32 %v1139_v13 }
 0x328   : > { %v6505_v25 = vpop.eup %5158  ;;  %v1141_v63 = vmul.f32 1.442695, %v1061_v54  ;;  %v1143_v3 = vmul.f32 1.442695, %v1062_v15  ;;  %1250 = vadd.xlane.f32.xlu1 %v1249_v24 }
 0x329   : > { %v6507_v40 = vpop.eup %5160  ;;  %v978_v5 = vpop.xlane.xlu1 %977 }
 0x32a   : > { %5170 = vpow2.f32 %v1141_v63  ;;  %v1063_v6 = vsub.f32 %v6315_v30, %v978_v5  ;;  %v1064_v18 = vsub.f32 %v6317_v31, %v978_v5  ;;  %v1252_v27 = vadd.f32 %v6507_v40, %v6505_v25 }
 0x32b   : > { %5172 = vpow2.f32 %v1143_v3 }
 0x32c   : > { %v6513_v28 = vpop.eup %5162  ;;  %v1145_v37 = vmul.f32 1.442695, %v1063_v6  ;;  %v1147_v60 = vmul.f32 1.442695, %v1064_v18  ;;  %1253 = vadd.xlane.f32.xlu1 %v1252_v27 }
 0x32d   : > { %v6515_v9 = vpop.eup %5164  ;;  %v981_v36 = vpop.xlane.xlu1 %980 }
 0x32e   : > { %5174 = vpow2.f32 %v1145_v37  ;;  %v1065_v0 = vsub.f32 %v6321_v33, %v981_v36  ;;  %v1066_v21 = vsub.f32 %v6323_v34, %v981_v36  ;;  %v1255_v30 = vadd.f32 %v6515_v9, %v6513_v28 }
 0x32f   : > { %5176 = vpow2.f32 %v1147_v60 }
 0x330   : > { %v6521_v31 = vpop.eup %5166  ;;  %v1149_v12 = vmul.f32 1.442695, %v1065_v0  ;;  %v1151_v13 = vmul.f32 1.442695, %v1066_v21  ;;  %1256 = vadd.xlane.f32.xlu1 %v1255_v30 }
 0x331   : > { %v6523_v23 = vpop.eup %5168  ;;  %v984_v54 = vpop.xlane.xlu1 %983 }
 0x332   : > { %5178 = vpow2.f32 %v1149_v12  ;;  %v1067_v15 = vsub.f32 %v6327_v38, %v984_v54  ;;  %v1068_v24 = vsub.f32 %v6329_v41, %v984_v54  ;;  %v1258_v33 = vadd.f32 %v6523_v23, %v6521_v31 }
 0x333   : > { %5180 = vpow2.f32 %v1151_v13 }
 0x334   : > { %v6529_v34 = vpop.eup %5170  ;;  %v1153_v63 = vmul.f32 1.442695, %v1067_v15  ;;  %v1155_v3 = vmul.f32 1.442695, %v1068_v24  ;;  %1259 = vadd.xlane.f32.xlu1 %v1258_v33 }
 0x335   : > { %v6531_v5 = vpop.eup %5172  ;;  %v987_v6 = vpop.xlane.xlu1 %986 }
 0x336   : > { %5182 = vpow2.f32 %v1153_v63  ;;  %v1069_v18 = vsub.f32 %v6333_v43, %v987_v6  ;;  %v1070_v27 = vsub.f32 %v6335_v44, %v987_v6  ;;  %v1261_v38 = vadd.f32 %v6531_v5, %v6529_v34 }
 0x337   : > { %5184 = vpow2.f32 %v1155_v3 }
 0x338   : > { %v6537_v41 = vpop.eup %5174  ;;  %v1157_v37 = vmul.f32 1.442695, %v1069_v18  ;;  %v1159_v60 = vmul.f32 1.442695, %v1070_v27  ;;  %1262 = vadd.xlane.f32.xlu1 %v1261_v38 }
 0x339   : > { %v6539_v36 = vpop.eup %5176  ;;  %v990_v0 = vpop.xlane.xlu1 %989 }
 0x33a   : > { %5186 = vpow2.f32 %v1157_v37  ;;  %v1071_v21 = vsub.f32 %v6339_v46, %v990_v0  ;;  %v1072_v30 = vsub.f32 %v6341_v47, %v990_v0  ;;  %v1264_v43 = vadd.f32 %v6539_v36, %v6537_v41 }
 0x33b   : > { %5188 = vpow2.f32 %v1159_v60 }
 0x33c   : > { %v6545_v44 = vpop.eup %5178  ;;  %v1161_v12 = vmul.f32 1.442695, %v1071_v21  ;;  %v1163_v13 = vmul.f32 1.442695, %v1072_v30  ;;  %1265 = vadd.xlane.f32.xlu1 %v1264_v43 }
 0x33d   : > { %v6547_v54 = vpop.eup %5180  ;;  %v993_v15 = vpop.xlane.xlu1 %992 }
 0x33e   : > { %5190 = vpow2.f32 %v1161_v12  ;;  %v1073_v24 = vsub.f32 %v6345_v49, %v993_v15  ;;  %v1074_v33 = vsub.f32 %v6347_v50, %v993_v15  ;;  %v1267_v46 = vadd.f32 %v6547_v54, %v6545_v44 }
 0x33f   : > { %5192 = vpow2.f32 %v1163_v13 }
 0x340   : > { %v6553_v47 = vpop.eup %5182  ;;  %v1165_v63 = vmul.f32 1.442695, %v1073_v24  ;;  %v1167_v3 = vmul.f32 1.442695, %v1074_v33  ;;  %1268 = vadd.xlane.f32.xlu1 %v1267_v46 }
 0x341   : > { %v6555_v6 = vpop.eup %5184  ;;  %v996_v18 = vpop.xlane.xlu1 %995 }
 0x342   : > { %5194 = vpow2.f32 %v1165_v63  ;;  %v1075_v27 = vsub.f32 %v6351_v52, %v996_v18  ;;  %v1076_v38 = vsub.f32 %v6353_v53, %v996_v18  ;;  %v1270_v49 = vadd.f32 %v6555_v6, %v6553_v47 }
 0x343   : > { %5196 = vpow2.f32 %v1167_v3 }
 0x344   : > { %v6561_v50 = vpop.eup %5186  ;;  %v1169_v37 = vmul.f32 1.442695, %v1075_v27  ;;  %v1171_v60 = vmul.f32 1.442695, %v1076_v38  ;;  %1271 = vadd.xlane.f32.xlu1 %v1270_v49 }
 0x345   : > { %v6563_v0 = vpop.eup %5188  ;;  %v999_v21 = vpop.xlane.xlu1 %998 }
 0x346   : > { %5198 = vpow2.f32 %v1169_v37  ;;  %v1077_v30 = vsub.f32 %v6357_v55, %v999_v21  ;;  %v1078_v43 = vsub.f32 %v6359_v56, %v999_v21  ;;  %v1273_v52 = vadd.f32 %v6563_v0, %v6561_v50 }
 0x347   : > { %5200 = vpow2.f32 %v1171_v60 }
 0x348   : > { %v6569_v53 = vpop.eup %5190  ;;  %v1173_v12 = vmul.f32 1.442695, %v1077_v30  ;;  %v1175_v13 = vmul.f32 1.442695, %v1078_v43  ;;  %1274 = vadd.xlane.f32.xlu0 %v1273_v52 }
 0x349   : > { %v6571_v15 = vpop.eup %5192  ;;  %v1002_v24 = vpop.xlane.xlu0 %1001 }
 0x34a   : > { %5202 = vpow2.f32 %v1173_v12  ;;  %v1079_v33 = vsub.f32 %v6363_v58, %v1002_v24  ;;  %v1080_v46 = vsub.f32 %v6365_v59, %v1002_v24  ;;  %v1276_v55 = vadd.f32 %v6571_v15, %v6569_v53 }
 0x34b   : > { %5204 = vpow2.f32 %v1175_v13 }
 0x34c   : > { %v6577_v56 = vpop.eup %5194  ;;  %v1177_v63 = vmul.f32 1.442695, %v1079_v33  ;;  %v1179_v3 = vmul.f32 1.442695, %v1080_v46  ;;  %1277 = vadd.xlane.f32.xlu1 %v1276_v55 }
 0x34d   : > { %v6579_v18 = vpop.eup %5196  ;;  %v1005_v27 = vpop.xlane.xlu1 %1004 }
 0x34e   : > { %5206 = vpow2.f32 %v1177_v63  ;;  %v1081_v38 = vsub.f32 %v6369_v61, %v1005_v27  ;;  %v1082_v49 = vsub.f32 %v6371_v62, %v1005_v27  ;;  %v1279_v58 = vadd.f32 %v6579_v18, %v6577_v56 }
 0x34f   : > { %5208 = vpow2.f32 %v1179_v3 }
 0x350   : > { %v6585_v59 = vpop.eup %5198  ;;  %v1181_v37 = vmul.f32 1.442695, %v1081_v38  ;;  %v1183_v60 = vmul.f32 1.442695, %v1082_v49  ;;  %1280 = vadd.xlane.f32.xlu0 %v1279_v58 }
 0x351   : > { %v6587_v21 = vpop.eup %5200  ;;  %v1008_v30 = vpop.xlane.xlu1 %1007 }
 0x352   : > { %5210 = vpow2.f32 %v1181_v37  ;;  %v1083_v43 = vsub.f32 %v6375_v1, %v1008_v30  ;;  %v1084_v52 = vsub.f32 %v6377_v2, %v1008_v30  ;;  %v1282_v61 = vadd.f32 %v6587_v21, %v6585_v59 }
 0x353   : > { %5212 = vpow2.f32 %v1183_v60 }
 0x354   : > { %v6593_v62 = vpop.eup %5202  ;;  %v1185_v12 = vmul.f32 1.442695, %v1083_v43  ;;  %v1187_v13 = vmul.f32 1.442695, %v1084_v52  ;;  %1283 = vadd.xlane.f32.xlu1 %v1282_v61 }
 0x355   : > { %v6595_v24 = vpop.eup %5204  ;;  %v1011_v33 = vpop.xlane.xlu1 %1010 }
 0x356   : > { %5214 = vpow2.f32 %v1185_v12  ;;  %v1085_v46 = vsub.f32 %v6381_v8, %v1011_v33  ;;  %v1086_v55 = vsub.f32 %v6383_v11, %v1011_v33  ;;  %v1285_v1 = vadd.f32 %v6595_v24, %v6593_v62 }
 0x357   : > { %5216 = vpow2.f32 %v1187_v13 }
 0x358   : > { %v6601_v2 = vpop.eup %5206  ;;  %v1189_v63 = vmul.f32 1.442695, %v1085_v46  ;;  %v1191_v3 = vmul.f32 1.442695, %v1086_v55  ;;  %1286 = vadd.xlane.f32.xlu1 %v1285_v1 }
 0x359   : > { %v6603_v27 = vpop.eup %5208  ;;  %v1014_v38 = vpop.xlane.xlu1 %1013 }
 0x35a   : > { %5218 = vpow2.f32 %v1189_v63  ;;  %v1087_v49 = vsub.f32 %v6387_v17, %v1014_v38  ;;  %v1088_v58 = vsub.f32 %v6389_v20, %v1014_v38  ;;  %v1288_v8 = vadd.f32 %v6603_v27, %v6601_v2 }
 0x35b   : > { %5220 = vpow2.f32 %v1191_v3 }
 0x35c   : > { %v6609_v11 = vpop.eup %5210  ;;  %v1193_v37 = vmul.f32 1.442695, %v1087_v49  ;;  %v1195_v60 = vmul.f32 1.442695, %v1088_v58  ;;  %1289 = vadd.xlane.f32.xlu1 %v1288_v8 }
 0x35d   : > { %v6611_v30 = vpop.eup %5212  ;;  %v1017_v43 = vpop.xlane.xlu1 %1016 }
 0x35e   : > { %5222 = vpow2.f32 %v1193_v37  ;;  %v1089_v52 = vsub.f32 %v6393_v26, %v1017_v43  ;;  %v1090_v61 = vsub.f32 %v6395_v29, %v1017_v43  ;;  %v1291_v17 = vadd.f32 %v6611_v30, %v6609_v11 }
 0x35f   : > { %5224 = vpow2.f32 %v1195_v60 }
 0x360   : > { %v6617_v20 = vpop.eup %5214  ;;  %v1197_v12 = vmul.f32 1.442695, %v1089_v52  ;;  %v1199_v13 = vmul.f32 1.442695, %v1090_v61  ;;  %1292 = vadd.xlane.f32.xlu1 %v1291_v17  ;;  %v9265_v17 = vld [vmem:[#allocation12_spill] sm:$0xff] }
 0x361   : > { %v6619_v33 = vpop.eup %5216  ;;  %v1020_v46 = vpop.xlane.xlu1 %1019 }
 0x362   : > { %5226 = vpow2.f32 %v1197_v12  ;;  %v1091_v55 = vsub.f32 %v6399_v35, %v1020_v46  ;;  %v1092_v1 = vsub.f32 %v6401_v42, %v1020_v46  ;;  %v1294_v26 = vadd.f32 %v6619_v33, %v6617_v20 }
 0x363   : > { %5228 = vpow2.f32 %v1199_v13 }
 0x364   : > { %v6625_v29 = vpop.eup %5218  ;;  %v1201_v63 = vmul.f32 1.442695, %v1091_v55  ;;  %v1203_v3 = vmul.f32 1.442695, %v1092_v1  ;;  %1295 = vadd.xlane.f32.xlu1 %v1294_v26  ;;  %v9268_v26 = vld [vmem:[#allocation13_spill] sm:$0xff] }
 0x365   : > { %v6627_v38 = vpop.eup %5220  ;;  %v1023_v49 = vpop.xlane.xlu1 %1022 }
 0x366   : > { %5230 = vpow2.f32 %v1201_v63  ;;  %v1093_v58 = vsub.f32 %v6405_v48, %v1023_v49  ;;  %v1094_v8 = vsub.f32 %v6407_v51, %v1023_v49  ;;  %v1297_v35 = vadd.f32 %v6627_v38, %v6625_v29 }
 0x367   : > { %5232 = vpow2.f32 %v1203_v3  ;;  %v9269_v3 = vld [vmem:[#allocation14_spill] sm:$0xff] }
 0x368   : > { %v6633_v42 = vpop.eup %5222  ;;  %v1205_v37 = vmul.f32 1.442695, %v1093_v58  ;;  %v1207_v60 = vmul.f32 1.442695, %v1094_v8  ;;  %1298 = vadd.xlane.f32.xlu1 %v1297_v35 }
 0x369   : > { %9264 = vst [vmem:[#allocation27_spill] sm:$0xff] %v6633_v42  ;;  %v6635_v43 = vpop.eup %5224  ;;  %v1026_v52 = vpop.xlane.xlu1 %1025 }
 0x36a   : > { %5234 = vpow2.f32 %v1205_v37  ;;  %v1095_v61 = vsub.f32 %v6411_v57, %v1026_v52  ;;  %v1096_v12 = vsub.f32 %v9265_v17, %v1026_v52  ;;  %v1300_v48 = vadd.f32 %v6635_v43, %v6633_v42  ;;  %v427_v52 = vld [vmem:[%s8964_s1 + $0x48] sm:$0xff] }
 0x36b   : > { %5236 = vpow2.f32 %v1207_v60  ;;  %4637 = vmatmul.mubr.msk.f32.gmra.mrb[10].mxu0 %vm211_vm0, %v427_v52  ;;  %v9272_v17 = vmov 0.0  }
 0x36c   : > { %v6641_v51 = vpop.eup %5226  ;;  %v1209_v13 = vmul.f32 1.442695, %v1095_v61  ;;  %v1211_v46 = vmul.f32 1.442695, %v1096_v12  ;;  %1301 = vadd.xlane.f32.xlu1 %v1300_v48  ;;  %518 = vmatprep.mubr.f32.mxu0 %v9272_v17 }
 0x36d   : > { %9266 = vst [vmem:[#allocation12_spill] sm:$0xff] %v6641_v51  ;;  %v6643_v55 = vpop.eup %5228  ;;  %v1029_v1 = vpop.xlane.xlu1 %1028 }
 0x36e   : > { %9267 = vst [vmem:[#allocation28_spill] sm:$0xff] %v6643_v55  ;;  %5238 = vpow2.f32 %v1209_v13  ;;  %v1097_v63 = vsub.f32 %v9268_v26, %v1029_v1  ;;  %v1098_v49 = vsub.f32 %v9269_v3, %v1029_v1  ;;  %v1303_v57 = vadd.f32 %v6643_v55, %v6641_v51  ;;  %v9275_v1 = vld [vmem:[#allocation17_spill] sm:$0xff] }
 0x36f   : > { %5240 = vpow2.f32 %v1211_v46  ;;  %v428_v46 = vld [vmem:[%s8964_s1 + $0x50] sm:$0xff] }
 0x370   : > { %v6649_v58 = vpop.eup %5230  ;;  %v1213_v8 = vmul.f32 1.442695, %v1097_v63  ;;  %v1215_v35 = vmul.f32 1.442695, %v1098_v49  ;;  %1304 = vadd.xlane.f32.xlu1 %v1303_v57  ;;  %v9276_v63 = vld [vmem:[#allocation18_spill] sm:$0xff]  ;;  %4638 = vmatmul.mubr.msk.f32.gmra.mrb[12].mxu0 %vm211_vm0, %v428_v46  ;;  %v9281_v46 = vld [vmem:[#allocation20_spill] sm:$0xff] }
 0x371   : > { %9270 = vst [vmem:[#allocation13_spill] sm:$0xff] %v6649_v58  ;;  %v6651_v37 = vpop.eup %5232  ;;  %v6653_v60 = vpop.xlane.xlu1 %1031  ;;  %524 = vmatprep.mubr.f32.mxu0 %v9272_v17 }
 0x372   : > { %9271 = vst [vmem:[#allocation14_spill] sm:$0xff] %v6651_v37  ;;  %5242 = vpow2.f32 %v1213_v8  ;;  %v1306_v61 = vadd.f32 %v6651_v37, %v6649_v58  ;;  %v9279_v58 = vld [vmem:[#allocation25_spill] sm:$0xff] }
 0x373   : > { %5244 = vpow2.f32 %v1215_v35  ;;  %v315_v51 = vmul.f32 0.35355338, %v9279_v58 }
 0x374   : > { %v6662_v12 = vpop.eup %5234  ;;  %1307 = vadd.xlane.f32.xlu1 %v1306_v61 }
 0x375   : > { %9273 = vst [vmem:[#allocation29_spill] sm:$0xff] %v6662_v12  ;;  %v6664_v48 = vpop.eup %5236  ;;  %v1035_v13 = vpop.xlane.xlu1 %1034 }
 0x376   : > { %9274 = vst [vmem:[#allocation30_spill] sm:$0xff] %v6664_v48  ;;  %v1101_v26 = vsub.f32 %v9275_v1, %v1035_v13  ;;  %v1102_v3 = vsub.f32 %v9276_v63, %v1035_v13  ;;  %v1309_v49 = vadd.f32 %v6664_v48, %v6662_v12  ;;  %v429_v13 = vld [vmem:[%s8964_s1 + $0x58] sm:$0xff] }
 0x377   : > { %v9280_v1 = vld [vmem:[#allocation19_spill] sm:$0xff]  ;;  %4639 = vmatmul.mubr.msk.f32.gmra.mrb[14].mxu0 %vm211_vm0, %v429_v13 }
 0x378   : > { %v6675_v57 = vpop.eup %5238  ;;  %v1221_v8 = vmul.f32 1.442695, %v1101_v26  ;;  %v1223_v35 = vmul.f32 1.442695, %v1102_v3  ;;  %1310 = vadd.xlane.f32.xlu1 %v1309_v49  ;;  %1724 = vmatprep.mubr.f32.mxu0 %v9272_v17 }
 0x379   : > { %9277 = vst [vmem:[#allocation17_spill] sm:$0xff] %v6675_v57  ;;  %v6677_v52 = vpop.eup %5240  ;;  %v1038_v61 = vpop.xlane.xlu1 %1037 }
 0x37a   : > { %9278 = vst [vmem:[#allocation18_spill] sm:$0xff] %v6677_v52  ;;  %5246 = vpow2.f32 %v1221_v8  ;;  %v1103_v63 = vsub.f32 %v9280_v1, %v1038_v61  ;;  %v1104_v12 = vsub.f32 %v9281_v46, %v1038_v61  ;;  %v1312_v48 = vadd.f32 %v6677_v52, %v6675_v57  ;;  %v9282_v1 = vld [vmem:[#allocation21_spill] sm:$0xff]  ;;  %v9283_v46 = vld [vmem:[#allocation22_spill] sm:$0xff] }
 0x37b   : > { %5248 = vpow2.f32 %v1223_v35 }
 0x37c   : > { %v6689_v26 = vpop.eup %5242  ;;  %v1225_v58 = vmul.f32 1.442695, %v1103_v63  ;;  %v1227_v3 = vmul.f32 1.442695, %v1104_v12  ;;  %1313 = vadd.xlane.f32.xlu1 %v1312_v48  ;;  %v9284_v12 = vld [vmem:[#allocation23_spill] sm:$0xff]  ;;  %v9285_v63 = vld [vmem:[#allocation24_spill] sm:$0xff] }
 0x37d   : > { %v6691_v49 = vpop.eup %5244  ;;  %1500 = vxpose.xlu0.b32.start.end [1/1] (short) %v315_v51, 128  ;;  %v1041_v8 = vpop.xlane.xlu1 %1040 }
 0x37e   : > { %5250 = vpow2.f32 %v1225_v58  ;;  %v1105_v61 = vsub.f32 %v9282_v1, %v1041_v8  ;;  %v1106_v37 = vsub.f32 %v9283_v46, %v1041_v8  ;;  %v1315_v13 = vadd.f32 %v6691_v49, %v6689_v26 }
 0x37f   : > { %5252 = vpow2.f32 %v1227_v3 }
 0x380   : > { %v1229_v35 = vmul.f32 1.442695, %v1105_v61  ;;  %v1231_v57 = vmul.f32 1.442695, %v1106_v37  ;;  %1316 = vadd.xlane.f32.xlu1 %v1315_v13 }
 0x381   : > { %v1044_v52 = vpop.xlane.xlu1 %1043 }
 0x382   : > { %5254 = vpow2.f32 %v1229_v35  ;;  %v1107_v48 = vsub.f32 %v9284_v12, %v1044_v52  ;;  %v1108_v55 = vsub.f32 %v9285_v63, %v1044_v52 }
 0x383   : > { %5256 = vpow2.f32 %v1231_v57 }
 0x384   : > { %v6699_v51 = vpop.eup %5246  ;;  %v1233_v58 = vmul.f32 1.442695, %v1107_v48  ;;  %v1235_v1 = vmul.f32 1.442695, %v1108_v55 }
 0x385   : > { %9286 = vst [vmem:[#allocation25_spill] sm:$0xff] %v6699_v51  ;;  %v6701_v42 = vpop.eup %5248 }
 0x386   : > { %5258 = vpow2.f32 %v1233_v58  ;;  %v1321_v3 = vadd.f32 %v6701_v42, %v6699_v51 }
 0x387   : > { %5260 = vpow2.f32 %v1235_v1 }
 0x388   : > { %v6705_v37 = vpop.eup %5250  ;;  %1322 = vadd.xlane.f32.xlu1 %v1321_v3 }
 0x389   : > { %v6707_v8 = vpop.eup %5252 }
 0x38a   : > { %v1324_v52 = vadd.f32 %v6707_v8, %v6705_v37 }
 0x38c   : > { %v6711_v57 = vpop.eup %5254  ;;  %1325 = vadd.xlane.f32.xlu1 %v1324_v52 }
 0x38d   : > { %9287 = vst [vmem:[#allocation19_spill] sm:$0xff] %v6711_v57  ;;  %v6713_v61 = vpop.eup %5256 }
 0x38e   : > { %9288 = vst [vmem:[#allocation20_spill] sm:$0xff] %v6713_v61  ;;  %v1327_v55 = vadd.f32 %v6713_v61, %v6711_v57 }
 0x390   : > { %v6717_v46 = vpop.eup %5258  ;;  %1328 = vadd.xlane.f32.xlu1 %v1327_v55 }
 0x391   : > { %9289 = vst [vmem:[#allocation21_spill] sm:$0xff] %v6717_v46  ;;  %v6719_v13 = vpop.eup %5260 }
 0x392   : > { %9290 = vst [vmem:[#allocation22_spill] sm:$0xff] %v6719_v13  ;;  %v1330_v35 = vadd.f32 %v6719_v13, %v6717_v46 }
 0x394   : > { %1331 = vadd.xlane.f32.xlu1 %v1330_v35 }
 0x3a5   : > { %v1239_v12 = vpop.xlane.xlu1 %1238 }
 0x3a6   : > { %5262 = vrcp.f32 %v1239_v12 }
 0x3a9   : > { %v1242_v48 = vpop.xlane.xlu1 %1241 }
 0x3aa   : > { %5264 = vrcp.f32 %v1242_v48 }
 0x3ad   : > { %v1245_v63 = vpop.xlane.xlu1 %1244 }
 0x3ae   : > { %5266 = vrcp.f32 %v1245_v63 }
 0x3b0   : > { %v5263_v1 = vpop.eup %5262 }
 0x3b1   : > { %v1248_v58 = vpop.xlane.xlu1 %1247  ;;  %v1366_v57 = vmul.f32 %v5263_v1, %v6467_v14  ;;  %v1365_v61 = vmul.f32 %v5263_v1, %v6465_v7 }
 0x3b2   : > { %5268 = vrcp.f32 %v1248_v58 }
 0x3b4   : > { %v5265_v3 = vpop.eup %5264 }
 0x3b5   : > { %v1251_v52 = vpop.xlane.xlu1 %1250  ;;  %v1368_v55 = vmul.f32 %v5265_v3, %v6475_v32  ;;  %v1367_v46 = vmul.f32 %v5265_v3, %v6473_v10 }
 0x3b6   : > { %5270 = vrcp.f32 %v1251_v52 }
 0x3b7   : > { %v4803_v35 = vpack.c.bf16 %v1368_v55, %v1366_v57  ;;  %v4805_v51 = vpack.c.bf16 %v1367_v46, %v1365_v61 }
 0x3b8   : > { %v5267_v48 = vpop.eup %5266 }
 0x3b9   : > { %4804 = vmatprep.subr.bf16.mxu1 %v4803_v35  ;;  %v1254_v12 = vpop.xlane.xlu1 %1253  ;;  %v1370_v13 = vmul.f32 %v5267_v48, %v6483_v4  ;;  %v1369_v32 = vmul.f32 %v5267_v48, %v6481_v16 }
 0x3ba   : > { %5272 = vrcp.f32 %v1254_v12  ;;  %4806 = vmatpush1.bf16.xpose.msra.mxu1 %v4805_v51  ;;  %v9291_v51 = vld [vmem:[#allocation26_spill] sm:$0xff] }
 0x3bb   : > { %v316_v3 = vmul.f32 0.35355338, %v9291_v51 }
 0x3bc   : > { %v5269_v63 = vpop.eup %5268 }
 0x3bd   : > { %v1257_v58 = vpop.xlane.xlu1 %1256  ;;  %v1372_v14 = vmul.f32 %v5269_v63, %v6491_v39  ;;  %v1371_v7 = vmul.f32 %v5269_v63, %v6489_v19 }
 0x3be   : > { %5274 = vrcp.f32 %v1257_v58 }
 0x3bf   : > { %v4807_v1 = vpack.c.bf16 %v1372_v14, %v1370_v13  ;;  %v4809_v10 = vpack.c.bf16 %v1371_v7, %v1369_v32  ;;  %v9293_v32 = vld [vmem:[#allocation16_spill] sm:$0xff] }
 0x3c0   : > { %v5271_v61 = vpop.eup %5270  ;;  %v1100_v7 = vsub.f32 %v9293_v32, %v6653_v60 }
 0x3c1   : > { %4808 = vmatprep.subr.bf16.mxu1 %v4807_v1  ;;  %v1260_v57 = vpop.xlane.xlu1 %1259  ;;  %v1374_v4 = vmul.f32 %v5271_v61, %v6499_v45  ;;  %v1373_v16 = vmul.f32 %v5271_v61, %v6497_v22 }
 0x3c2   : > { %5276 = vrcp.f32 %v1260_v57  ;;  %4810 = vmatpush1.bf16.xpose.msra.mxu1 %v4809_v10 }
 0x3c4   : > { %v5273_v46 = vpop.eup %5272 }
 0x3c5   : > { %v1263_v52 = vpop.xlane.xlu1 %1262  ;;  %v1376_v39 = vmul.f32 %v5273_v46, %v6507_v40  ;;  %v1375_v19 = vmul.f32 %v5273_v46, %v6505_v25  ;;  %v9292_v25 = vld [vmem:[#allocation15_spill] sm:$0xff] }
 0x3c6   : > { %5278 = vrcp.f32 %v1263_v52  ;;  %v1099_v14 = vsub.f32 %v9292_v25, %v6653_v60 }
 0x3c7   : > { %1532 = vxpose.xlu1.b32.start.end [1/1] (short) %v316_v3, 128  ;;  %v4811_v13 = vpack.c.bf16 %v1376_v39, %v1374_v4  ;;  %v4813_v55 = vpack.c.bf16 %v1375_v19, %v1373_v16 }
 0x3c8   : > { %v5275_v12 = vpop.eup %5274  ;;  %v1217_v46 = vmul.f32 1.442695, %v1099_v14 }
 0x3c9   : > { %4812 = vmatprep.subr.bf16.mxu1 %v4811_v13  ;;  %v1266_v35 = vpop.xlane.xlu1 %1265  ;;  %v1378_v58 = vmul.f32 %v5275_v12, %v6515_v9  ;;  %v1377_v40 = vmul.f32 %v5275_v12, %v6513_v28  ;;  %v1219_v9 = vmul.f32 1.442695, %v1100_v7 }
 0x3ca   : > { %5280 = vrcp.f32 %v1266_v35  ;;  %4814 = vmatpush1.bf16.xpose.msra.mxu1 %v4813_v55 }
 0x3cc   : > { %v5277_v48 = vpop.eup %5276 }
 0x3cd   : > { %v1269_v63 = vpop.xlane.xlu1 %1268  ;;  %v1380_v45 = vmul.f32 %v5277_v48, %v6523_v23  ;;  %v1379_v22 = vmul.f32 %v5277_v48, %v6521_v31 }
 0x3ce   : > { %5282 = vrcp.f32 %v1269_v63 }
 0x3cf   : > { %v4815_v1 = vpack.c.bf16 %v1380_v45, %v1378_v58  ;;  %v4817_v10 = vpack.c.bf16 %v1379_v22, %v1377_v40 }
 0x3d0   : > { %v5279_v61 = vpop.eup %5278 }
 0x3d1   : > { %4816 = vmatprep.subr.bf16.mxu1 %v4815_v1  ;;  %v1272_v57 = vpop.xlane.xlu1 %1271  ;;  %v1382_v31 = vmul.f32 %v5279_v61, %v6531_v5  ;;  %v1381_v3 = vmul.f32 %v5279_v61, %v6529_v34 }
 0x3d2   : > { %5284 = vrcp.f32 %v1272_v57  ;;  %4818 = vmatpush1.bf16.xpose.msra.mxu1 %v4817_v10 }
 0x3d3   : > { %5286 = vpow2.f32 %v1217_v46 }
 0x3d4   : > { %v5281_v23 = vpop.eup %5280  ;;  %5288 = vpow2.f32 %v1219_v9 }
 0x3d5   : > { %v1275_v28 = vpop.xlane.xlu0 %1274  ;;  %v1384_v51 = vmul.f32 %v5281_v23, %v6539_v36  ;;  %v1383_v60 = vmul.f32 %v5281_v23, %v6537_v41 }
 0x3d6   : > { %5290 = vrcp.f32 %v1275_v28 }
 0x3d7   : > { %v4819_v52 = vpack.c.bf16 %v1384_v51, %v1382_v31  ;;  %v4821_v4 = vpack.c.bf16 %v1383_v60, %v1381_v3 }
 0x3d8   : > { %v5283_v16 = vpop.eup %5282 }
 0x3d9   : > { %4820 = vmatprep.subr.bf16.mxu1 %v4819_v52  ;;  %v1278_v39 = vpop.xlane.xlu1 %1277  ;;  %v1386_v5 = vmul.f32 %v5283_v16, %v6547_v54  ;;  %v1385_v34 = vmul.f32 %v5283_v16, %v6545_v44 }
 0x3da   : > { %5292 = vrcp.f32 %v1278_v39  ;;  %4822 = vmatpush1.bf16.xpose.msra.mxu1 %v4821_v4 }
 0x3dc   : > { %v5285_v19 = vpop.eup %5284 }
 0x3dd   : > { %v1281_v13 = vpop.xlane.xlu0 %1280  ;;  %v1388_v36 = vmul.f32 %v5285_v19, %v6555_v6  ;;  %v1387_v41 = vmul.f32 %v5285_v19, %v6553_v47  ;;  %v6752_v12 = vpop.eup %5286 }
 0x3de   : > { %5294 = vrcp.f32 %v1281_v13  ;;  %v6754_v48 = vpop.eup %5288 }
 0x3df   : > { %v4823_v55 = vpack.c.bf16 %v1388_v36, %v1386_v5  ;;  %v4825_v35 = vpack.c.bf16 %v1387_v41, %v1385_v34  ;;  %v1318_v54 = vadd.f32 %v6754_v48, %v6752_v12 }
 0x3e0   : > { %v5291_v58 = vpop.eup %5290 }
 0x3e1   : > { %4824 = vmatprep.subr.bf16.mxu1 %v4823_v55  ;;  %v1284_v63 = vpop.xlane.xlu1 %1283  ;;  %v1390_v44 = vmul.f32 %v5291_v58, %v6563_v0  ;;  %v1389_v40 = vmul.f32 %v5291_v58, %v6561_v50  ;;  %v9294_v55 = vld [vmem:[#allocation27_spill] sm:$0xff] }
 0x3e2   : > { %5296 = vrcp.f32 %v1284_v63  ;;  %4826 = vmatpush1.bf16.xpose.msra.mxu1 %v4825_v35 }
 0x3e4   : > { %v5293_v45 = vpop.eup %5292 }
 0x3e5   : > { %v1287_v6 = vpop.xlane.xlu1 %1286  ;;  %v1392_v47 = vmul.f32 %v5293_v45, %v6571_v15  ;;  %v1391_v22 = vmul.f32 %v5293_v45, %v6569_v53 }
 0x3e6   : > { %1319 = vadd.xlane.f32.xlu0 %v1318_v54  ;;  %5298 = vrcp.f32 %v1287_v6 }
 0x3e7   : > { %v4827_v25 = vpack.c.bf16 %v1392_v47, %v1390_v44  ;;  %v4829_v14 = vpack.c.bf16 %v1391_v22, %v1389_v40  ;;  %v9296_v47 = vld [vmem:[#allocation14_spill] sm:$0xff]  ;;  %v9297_v22 = vld [vmem:[#allocation12_spill] sm:$0xff] }
 0x3e8   : > { %v5295_v7 = vpop.eup %5294 }
 0x3e9   : > { %v1290_v32 = vpop.xlane.xlu1 %1289  ;;  %4828 = vmatprep.subr.bf16.mxu1 %v4827_v25  ;;  %v1394_v57 = vmul.f32 %v5295_v7, %v6579_v18  ;;  %v1393_v15 = vmul.f32 %v5295_v7, %v6577_v56 }
 0x3ea   : > { %5300 = vrcp.f32 %v1290_v32  ;;  %4830 = vmatpush1.bf16.xpose.msra.mxu1 %v4829_v14  ;;  %v9298_v14 = vld [vmem:[#allocation13_spill] sm:$0xff] }
 0x3ec   : > { %v5297_v1 = vpop.eup %5296 }
 0x3ed   : > { %v1293_v10 = vpop.xlane.xlu1 %1292  ;;  %v1396_v0 = vmul.f32 %v5297_v1, %v6587_v21  ;;  %v1395_v50 = vmul.f32 %v5297_v1, %v6585_v59 }
 0x3ee   : > { %5302 = vrcp.f32 %v1293_v10 }
 0x3ef   : > { %v4831_v53 = vpack.c.bf16 %v1396_v0, %v1394_v57  ;;  %v4833_v61 = vpack.c.bf16 %v1395_v50, %v1393_v15  ;;  %v6794_v15 = vpop.f32.mrb[4].mxu0 }
 0x3f0   : > { %v5299_v9 = vpop.eup %5298 }
 0x3f1   : > { %v1296_v46 = vpop.xlane.xlu1 %1295  ;;  %4832 = vmatprep.subr.bf16.mxu1 %v4831_v53  ;;  %v1398_v31 = vmul.f32 %v5299_v9, %v6595_v24  ;;  %v1397_v21 = vmul.f32 %v5299_v9, %v6593_v62  ;;  %v9299_v53 = vld [vmem:[#allocation30_spill] sm:$0xff] }
 0x3f2   : > { %5304 = vrcp.f32 %v1296_v46  ;;  %4834 = vmatpush1.bf16.xpose.msra.mxu1 %v4833_v61  ;;  %v9300_v46 = vld [vmem:[#allocation18_spill] sm:$0xff] }
 0x3f4   : > { %v5301_v23 = vpop.eup %5300 }
 0x3f5   : > { %v1299_v28 = vpop.xlane.xlu1 %1298  ;;  %v1400_v18 = vmul.f32 %v5301_v23, %v6603_v27  ;;  %v1399_v56 = vmul.f32 %v5301_v23, %v6601_v2  ;;  %v9301_v23 = vld [vmem:[#allocation29_spill] sm:$0xff] }
 0x3f6   : > { %5306 = vrcp.f32 %v1299_v28 }
 0x3f7   : > { %v4835_v51 = vpack.c.bf16 %v1400_v18, %v1398_v31  ;;  %v4837_v59 = vpack.c.bf16 %v1399_v56, %v1397_v21  ;;  %v9302_v31 = vld [vmem:[#allocation17_spill] sm:$0xff]  ;;  %v6801_v21 = vpop.f32.mrb[5].mxu0 }
 0x3f8   : > { %v5303_v60 = vpop.eup %5302 }
 0x3f9   : > { %v1302_v3 = vpop.xlane.xlu1 %1301  ;;  %4836 = vmatprep.subr.bf16.mxu1 %v4835_v51  ;;  %v1402_v16 = vmul.f32 %v5303_v60, %v6611_v30  ;;  %v1401_v27 = vmul.f32 %v5303_v60, %v6609_v11 }
 0x3fa   : > { %5308 = vrcp.f32 %v1302_v3  ;;  %4838 = vmatpush1.bf16.xpose.msra.mxu1 %v4837_v59  ;;  %v6804_v59 = vpop.f32.mrb[6].mxu0 }
 0x3fb   : > { %v6806_v3 = vpop.f32.mrb[7].mxu0 }
 0x3fc   : > { %v5305_v52 = vpop.eup %5304 }
 0x3fd   : > { %v1305_v4 = vpop.xlane.xlu1 %1304  ;;  %v1516_v39 = vpop.trf.xlu0  ;;  %v1404_v24 = vmul.f32 %v5305_v52, %v6619_v33  ;;  %v1403_v62 = vmul.f32 %v5305_v52, %v6617_v20 }
 0x3fe   : > { %4672 = vmatmul.mubr.msk.f32.vlgmr.msra.gmra.mrb[16].mxu0 %vm595_vm1, %v1516_v39  ;;  %5310 = vrcp.f32 %v1305_v4  ;;  %v6809_v52 = vpop.f32.mrb[8].mxu0 }
 0x3ff   : > { %v4839_v2 = vpack.c.bf16 %v1404_v24, %v1402_v16  ;;  %1730 = vmatprep.mubr.f32.mxu0 %v9272_v17  ;;  %v4841_v19 = vpack.c.bf16 %v1403_v62, %v1401_v27  ;;  %v510_v4 = vpop.f32.mrb[9].mxu0 }
 0x400   : > { %v5307_v36 = vpop.eup %5306  ;;  %1493 = vmatprep.mubr.f32.mxu1 %v510_v4 }
 0x401   : > { %v1308_v13 = vpop.xlane.xlu1 %1307  ;;  %4840 = vmatprep.subr.bf16.mxu1 %v4839_v2  ;;  %v1517_v5 = vpop.trf.xlu0  ;;  %v1406_v33 = vmul.f32 %v5307_v36, %v6627_v38  ;;  %v1405_v41 = vmul.f32 %v5307_v36, %v6625_v29 }
 0x402   : > { %5312 = vrcp.f32 %v1308_v13  ;;  %4842 = vmatpush1.bf16.xpose.msra.mxu1 %v4841_v19  ;;  %4673 = vmatmul.mubr.msk.f32.gmra.mrb[18].mxu0 %vm595_vm1, %v1517_v5 }
 0x403   : > { %1736 = vmatprep.mubr.f32.mxu0 %v9272_v17 }
 0x404   : > { %v5309_v11 = vpop.eup %5308 }
 0x405   : > { %v1311_v30 = vpop.xlane.xlu1 %1310  ;;  %v1518_v20 = vpop.trf.xlu0  ;;  %v1408_v34 = vmul.f32 %v5309_v11, %v6635_v43  ;;  %v1407_v35 = vmul.f32 %v5309_v11, %v9294_v55  ;;  %v9295_v43 = vld [vmem:[#allocation28_spill] sm:$0xff] }
 0x406   : > { %4674 = vmatmul.mubr.msk.f32.gmra.mrb[20].mxu0 %vm595_vm1, %v1518_v20  ;;  %5314 = vrcp.f32 %v1311_v30 }
 0x407   : > { %v4843_v63 = vpack.c.bf16 %v1408_v34, %v1406_v33  ;;  %1742 = vmatprep.mubr.f32.mxu0 %v9272_v17  ;;  %v4845_v58 = vpack.c.bf16 %v1407_v35, %v1405_v41 }
 0x408   : > { %v5311_v6 = vpop.eup %5310 }
 0x409   : > { %v1314_v45 = vpop.xlane.xlu1 %1313  ;;  %4844 = vmatprep.subr.bf16.mxu1 %v4843_v63  ;;  %v1519_v54 = vpop.trf.xlu0  ;;  %v1410_v44 = vmul.f32 %v5311_v6, %v9295_v43  ;;  %v1409_v25 = vmul.f32 %v5311_v6, %v9297_v22 }
 0x40a   : > { %5316 = vrcp.f32 %v1314_v45  ;;  %4846 = vmatpush1.bf16.xpose.msra.mxu1 %v4845_v58  ;;  %4675 = vmatmul.mubr.msk.f32.gmra.mrb[22].mxu0 %vm595_vm1, %v1519_v54 }
 0x40b   : > { %1748 = vmatprep.mubr.f32.mxu0 %v9272_v17 }
 0x40c   : > { %v5313_v29 = vpop.eup %5312 }
 0x40d   : > { %v1520_v38 = vpop.trf.xlu0  ;;  %v1412_v40 = vmul.f32 %v5313_v29, %v9296_v47  ;;  %v1411_v32 = vmul.f32 %v5313_v29, %v9298_v14  ;;  %v1317_v62 = vpop.xlane.xlu1 %1316 }
 0x40e   : > { %4676 = vmatmul.mubr.msk.f32.gmra.mrb[24].mxu0 %vm595_vm1, %v1520_v38  ;;  %5318 = vrcp.f32 %v1317_v62 }
 0x40f   : > { %v4847_v7 = vpack.c.bf16 %v1412_v40, %v1410_v44  ;;  %1754 = vmatprep.mubr.f32.mxu0 %v9272_v17  ;;  %v4849_v1 = vpack.c.bf16 %v1411_v32, %v1409_v25 }
 0x410   : > { %v5315_v57 = vpop.eup %5314 }
 0x411   : > { %4848 = vmatprep.subr.bf16.mxu1 %v4847_v7  ;;  %v1521_v10 = vpop.trf.xlu0  ;;  %v1414_v61 = vmul.f32 %v5315_v57, %v9299_v53  ;;  %v1413_v28 = vmul.f32 %v5315_v57, %v9301_v23 }
 0x412   : > { %4850 = vmatpush1.bf16.xpose.msra.mxu1 %v4849_v1  ;;  %4677 = vmatmul.mubr.msk.f32.gmra.mrb[26].mxu0 %vm595_vm1, %v1521_v10 }
 0x413   : > { %1760 = vmatprep.mubr.f32.mxu0 %v9272_v17 }
 0x414   : > { %v5317_v0 = vpop.eup %5316 }
 0x415   : > { %v1522_v50 = vpop.trf.xlu0  ;;  %v1416_v9 = vmul.f32 %v5317_v0, %v9300_v46  ;;  %v1415_v18 = vmul.f32 %v5317_v0, %v9302_v31  ;;  %v1323_v19 = vpop.xlane.xlu1 %1322 }
 0x416   : > { %4678 = vmatmul.mubr.msk.f32.gmra.mrb[28].mxu0 %vm595_vm1, %v1522_v50 }
 0x417   : > { %v4851_v56 = vpack.c.bf16 %v1416_v9, %v1414_v61  ;;  %1766 = vmatprep.mubr.f32.mxu0 %v9272_v17  ;;  %v4853_v51 = vpack.c.bf16 %v1415_v18, %v1413_v28 }
 0x418   : > { %v5319_v7 = vpop.eup %5318 }
 0x419   : > { %4852 = vmatprep.subr.bf16.mxu1 %v4851_v56  ;;  %v1523_v60 = vpop.trf.xlu0  ;;  %v1326_v36 = vpop.xlane.xlu1 %1325  ;;  %v1418_v50 = vmul.f32 %v5319_v7, %v6691_v49  ;;  %v1417_v61 = vmul.f32 %v5319_v7, %v6689_v26 }
 0x41a   : > { %4854 = vmatpush1.bf16.xpose.msra.mxu1 %v4853_v51  ;;  %4679 = vmatmul.mubr.msk.f32.gmra.mrb[30].mxu0 %vm595_vm1, %v1523_v60  ;;  %5320 = vrcp.f32 %v1326_v36  ;;  %v9309_v60 = vld [vmem:[#allocation25_spill] sm:$0xff]  ;;  %v9315_v36 = vld [vmem:[#allocation11_spill] sm:$0xff] }
 0x41b   : > { %1772 = vmatprep.mubr.f32.mxu0 %v9272_v17  ;;  %5322 = vrcp.f32 %v1323_v19 }
 0x41d   : > { %v1524_v39 = vpop.trf.xlu0  ;;  %v1329_v30 = vpop.xlane.xlu1 %1328 }
 0x41e   : > { %4680 = vmatmul.mubr.msk.f32.gmra.mrb[32].mxu0 %vm595_vm1, %v1524_v39 }
 0x41f   : > { %1778 = vmatprep.mubr.f32.mxu0 %v9272_v17 }
 0x421   : > { %v1525_v16 = vpop.trf.xlu0  ;;  %v1332_v20 = vpop.xlane.xlu1 %1331 }
 0x422   : > { %4681 = vmatmul.mubr.msk.f32.gmra.mrb[34].mxu0 %vm595_vm1, %v1525_v16 }
 0x423   : > { %1784 = vmatprep.mubr.f32.mxu0 %v9272_v17 }
 0x424   : > { %v5321_v10 = vpop.eup %5320 }
 0x425   : > { %v1526_v24 = vpop.trf.xlu0  ;;  %v5323_v57 = vpop.eup %5322  ;;  %v1424_v9 = vmul.f32 %v5321_v10, %v6707_v8  ;;  %v1423_v8 = vmul.f32 %v5321_v10, %v6705_v37  ;;  %v9314_v37 = vld [vmem:[#allocation8_spill] sm:$0xff] }
 0x426   : > { %4682 = vmatmul.mubr.msk.f32.gmra.mrb[36].mxu0 %vm595_vm1, %v1526_v24  ;;  %v1422_v18 = vmul.f32 %v5323_v57, %v6701_v42  ;;  %v1421_v4 = vmul.f32 %v5323_v57, %v9309_v60  ;;  %v9310_v42 = vld [vmem:[#allocation20_spill] sm:$0xff]  ;;  %v317_v60 = vmul.f32 0.35355338, %v6794_v15 }
 0x427   : > { %1790 = vmatprep.mubr.f32.mxu0 %v9272_v17 }
 0x428   : > { %v4859_v56 = vpack.c.bf16 %v1424_v9, %v1422_v18  ;;  %v4861_v16 = vpack.c.bf16 %v1423_v8, %v1421_v4 }
 0x429   : > { %v1527_v27 = vpop.trf.xlu0 }
 0x42a   : > { %4683 = vmatmul.mubr.msk.f32.gmra.mrb[38].mxu0 %vm595_vm1, %v1527_v27  ;;  %v9311_v27 = vld [vmem:[#allocation21_spill] sm:$0xff] }
 0x42b   : > { %1796 = vmatprep.mubr.f32.mxu0 %v9272_v17 }
 0x42d   : > { %v1528_v2 = vpop.trf.xlu0 }
 0x42e   : > { %4684 = vmatmul.mubr.msk.f32.gmra.mrb[40].mxu0 %vm595_vm1, %v1528_v2  ;;  %v9312_v2 = vld [vmem:[#allocation19_spill] sm:$0xff] }
 0x42f   : > { %1802 = vmatprep.mubr.f32.mxu0 %v9272_v17 }
 0x431   : > { %v1529_v13 = vpop.trf.xlu0 }
 0x432   : > { %4685 = vmatmul.mubr.msk.f32.gmra.mrb[42].mxu0 %vm595_vm1, %v1529_v13 }
 0x433   : > { %1808 = vmatprep.mubr.f32.mxu0 %v9272_v17 }
 0x435   : > { %v1530_v5 = vpop.trf.xlu0 }
 0x436   : > { %4686 = vmatmul.mubr.msk.f32.gmra.mrb[44].mxu0 %vm595_vm1, %v1530_v5  ;;  %v9313_v5 = vld [vmem:[#allocation9_spill] sm:$0xff] }
 0x437   : > { %1814 = vmatprep.mubr.f32.mxu0 %v9272_v17 }
 0x439   : > { %v1531_v11 = vpop.trf.xlu0 }
 0x43a   : > { %4687 = vmatmul.mubr.msk.f32.gmra.mrb[46].mxu0 %vm595_vm1, %v1531_v11 }
 0x43b   : > { %1820 = vmatprep.mubr.f32.mxu0 %v9272_v17 }
 0x43e   : > { %v6828_v33 = vpop.f32.mrb[10].mxu0 }
 0x43f   : > { %9303 = vst [vmem:[#allocation23_spill] sm:$0xff] %v6828_v33  ;;  %v6830_v34 = vpop.f32.mrb[11].mxu0 }
 0x443   : > { %v6834_v55 = vpop.f32.mrb[12].mxu0 }
 0x444   : > { %9304 = vst [vmem:[#allocation24_spill] sm:$0xff] %v6834_v55  ;;  %v6836_v35 = vpop.f32.mrb[13].mxu0 }
 0x445   : > { %9305 = vst [vmem:[#allocation26_spill] sm:$0xff] %v6836_v35 }
 0x447   : > { %v1548_v41 = vpop.trf.xlu1 }
 0x448   : > { %4688 = vmatmul.mubr.msk.f32.gmra.mrb[48].mxu0 %vm595_vm1, %v1548_v41 }
 0x449   : > { %1826 = vmatprep.mubr.f32.mxu0 %v9272_v17 }
 0x44a   : > { %v6840_v58 = vpop.f32.mrb[14].mxu0 }
 0x44b   : > { %v1549_v63 = vpop.trf.xlu1  ;;  %9306 = vst [vmem:[#allocation15_spill] sm:$0xff] %v6840_v58  ;;  %v6842_v45 = vpop.f32.mrb[15].mxu0 }
 0x44c   : > { %4689 = vmatmul.mubr.msk.f32.gmra.mrb[50].mxu0 %vm595_vm1, %v1549_v63  ;;  %9307 = vst [vmem:[#allocation16_spill] sm:$0xff] %v6842_v45  ;;  %v318_v45 = vmul.f32 0.35355338, %v6801_v21 }
 0x44d   : > { %1832 = vmatprep.mubr.f32.mxu0 %v9272_v17 }
 0x44f   : > { %v1550_v54 = vpop.trf.xlu1 }
 0x450   : > { %4690 = vmatmul.mubr.msk.f32.gmra.mrb[52].mxu0 %vm595_vm1, %v1550_v54 }
 0x451   : > { %1838 = vmatprep.mubr.f32.mxu0 %v9272_v17 }
 0x453   : > { %v1551_v6 = vpop.trf.xlu1 }
 0x454   : > { %4691 = vmatmul.mubr.msk.f32.gmra.mrb[54].mxu0 %vm595_vm1, %v1551_v6 }
 0x455   : > { %1844 = vmatprep.mubr.f32.mxu0 %v9272_v17 }
 0x457   : > { %v1552_v29 = vpop.trf.xlu1 }
 0x458   : > { %4692 = vmatmul.mubr.msk.f32.gmra.mrb[56].mxu0 %vm595_vm1, %v1552_v29 }
 0x459   : > { %1850 = vmatprep.mubr.f32.mxu0 %v9272_v17 }
 0x45b   : > { %v1553_v38 = vpop.trf.xlu1 }
 0x45c   : > { %4693 = vmatmul.mubr.msk.f32.gmra.mrb[58].mxu0 %vm595_vm1, %v1553_v38 }
 0x45d   : > { %1856 = vmatprep.mubr.f32.mxu0 %v9272_v17 }
 0x45f   : > { %v1554_v43 = vpop.trf.xlu1 }
 0x460   : > { %4694 = vmatmul.mubr.msk.f32.gmra.mrb[60].mxu0 %vm595_vm1, %v1554_v43 }
 0x461   : > { %1862 = vmatprep.mubr.f32.mxu0 %v9272_v17 }
 0x463   : > { %v1555_v44 = vpop.trf.xlu1 }
 0x464   : > { %4695 = vmatmul.mubr.msk.f32.gmra.mrb[62].mxu0 %vm595_vm1, %v1555_v44 }
 0x465   : > { %1868 = vmatprep.mubr.f32.mxu0 %v9272_v17 }
 0x467   : > { %v1556_v47 = vpop.trf.xlu1 }
 0x468   : > { %4696 = vmatmul.mubr.msk.f32.gmra.mrb[64].mxu0 %vm595_vm1, %v1556_v47 }
 0x469   : > { %1874 = vmatprep.mubr.f32.mxu0 %v9272_v17 }
 0x46b   : > { %v1557_v40 = vpop.trf.xlu1 }
 0x46c   : > { %4697 = vmatmul.mubr.msk.f32.gmra.mrb[66].mxu0 %vm595_vm1, %v1557_v40 }
 0x46d   : > { %1880 = vmatprep.mubr.f32.mxu0 %v9272_v17 }
 0x46f   : > { %v1558_v22 = vpop.trf.xlu1 }
 0x470   : > { %4698 = vmatmul.mubr.msk.f32.gmra.mrb[68].mxu0 %vm595_vm1, %v1558_v22 }
 0x471   : > { %1886 = vmatprep.mubr.f32.mxu0 %v9272_v17 }
 0x473   : > { %v1320_v25 = vpop.xlane.xlu0 %1319  ;;  %v1559_v14 = vpop.trf.xlu1 }
 0x474   : > { %5324 = vrcp.f32 %v1320_v25  ;;  %4699 = vmatmul.mubr.msk.f32.gmra.mrb[70].mxu0 %vm595_vm1, %v1559_v14 }
 0x475   : > { %1892 = vmatprep.mubr.f32.mxu0 %v9272_v17  ;;  %5326 = vrcp.f32 %v1332_v20 }
 0x476   : > { %5328 = vrcp.f32 %v1329_v30 }
 0x477   : > { %v1560_v32 = vpop.trf.xlu1 }
 0x478   : > { %4700 = vmatmul.mubr.msk.f32.gmra.mrb[72].mxu0 %vm595_vm1, %v1560_v32 }
 0x479   : > { %1898 = vmatprep.mubr.f32.mxu0 %v9272_v17 }
 0x47b   : > { %v1561_v1 = vpop.trf.xlu1 }
 0x47c   : > { %4701 = vmatmul.mubr.msk.f32.gmra.mrb[74].mxu0 %vm595_vm1, %v1561_v1 }
 0x47d   : > { %1904 = vmatprep.mubr.f32.mxu0 %v9272_v17 }
 0x47e   : > { %v5325_v0 = vpop.eup %5324 }
 0x47f   : > { %v1420_v53 = vmul.f32 %v5325_v0, %v6754_v48  ;;  %v1419_v46 = vmul.f32 %v5325_v0, %v6752_v12  ;;  %v1562_v23 = vpop.trf.xlu1  ;;  %v5327_v51 = vpop.eup %5326  ;;  %v9308_v12 = vld [vmem:[#allocation22_spill] sm:$0xff] }
 0x480   : > { %4702 = vmatmul.mubr.msk.f32.gmra.mrb[76].mxu0 %vm595_vm1, %v1562_v23  ;;  %v5329_v26 = vpop.eup %5328  ;;  %v1428_v48 = vmul.f32 %v5327_v51, %v9308_v12  ;;  %v1427_v62 = vmul.f32 %v5327_v51, %v9311_v27 }
 0x481   : > { %v4855_v28 = vpack.c.bf16 %v1420_v53, %v1418_v50  ;;  %v4857_v31 = vpack.c.bf16 %v1419_v46, %v1417_v61  ;;  %1910 = vmatprep.mubr.f32.mxu0 %v9272_v17  ;;  %v1426_v39 = vmul.f32 %v5329_v26, %v9310_v42  ;;  %v1425_v19 = vmul.f32 %v5329_v26, %v9312_v2 }
 0x483   : > { %4856 = vmatprep.subr.bf16.mxu1 %v4855_v28  ;;  %v1563_v49 = vpop.trf.xlu1  ;;  %v4863_v24 = vpack.c.bf16 %v1428_v48, %v1426_v39  ;;  %v4865_v13 = vpack.c.bf16 %v1427_v62, %v1425_v19 }
 0x484   : > { %4858 = vmatpush1.bf16.xpose.msra.mxu1 %v4857_v31  ;;  %4703 = vmatmul.mubr.msk.f32.gmra.mrb[78].mxu0 %vm595_vm1, %v1563_v49 }
 0x485   : > { %4860 = vmatprep.subr.bf16.mxu1 %v4859_v56  ;;  %2461 = vmatprep.mubr.f32.mxu0 %v6830_v34 }
 0x48c   : > { %4862 = vmatpush1.bf16.xpose.msra.mxu1 %v4861_v16 }
 0x48d   : > { %4864 = vmatprep.subr.bf16.mxu1 %v4863_v24 }
 0x494   : > { %4866 = vmatpush1.bf16.xpose.msra.mxu1 %v4865_v13 }
 0x495   : > { %2628 = vmatprep.subr.mxu1 %v9313_v5 }
 0x49b   : > { %1494 = vmatmul.mubr.f32.vlgmr.msra.gmra.mrb[72].mxu1 %v6809_v52 }
 0x49c   : > { %2629 = vmatpush1.msra.mxu1 %v9314_v37  ;;  %2692 = vmatprep.mubr.f32.mxu1 %v9272_v17 }
 0x49d   : > { %3596 = vmatprep.subr.mxu1 %v9315_v36 }
 0x4d1   : > { %v6889_v11 = vpop.f32.mrb[16].mxu0 }
 0x4d2   : > { %v6891_v30 = vpop.f32.mrb[17].mxu0 }
 0x4d3   : > { %v1917_v20 = vmax.f32 %v6889_v11, %v6891_v30 }
 0x4d5   : > { %1918 = vmax.xlane.f32.xlu1 %v1917_v20  ;;  %v6895_v34 = vpop.f32.mrb[18].mxu0 }
 0x4d6   : > { %v6897_v41 = vpop.f32.mrb[19].mxu0 }
 0x4d7   : > { %v1920_v52 = vmax.f32 %v6895_v34, %v6897_v41 }
 0x4d9   : > { %1921 = vmax.xlane.f32.xlu0 %v1920_v52  ;;  %v6901_v63 = vpop.f32.mrb[20].mxu0 }
 0x4da   : > { %v6903_v54 = vpop.f32.mrb[21].mxu0 }
 0x4db   : > { %v1923_v6 = vmax.f32 %v6901_v63, %v6903_v54 }
 0x4dd   : > { %1924 = vmax.xlane.f32.xlu0 %v1923_v6  ;;  %v6907_v29 = vpop.f32.mrb[22].mxu0  ;;  %v319_v6 = vmul.f32 0.35355338, %v6804_v59 }
 0x4de   : > { %v6909_v38 = vpop.f32.mrb[23].mxu0 }
 0x4df   : > { %v1926_v43 = vmax.f32 %v6907_v29, %v6909_v38 }
 0x4e1   : > { %1927 = vmax.xlane.f32.xlu0 %v1926_v43  ;;  %v6913_v44 = vpop.f32.mrb[24].mxu0 }
 0x4e2   : > { %v6915_v47 = vpop.f32.mrb[25].mxu0 }
 0x4e3   : > { %v1929_v40 = vmax.f32 %v6913_v44, %v6915_v47 }
 0x4e5   : > { %1930 = vmax.xlane.f32.xlu0 %v1929_v40  ;;  %v6919_v22 = vpop.f32.mrb[26].mxu0 }
 0x4e6   : > { %v6921_v25 = vpop.f32.mrb[27].mxu0 }
 0x4e7   : > { %v1932_v14 = vmax.f32 %v6919_v22, %v6921_v25 }
 0x4e9   : > { %1933 = vmax.xlane.f32.xlu0 %v1932_v14  ;;  %v6925_v32 = vpop.f32.mrb[28].mxu0 }
 0x4ea   : > { %v6927_v7 = vpop.f32.mrb[29].mxu0 }
 0x4eb   : > { %v1935_v1 = vmax.f32 %v6925_v32, %v6927_v7 }
 0x4ed   : > { %1936 = vmax.xlane.f32.xlu0 %v1935_v1  ;;  %v6931_v10 = vpop.f32.mrb[30].mxu0 }
 0x4ee   : > { %v6933_v57 = vpop.f32.mrb[31].mxu0 }
 0x4ef   : > { %v1938_v0 = vmax.f32 %v6931_v10, %v6933_v57 }
 0x4f1   : > { %1939 = vmax.xlane.f32.xlu0 %v1938_v0  ;;  %v6937_v50 = vpop.f32.mrb[32].mxu0 }
 0x4f2   : > { %v6939_v53 = vpop.f32.mrb[33].mxu0 }
 0x4f3   : > { %v1941_v61 = vmax.f32 %v6937_v50, %v6939_v53 }
 0x4f5   : > { %1942 = vmax.xlane.f32.xlu0 %v1941_v61  ;;  %v6943_v46 = vpop.f32.mrb[34].mxu0 }
 0x4f6   : > { %v6945_v9 = vpop.f32.mrb[35].mxu0 }
 0x4f7   : > { %9316 = vst [vmem:[#allocation27_spill] sm:$0xff] %v6945_v9 }
 0x4f9   : > { %v6949_v28 = vpop.f32.mrb[36].mxu0 }
 0x4fa   : > { %9317 = vst [vmem:[#allocation28_spill] sm:$0xff] %v6949_v28  ;;  %v6951_v31 = vpop.f32.mrb[37].mxu0 }
 0x4fb   : > { %9318 = vst [vmem:[#allocation14_spill] sm:$0xff] %v6951_v31  ;;  %v1947_v18 = vmax.f32 %v6949_v28, %v6951_v31 }
 0x4fd   : > { %1948 = vmax.xlane.f32.xlu0 %v1947_v18  ;;  %v6955_v56 = vpop.f32.mrb[38].mxu0 }
 0x4fe   : > { %9319 = vst [vmem:[#allocation12_spill] sm:$0xff] %v6955_v56  ;;  %v6957_v49 = vpop.f32.mrb[39].mxu0 }
 0x4ff   : > { %9320 = vst [vmem:[#allocation13_spill] sm:$0xff] %v6957_v49  ;;  %v1950_v51 = vmax.f32 %v6955_v56, %v6957_v49 }
 0x501   : > { %1951 = vmax.xlane.f32.xlu0 %v1950_v51  ;;  %v6961_v26 = vpop.f32.mrb[40].mxu0 }
 0x502   : > { %9321 = vst [vmem:[#allocation30_spill] sm:$0xff] %v6961_v26  ;;  %v6963_v8 = vpop.f32.mrb[41].mxu0 }
 0x503   : > { %9322 = vst [vmem:[#allocation18_spill] sm:$0xff] %v6963_v8  ;;  %v1953_v12 = vmax.f32 %v6961_v26, %v6963_v8  ;;  %v9351_v8 = vld [vmem:[#allocation10_spill] sm:$0xff] }
 0x505   : > { %1954 = vmax.xlane.f32.xlu0 %v1953_v12  ;;  %v6967_v48 = vpop.f32.mrb[42].mxu0 }
 0x506   : > { %9323 = vst [vmem:[#allocation29_spill] sm:$0xff] %v6967_v48  ;;  %v6970_v4 = vpop.f32.mrb[43].mxu0 }
 0x507   : > { %9324 = vst [vmem:[#allocation17_spill] sm:$0xff] %v6970_v4  ;;  %v1956_v42 = vmax.f32 %v6967_v48, %v6970_v4 }
 0x508   : > { %2468 = vxpose.xlu1.b32.start.end [1/1] (short) %v317_v60, 128 }
 0x509   : > { %1957 = vmax.xlane.f32.xlu0 %v1956_v42  ;;  %v6974_v39 = vpop.f32.mrb[44].mxu0 }
 0x50a   : > { %9325 = vst [vmem:[#allocation22_spill] sm:$0xff] %v6974_v39  ;;  %v6976_v16 = vpop.f32.mrb[45].mxu0 }
 0x50b   : > { %9326 = vst [vmem:[#allocation25_spill] sm:$0xff] %v6976_v16  ;;  %v1959_v24 = vmax.f32 %v6974_v39, %v6976_v16 }
 0x50d   : > { %1960 = vmax.xlane.f32.xlu0 %v1959_v24  ;;  %v6980_v27 = vpop.f32.mrb[46].mxu0 }
 0x50e   : > { %9327 = vst [vmem:[#allocation20_spill] sm:$0xff] %v6980_v27  ;;  %v6982_v62 = vpop.f32.mrb[47].mxu0 }
 0x50f   : > { %9328 = vst [vmem:[#allocation21_spill] sm:$0xff] %v6982_v62  ;;  %v1962_v15 = vmax.f32 %v6980_v27, %v6982_v62  ;;  %v320_v27 = vmul.f32 0.35355338, %v6806_v3 }
 0x511   : > { %1963 = vmax.xlane.f32.xlu0 %v1962_v15 }
 0x51b   : > { %v6986_v2 = vpop.f32.mrb[48].mxu0 }
 0x51c   : > { %9329 = vst [vmem:[#allocation19_spill] sm:$0xff] %v6986_v2  ;;  %v6988_v19 = vpop.f32.mrb[49].mxu0 }
 0x51d   : > { %9330 = vst [vmem:[#allocation9_spill] sm:$0xff] %v6988_v19  ;;  %v1965_v13 = vmax.f32 %v6986_v2, %v6988_v19 }
 0x51f   : > { %1966 = vmax.xlane.f32.xlu0 %v1965_v13  ;;  %v6992_v5 = vpop.f32.mrb[50].mxu0 }
 0x520   : > { %9331 = vst [vmem:[#allocation8_spill] sm:$0xff] %v6992_v5  ;;  %v6994_v37 = vpop.f32.mrb[51].mxu0 }
 0x521   : > { %9332 = vst [vmem:[#allocation11_spill] sm:$0xff] %v6994_v37  ;;  %v1968_v36 = vmax.f32 %v6992_v5, %v6994_v37 }
 0x523   : > { %1969 = vmax.xlane.f32.xlu0 %v1968_v36  ;;  %v6998_v20 = vpop.f32.mrb[52].mxu0 }
 0x524   : > { %v7000_v52 = vpop.f32.mrb[53].mxu0 }
 0x527   : > { %v7004_v43 = vpop.f32.mrb[54].mxu0 }
 0x528   : > { %v7006_v40 = vpop.f32.mrb[55].mxu0 }
 0x52b   : > { %v7010_v1 = vpop.f32.mrb[56].mxu0 }
 0x52c   : > { %v7012_v0 = vpop.f32.mrb[57].mxu0 }
 0x52f   : > { %v7016_v18 = vpop.f32.mrb[58].mxu0 }
 0x530   : > { %v7018_v51 = vpop.f32.mrb[59].mxu0 }
 0x533   : > { %v7022_v60 = vpop.f32.mrb[60].mxu0 }
 0x534   : > { %9333 = vst [vmem:[#allocation31_spill] sm:$0xff] %v7022_v60  ;;  %v7024_v42 = vpop.f32.mrb[61].mxu0 }
 0x535   : > { %9334 = vst [vmem:[#allocation32_spill] sm:$0xff] %v7024_v42 }
 0x537   : > { %v7028_v15 = vpop.f32.mrb[62].mxu0 }
 0x538   : > { %v7030_v13 = vpop.f32.mrb[63].mxu0 }
 0x53b   : > { %v7035_v61 = vpop.f32.mrb[64].mxu0 }
 0x53c   : > { %9335 = vst [vmem:[#allocation33_spill] sm:$0xff] %v7035_v61  ;;  %v7037_v12 = vpop.f32.mrb[65].mxu0 }
 0x53d   : > { %9336 = vst [vmem:[#allocation34_spill] sm:$0xff] %v7037_v12 }
 0x53f   : > { %v7041_v23 = vpop.f32.mrb[66].mxu0 }
 0x540   : > { %v7043_v24 = vpop.f32.mrb[67].mxu0 }
 0x543   : > { %v7048_v36 = vpop.f32.mrb[68].mxu0 }
 0x544   : > { %9337 = vst [vmem:[#allocation35_spill] sm:$0xff] %v7048_v36  ;;  %v7050_v59 = vpop.f32.mrb[69].mxu0 }
 0x545   : > { %3436 = vxpose.xlu1.b32.start.end [1/1] (short) %v319_v6, 128  ;;  %9338 = vst [vmem:[#allocation36_spill] sm:$0xff] %v7050_v59 }
 0x547   : > { %v7054_v55 = vpop.f32.mrb[70].mxu0 }
 0x548   : > { %9339 = vst [vmem:[#allocation37_spill] sm:$0xff] %v7054_v55  ;;  %v7056_v14 = vpop.f32.mrb[71].mxu0 }
 0x549   : > { %9340 = vst [vmem:[#allocation38_spill] sm:$0xff] %v7056_v14 }
 0x54b   : > { %v7060_v33 = vpop.f32.mrb[72].mxu0 }
 0x54c   : > { %9341 = vst [vmem:[#allocation39_spill] sm:$0xff] %v7060_v33  ;;  %v7062_v58 = vpop.f32.mrb[73].mxu0 }
 0x54d   : > { %9342 = vst [vmem:[#allocation40_spill] sm:$0xff] %v7062_v58 }
 0x550   : > { %2500 = vxpose.xlu0.b32.start.end [1/1] (short) %v318_v45, 128  ;;  %v7066_v45 = vpop.f32.mrb[74].mxu0 }
 0x551   : > { %9343 = vst [vmem:[#allocation41_spill] sm:$0xff] %v7066_v45  ;;  %v7068_v37 = vpop.f32.mrb[75].mxu0 }
 0x552   : > { %9344 = vst [vmem:[#allocation42_spill] sm:$0xff] %v7068_v37 }
 0x553   : > { %v7076_v2 = vpop.f32.mrb[76].mxu0 }
 0x554   : > { %9347 = vst [vmem:[#allocation45_spill] sm:$0xff] %v7076_v2  ;;  %v7078_v35 = vpop.f32.mrb[77].mxu0 }
 0x555   : > { %9348 = vst [vmem:[#allocation46_spill] sm:$0xff] %v7078_v35 }
 0x557   : > { %v7082_v21 = vpop.f32.mrb[78].mxu0 }
 0x558   : > { %9349 = vst [vmem:[#allocation47_spill] sm:$0xff] %v7082_v21  ;;  %v7084_v16 = vpop.f32.mrb[79].mxu0 }
 0x559   : > { %9350 = vst [vmem:[#allocation48_spill] sm:$0xff] %v7084_v16 }
 0x566   : > { %v1922_v62 = vpop.xlane.xlu0 %1921 }
 0x56a   : > { %v7088_v6 = vpop.xlane.xlu0 %1924 }
 0x56e   : > { %v7072_v5 = vpop.f32.mrb[72].mxu1 }
 0x56f   : > { %9345 = vst [vmem:[#allocation43_spill] sm:$0xff] %v7072_v5  ;;  %v7074_v19 = vpop.f32.mrb[73].mxu1  ;;  %v7090_v5 = vpop.xlane.xlu0 %1927 }
 0x570   : > { %9346 = vst [vmem:[#allocation44_spill] sm:$0xff] %v7074_v19  ;;  %v1919_v19 = vpop.xlane.xlu1 %1918 }
 0x571   : > { %v2014_v16 = vsub.f32 %v6891_v30, %v1919_v19 }
 0x573   : > { %v7092_v4 = vpop.xlane.xlu0 %1930  ;;  %v2079_v35 = vmul.f32 1.442695, %v2014_v16  ;;  %v9356_v16 = vmax.f32 %v7016_v18, %v7018_v51 }
 0x577   : > { %v7099_v39 = vpop.xlane.xlu0 %1933 }
 0x588   : > { %v2484_v48 = vpop.trf.xlu1 }
 0x589   : > { %4704 = vmatmul.mubr.msk.f32.vlgmr.msra.gmra.mrb[74].mxu1 %vm595_vm1, %v2484_v48  ;;  %v7104_v48 = vpop.xlane.xlu0 %1936 }
 0x58a   : > { %3597 = vmatpush1.msra.mxu1 %v9351_v8  ;;  %2698 = vmatprep.mubr.f32.mxu1 %v9272_v17 }
 0x58c   : > { %v2485_v26 = vpop.trf.xlu1 }
 0x58d   : > { %4705 = vmatmul.mubr.msk.f32.gmra.mrb[76].mxu1 %vm595_vm1, %v2485_v26  ;;  %3468 = vxpose.xlu0.b32.start.end [1/1] (short) %v320_v27, 128  ;;  %v7109_v26 = vpop.xlane.xlu0 %1939 }
 0x58e   : > { %2704 = vmatprep.mubr.f32.mxu1 %v9272_v17 }
 0x590   : > { %v2486_v49 = vpop.trf.xlu1 }
 0x591   : > { %4706 = vmatmul.mubr.msk.f32.gmra.mrb[78].mxu1 %vm595_vm1, %v2486_v49  ;;  %v7114_v49 = vpop.xlane.xlu0 %1942 }
 0x592   : > { %2710 = vmatprep.mubr.f32.mxu1 %v9272_v17 }
 0x594   : > { %v2487_v8 = vpop.trf.xlu1 }
 0x595   : > { %4707 = vmatmul.mubr.msk.f32.gmra.mrb[80].mxu1 %vm595_vm1, %v2487_v8  ;;  %v7118_v8 = vpop.xlane.xlu0 %1948 }
 0x596   : > { %2716 = vmatprep.mubr.f32.mxu1 %v9272_v17  ;;  %9352 = vst [vmem:[#allocation10_spill] sm:$0xff] %v7118_v8 }
 0x598   : > { %v2488_v3 = vpop.trf.xlu1 }
 0x599   : > { %4708 = vmatmul.mubr.msk.f32.gmra.mrb[82].mxu1 %vm595_vm1, %v2488_v3  ;;  %v2013_v3 = vsub.f32 %v6889_v11, %v1919_v19  ;;  %v9354_v11 = vmax.f32 %v7004_v43, %v7006_v40 }
 0x59a   : > { %2722 = vmatprep.mubr.f32.mxu1 %v9272_v17 }
 0x59b   : > { %v2077_v8 = vmul.f32 1.442695, %v2013_v3 }
 0x59c   : > { %v2489_v27 = vpop.trf.xlu1 }
 0x59d   : > { %4709 = vmatmul.mubr.msk.f32.gmra.mrb[84].mxu1 %vm595_vm1, %v2489_v27  ;;  %v9353_v27 = vmax.f32 %v6943_v46, %v6945_v9  ;;  %v2016_v9 = vsub.f32 %v6897_v41, %v1922_v62  ;;  %5330 = vpow2.f32 %v2077_v8  ;;  %v2018_v8 = vsub.f32 %v6903_v54, %v7088_v6 }
 0x59e   : > { %2728 = vmatprep.mubr.f32.mxu1 %v9272_v17  ;;  %5332 = vpow2.f32 %v2079_v35  ;;  %v2017_v35 = vsub.f32 %v6901_v63, %v7088_v6  ;;  %v2019_v63 = vsub.f32 %v6907_v29, %v7090_v5  ;;  %v2020_v6 = vsub.f32 %v6909_v38, %v7090_v5 }
 0x59f   : > { %v2083_v3 = vmul.f32 1.442695, %v2016_v9  ;;  %v2087_v54 = vmul.f32 1.442695, %v2018_v8 }
 0x5a0   : > { %v2490_v56 = vpop.trf.xlu1 }
 0x5a1   : > { %4710 = vmatmul.mubr.msk.f32.gmra.mrb[86].mxu1 %vm595_vm1, %v2490_v56  ;;  %v7128_v56 = vpop.xlane.xlu0 %1951 }
 0x5a2   : > { %2734 = vmatprep.mubr.f32.mxu1 %v9272_v17 }
 0x5a4   : > { %v2491_v31 = vpop.trf.xlu1 }
 0x5a5   : > { %4711 = vmatmul.mubr.msk.f32.gmra.mrb[88].mxu1 %vm595_vm1, %v2491_v31  ;;  %v2015_v31 = vsub.f32 %v6895_v34, %v1922_v62  ;;  %v9355_v34 = vmax.f32 %v7010_v1, %v7012_v0 }
 0x5a6   : > { %2740 = vmatprep.mubr.f32.mxu1 %v9272_v17 }
 0x5a7   : > { %v2081_v30 = vmul.f32 1.442695, %v2015_v31 }
 0x5a8   : > { %v2492_v28 = vpop.trf.xlu1  ;;  %1945 = vmax.xlane.f32.xlu1 %v9353_v27  ;;  %v7160_v27 = vpop.eup %5330 }
 0x5a9   : > { %4712 = vmatmul.mubr.msk.f32.gmra.mrb[90].mxu1 %vm595_vm1, %v2492_v28  ;;  %v7138_v28 = vpop.xlane.xlu0 %1954  ;;  %5334 = vpow2.f32 %v2081_v30  ;;  %v7163_v31 = vpop.eup %5332 }
 0x5aa   : > { %2746 = vmatprep.mubr.f32.mxu1 %v9272_v17  ;;  %5336 = vpow2.f32 %v2083_v3  ;;  %v2205_v29 = vadd.f32 %v7163_v31, %v7160_v27 }
 0x5ac   : > { %v2493_v21 = vpop.trf.xlu1  ;;  %1975 = vmax.xlane.f32.xlu1 %v9354_v11  ;;  %v2085_v11 = vmul.f32 1.442695, %v2017_v35 }
 0x5ad   : > { %4713 = vmatmul.mubr.msk.f32.gmra.mrb[92].mxu1 %vm595_vm1, %v2493_v21  ;;  %v7149_v62 = vpop.xlane.xlu0 %1957  ;;  %v9357_v21 = vmax.f32 %v7022_v60, %v7024_v42 }
 0x5ae   : > { %2752 = vmatprep.mubr.f32.mxu1 %v9272_v17  ;;  %5338 = vpow2.f32 %v2085_v11  ;;  %v2021_v11 = vsub.f32 %v6913_v44, %v7092_v4  ;;  %v9360_v44 = vmax.f32 %v7041_v23, %v7043_v24 }
 0x5af   : > { %5340 = vpow2.f32 %v2087_v54 }
 0x5b0   : > { %v2494_v19 = vpop.trf.xlu1  ;;  %1978 = vmax.xlane.f32.xlu1 %v9355_v34  ;;  %v9358_v34 = vmax.f32 %v7028_v15, %v7030_v13 }
 0x5b1   : > { %4714 = vmatmul.mubr.msk.f32.gmra.mrb[94].mxu1 %vm595_vm1, %v2494_v19  ;;  %v7167_v30 = vpop.xlane.xlu0 %1960 }
 0x5b2   : > { %2758 = vmatprep.mubr.f32.mxu1 %v9272_v17 }
 0x5b3   : > { %v7175_v3 = vpop.eup %5334 }
 0x5b4   : > { %v2495_v41 = vpop.trf.xlu1  ;;  %1981 = vmax.xlane.f32.xlu1 %v9356_v16  ;;  %v2089_v16 = vmul.f32 1.442695, %v2019_v63  ;;  %v9359_v63 = vmax.f32 %v7035_v61, %v7037_v12  ;;  %v9380_v12 = vld [vmem:[#allocation13_spill] sm:$0xff] }
 0x5b5   : > { %4715 = vmatmul.mubr.msk.f32.gmra.mrb[96].mxu1 %vm595_vm1, %v2495_v41  ;;  %v7180_v41 = vpop.eup %5336  ;;  %v7183_v38 = vpop.xlane.xlu0 %1963  ;;  %v2036_v61 = vsub.f32 %v9380_v12, %v7128_v56 }
 0x5b6   : > { %2764 = vmatprep.mubr.f32.mxu1 %v9272_v17  ;;  %v2208_v5 = vadd.f32 %v7180_v41, %v7175_v3  ;;  %5342 = vpow2.f32 %v2089_v16 }
 0x5b8   : > { %v2496_v9 = vpop.trf.xlu1  ;;  %1984 = vmax.xlane.f32.xlu1 %v9357_v21 }
 0x5b9   : > { %4716 = vmatmul.mubr.msk.f32.gmra.mrb[98].mxu1 %vm595_vm1, %v2496_v9  ;;  %v2091_v9 = vmul.f32 1.442695, %v2020_v6  ;;  %v7189_v8 = vpop.xlane.xlu0 %1966  ;;  %v2093_v6 = vmul.f32 1.442695, %v2021_v11 }
 0x5ba   : > { %2770 = vmatprep.mubr.f32.mxu1 %v9272_v17 }
 0x5bb   : > { %5344 = vpow2.f32 %v2091_v9  ;;  %v2024_v9 = vsub.f32 %v6921_v25, %v7099_v39 }
 0x5bc   : > { %v2497_v19 = vpop.trf.xlu1  ;;  %1987 = vmax.xlane.f32.xlu1 %v9358_v34  ;;  %v7199_v34 = vpop.eup %5338  ;;  %5346 = vpow2.f32 %v2093_v6 }
 0x5bd   : > { %4717 = vmatmul.mubr.msk.f32.gmra.mrb[100].mxu1 %vm595_vm1, %v2497_v19  ;;  %v2022_v19 = vsub.f32 %v6915_v47, %v7092_v4  ;;  %v7201_v54 = vpop.eup %5340  ;;  %v7205_v16 = vpop.xlane.xlu0 %1969  ;;  %v2099_v11 = vmul.f32 1.442695, %v2024_v9 }
 0x5be   : > { %2776 = vmatprep.mubr.f32.mxu1 %v9272_v17  ;;  %v2211_v47 = vadd.f32 %v7201_v54, %v7199_v34 }
 0x5c0   : > { %v2498_v35 = vpop.trf.xlu1  ;;  %2206 = vadd.xlane.f32.xlu1 %v2205_v29  ;;  %v2023_v29 = vsub.f32 %v6919_v22, %v7099_v39 }
 0x5c1   : > { %4718 = vmatmul.mubr.msk.f32.gmra.mrb[102].mxu1 %vm595_vm1, %v2498_v35  ;;  %v2095_v35 = vmul.f32 1.442695, %v2022_v19  ;;  %v2025_v19 = vsub.f32 %v6925_v32, %v7104_v48  ;;  %v2027_v32 = vsub.f32 %v6931_v10, %v7109_v26 }
 0x5c2   : > { %2782 = vmatprep.mubr.f32.mxu1 %v9272_v17 }
 0x5c3   : > { %5348 = vpow2.f32 %v2095_v35  ;;  %v2105_v10 = vmul.f32 1.442695, %v2027_v32  ;;  %v2029_v32 = vsub.f32 %v6937_v50, %v7114_v49  ;;  %v9364_v50 = vmax.f32 %v7066_v45, %v7068_v37 }
 0x5c4   : > { %v2499_v21 = vpop.trf.xlu1  ;;  %2209 = vadd.xlane.f32.xlu1 %v2208_v5  ;;  %v7212_v5 = vpop.eup %5342 }
 0x5c5   : > { %4719 = vmatmul.mubr.msk.f32.gmra.mrb[104].mxu1 %vm595_vm1, %v2499_v21  ;;  %v7216_v4 = vpop.eup %5344  ;;  %v2097_v21 = vmul.f32 1.442695, %v2023_v29  ;;  %v9361_v29 = vmax.f32 %v7048_v36, %v7050_v59  ;;  %v9378_v36 = vld [vmem:[#allocation14_spill] sm:$0xff] }
 0x5c6   : > { %2788 = vmatprep.mubr.f32.mxu1 %v9272_v17  ;;  %v2214_v25 = vadd.f32 %v7216_v4, %v7212_v5  ;;  %v7234_v35 = vpop.eup %5346 }
 0x5c7   : > { %5350 = vpow2.f32 %v2097_v21  ;;  %v2101_v21 = vmul.f32 1.442695, %v2025_v19 }
 0x5c8   : > { %1990 = vmax.xlane.f32.xlu1 %v9359_v63  ;;  %5352 = vpow2.f32 %v2099_v11  ;;  %v7223_v63 = vpop.trf.xlu1  ;;  %v9362_v11 = vmax.f32 %v7054_v55, %v7056_v14 }
 0x5c9   : > { %5354 = vpow2.f32 %v2101_v21 }
 0x5cc   : > { %1993 = vmax.xlane.f32.xlu1 %v9360_v44  ;;  %v2026_v44 = vsub.f32 %v6927_v7, %v7104_v48  ;;  %v2028_v48 = vsub.f32 %v6933_v57, %v7109_v26 }
 0x5cd   : > { %v7237_v9 = vpop.eup %5348 }
 0x5ce   : > { %v2103_v7 = vmul.f32 1.442695, %v2026_v44 }
 0x5d0   : > { %v2516_v22 = vpop.trf.xlu0  ;;  %2212 = vadd.xlane.f32.xlu1 %v2211_v47  ;;  %v7239_v47 = vpop.trf.xlu1  ;;  %5356 = vpow2.f32 %v2103_v7  ;;  %v2030_v7 = vsub.f32 %v6939_v53, %v7114_v49 }
 0x5d1   : > { %4720 = vmatmul.mubr.msk.f32.gmra.mrb[106].mxu1 %vm595_vm1, %v2516_v22  ;;  %5358 = vpow2.f32 %v2105_v10  ;;  %v2109_v10 = vmul.f32 1.442695, %v2029_v32 }
 0x5d2   : > { %2794 = vmatprep.mubr.f32.mxu1 %v9272_v17 }
 0x5d4   : > { %v2517_v39 = vpop.trf.xlu0  ;;  %2215 = vadd.xlane.f32.xlu1 %v2214_v25  ;;  %v7249_v25 = vpop.eup %5350 }
 0x5d5   : > { %4721 = vmatmul.mubr.msk.f32.gmra.mrb[108].mxu1 %vm595_vm1, %v2517_v39  ;;  %v2217_v39 = vadd.f32 %v7237_v9, %v7234_v35  ;;  %v7254_v19 = vpop.eup %5352  ;;  %v7257_v57 = vpop.trf.xlu1 }
 0x5d6   : > { %2800 = vmatprep.mubr.f32.mxu1 %v9272_v17  ;;  %v2220_v26 = vadd.f32 %v7254_v19, %v7249_v25 }
 0x5d8   : > { %v2518_v6 = vpop.trf.xlu0  ;;  %1996 = vmax.xlane.f32.xlu1 %v9361_v29  ;;  %v2107_v29 = vmul.f32 1.442695, %v2028_v48  ;;  %v7274_v48 = vpop.eup %5354 }
 0x5d9   : > { %4722 = vmatmul.mubr.msk.f32.gmra.mrb[110].mxu1 %vm595_vm1, %v2518_v6  ;;  %v7264_v21 = vpop.trf.xlu1 }
 0x5da   : > { %2806 = vmatprep.mubr.f32.mxu1 %v9272_v17  ;;  %5360 = vpow2.f32 %v2107_v29  ;;  %v2111_v29 = vmul.f32 1.442695, %v2030_v7 }
 0x5db   : > { %5362 = vpow2.f32 %v2109_v10 }
 0x5dc   : > { %v2519_v22 = vpop.trf.xlu0  ;;  %1999 = vmax.xlane.f32.xlu1 %v9362_v11  ;;  %v9363_v11 = vmax.f32 %v7060_v33, %v7062_v58  ;;  %5364 = vpow2.f32 %v2111_v29  ;;  %v9370_v58 = vld [vmem:[#allocation47_spill] sm:$0xff]  ;;  %v9371_v33 = vld [vmem:[#allocation48_spill] sm:$0xff] }
 0x5dd   : > { %4723 = vmatmul.mubr.msk.f32.gmra.mrb[112].mxu1 %vm595_vm1, %v2519_v22 }
 0x5de   : > { %2812 = vmatprep.mubr.f32.mxu1 %v9272_v17 }
 0x5e0   : > { %v2520_v6 = vpop.trf.xlu0  ;;  %2218 = vadd.xlane.f32.xlu1 %v2217_v39  ;;  %v7277_v39 = vpop.eup %5356 }
 0x5e1   : > { %4724 = vmatmul.mubr.msk.f32.gmra.mrb[114].mxu1 %vm595_vm1, %v2520_v6  ;;  %v2223_v53 = vadd.f32 %v7277_v39, %v7274_v48 }
 0x5e2   : > { %2818 = vmatprep.mubr.f32.mxu1 %v9272_v17 }
 0x5e4   : > { %v2521_v44 = vpop.trf.xlu0  ;;  %2221 = vadd.xlane.f32.xlu1 %v2220_v26  ;;  %v3456_v26 = vpop.trf.xlu1 }
 0x5e5   : > { %4725 = vmatmul.mubr.msk.f32.gmra.mrb[116].mxu1 %vm595_vm1, %v2521_v44  ;;  %v7283_v44 = vpop.eup %5358 }
 0x5e6   : > { %2824 = vmatprep.mubr.f32.mxu1 %v9272_v17  ;;  %v7288_v49 = vpop.eup %5360 }
 0x5e8   : > { %v2522_v22 = vpop.trf.xlu0  ;;  %2002 = vmax.xlane.f32.xlu1 %v9363_v11  ;;  %v3457_v11 = vpop.trf.xlu1 }
 0x5e9   : > { %4726 = vmatmul.mubr.msk.f32.gmra.mrb[118].mxu1 %vm595_vm1, %v2522_v22  ;;  %v2226_v22 = vadd.f32 %v7288_v49, %v7283_v44 }
 0x5ea   : > { %2830 = vmatprep.mubr.f32.mxu1 %v9272_v17 }
 0x5ec   : > { %v2523_v6 = vpop.trf.xlu0  ;;  %2005 = vmax.xlane.f32.xlu1 %v9364_v50  ;;  %v9366_v50 = vld [vmem:[#allocation46_spill] sm:$0xff] }
 0x5ed   : > { %4727 = vmatmul.mubr.msk.f32.gmra.mrb[120].mxu1 %vm595_vm1, %v2523_v6  ;;  %v9365_v6 = vmax.f32 %v6998_v20, %v7000_v52  ;;  %v9367_v29 = vmax.f32 %v7076_v2, %v9366_v50 }
 0x5ee   : > { %2836 = vmatprep.mubr.f32.mxu1 %v9272_v17 }
 0x5f0   : > { %v2524_v32 = vpop.trf.xlu0  ;;  %2224 = vadd.xlane.f32.xlu1 %v2223_v53  ;;  %v3458_v53 = vpop.trf.xlu1 }
 0x5f1   : > { %4728 = vmatmul.mubr.msk.f32.gmra.mrb[122].mxu1 %vm595_vm1, %v2524_v32  ;;  %v7303_v32 = vpop.eup %5362 }
 0x5f2   : > { %2842 = vmatprep.mubr.f32.mxu1 %v9272_v17  ;;  %9368 = vst [vmem:[#allocation49_spill] sm:$0xff] %v7303_v32 }
 0x5f4   : > { %v2525_v7 = vpop.trf.xlu0  ;;  %2227 = vadd.xlane.f32.xlu1 %v2226_v22  ;;  %v7306_v22 = vpop.eup %5364 }
 0x5f5   : > { %4729 = vmatmul.mubr.msk.f32.gmra.mrb[124].mxu1 %vm595_vm1, %v2525_v7  ;;  %9369 = vst [vmem:[#allocation50_spill] sm:$0xff] %v7306_v22 }
 0x5f6   : > { %1972 = vmax.xlane.f32.xlu0 %v9365_v6  ;;  %2848 = vmatprep.mubr.f32.mxu1 %v9272_v17  ;;  %v9372_v6 = vmax.f32 %v9370_v58, %v9371_v33 }
 0x5f8   : > { %v2526_v10 = vpop.trf.xlu0  ;;  %2008 = vmax.xlane.f32.xlu1 %v9367_v29  ;;  %v2229_v29 = vadd.f32 %v7306_v22, %v7303_v32  ;;  %v9373_v22 = vld [vmem:[#allocation27_spill] sm:$0xff] }
 0x5f9   : > { %4730 = vmatmul.mubr.msk.f32.gmra.mrb[126].mxu1 %vm595_vm1, %v2526_v10  ;;  %v3459_v10 = vpop.trf.xlu1 }
 0x5fa   : > { %2854 = vmatprep.mubr.f32.mxu1 %v9272_v17 }
 0x5fc   : > { %v2527_v7 = vpop.trf.xlu0  ;;  %2011 = vmax.xlane.f32.xlu1 %v9372_v6 }
 0x5fd   : > { %4731 = vmatmul.mubr.msk.f32.gmra.mrb[128].mxu1 %vm595_vm1, %v2527_v7  ;;  %v3460_v37 = vpop.trf.xlu1 }
 0x5fe   : > { %2860 = vmatprep.mubr.f32.mxu1 %v9272_v17 }
 0x600   : > { %v2528_v50 = vpop.trf.xlu0  ;;  %2230 = vadd.xlane.f32.xlu1 %v2229_v29 }
 0x601   : > { %4732 = vmatmul.mubr.msk.f32.gmra.mrb[130].mxu1 %vm595_vm1, %v2528_v50  ;;  %v3461_v7 = vpop.trf.xlu1 }
 0x602   : > { %2866 = vmatprep.mubr.f32.mxu1 %v9272_v17 }
 0x604   : > { %v2529_v2 = vpop.trf.xlu0 }
 0x605   : > { %4733 = vmatmul.mubr.msk.f32.gmra.mrb[132].mxu1 %vm595_vm1, %v2529_v2  ;;  %v3462_v50 = vpop.trf.xlu1 }
 0x606   : > { %2872 = vmatprep.mubr.f32.mxu1 %v9272_v17 }
 0x608   : > { %v2530_v6 = vpop.trf.xlu0 }
 0x609   : > { %4734 = vmatmul.mubr.msk.f32.gmra.mrb[134].mxu1 %vm595_vm1, %v2530_v6  ;;  %v3463_v2 = vpop.trf.xlu1 }
 0x60a   : > { %2878 = vmatprep.mubr.f32.mxu1 %v9272_v17 }
 0x60c   : > { %v2531_v32 = vpop.trf.xlu0 }
 0x60d   : > { %4735 = vmatmul.mubr.msk.f32.gmra.mrb[136].mxu1 %vm595_vm1, %v2531_v32  ;;  %v3464_v32 = vpop.trf.xlu1 }
 0x60e   : > { %3660 = vmatprep.mubr.f32.mxu1 %v9272_v17 }
 0x611   : > { %4736 = vmatmul.mubr.msk.f32.vlgmr.msra.gmra.mrb[138].mxu1 %vm595_vm1, %v7223_v63  ;;  %v3484_v63 = vpop.trf.xlu0 }
 0x612   : > { %3666 = vmatprep.mubr.f32.mxu1 %v9272_v17 }
 0x615   : > { %4737 = vmatmul.mubr.msk.f32.gmra.mrb[140].mxu1 %vm595_vm1, %v7239_v47  ;;  %v3465_v47 = vpop.trf.xlu1  ;;  %v7339_v29 = vpop.trf.xlu0 }
 0x616   : > { %3672 = vmatprep.mubr.f32.mxu1 %v9272_v17 }
 0x619   : > { %4738 = vmatmul.mubr.msk.f32.gmra.mrb[142].mxu1 %vm595_vm1, %v7257_v57  ;;  %v3466_v57 = vpop.trf.xlu1 }
 0x61a   : > { %3678 = vmatprep.mubr.f32.mxu1 %v9272_v17 }
 0x61d   : > { %4739 = vmatmul.mubr.msk.f32.gmra.mrb[144].mxu1 %vm595_vm1, %v7264_v21  ;;  %v7345_v21 = vpop.trf.xlu0 }
 0x61e   : > { %3684 = vmatprep.mubr.f32.mxu1 %v9272_v17 }
 0x621   : > { %4740 = vmatmul.mubr.msk.f32.gmra.mrb[146].mxu1 %vm595_vm1, %v3456_v26  ;;  %v3467_v26 = vpop.trf.xlu1 }
 0x622   : > { %3690 = vmatprep.mubr.f32.mxu1 %v9272_v17 }
 0x625   : > { %4741 = vmatmul.mubr.msk.f32.gmra.mrb[148].mxu1 %vm595_vm1, %v3457_v11  ;;  %v7349_v11 = vpop.trf.xlu0 }
 0x626   : > { %3696 = vmatprep.mubr.f32.mxu1 %v9272_v17 }
 0x629   : > { %4742 = vmatmul.mubr.msk.f32.gmra.mrb[150].mxu1 %vm595_vm1, %v3458_v53 }
 0x62a   : > { %3702 = vmatprep.mubr.f32.mxu1 %v9272_v17 }
 0x62d   : > { %4743 = vmatmul.mubr.msk.f32.gmra.mrb[152].mxu1 %vm595_vm1, %v3459_v10 }
 0x62e   : > { %3708 = vmatprep.mubr.f32.mxu1 %v9272_v17 }
 0x631   : > { %4744 = vmatmul.mubr.msk.f32.gmra.mrb[154].mxu1 %vm595_vm1, %v3460_v37  ;;  %v7359_v37 = vpop.trf.xlu0 }
 0x632   : > { %3714 = vmatprep.mubr.f32.mxu1 %v9272_v17 }
 0x635   : > { %v1946_v6 = vpop.xlane.xlu1 %1945  ;;  %4745 = vmatmul.mubr.msk.f32.gmra.mrb[156].mxu1 %vm595_vm1, %v3461_v7 }
 0x636   : > { %v2031_v53 = vsub.f32 %v6943_v46, %v1946_v6  ;;  %v2032_v33 = vsub.f32 %v9373_v22, %v1946_v6  ;;  %3720 = vmatprep.mubr.f32.mxu1 %v9272_v17  ;;  %v7365_v46 = vpop.trf.xlu0 }
 0x638   : > { %v2113_v10 = vmul.f32 1.442695, %v2031_v53  ;;  %v2115_v58 = vmul.f32 1.442695, %v2032_v33  ;;  %v9376_v53 = vld [vmem:[#allocation10_spill] sm:$0xff] }
 0x639   : > { %4746 = vmatmul.mubr.msk.f32.gmra.mrb[158].mxu1 %vm595_vm1, %v3462_v50  ;;  %v7356_v45 = vpop.xlane.xlu1 %1975  ;;  %v2034_v14 = vsub.f32 %v9378_v36, %v9376_v53 }
 0x63a   : > { %5366 = vpow2.f32 %v2113_v10  ;;  %3726 = vmatprep.mubr.f32.mxu1 %v9272_v17  ;;  %v7381_v6 = vpop.trf.xlu0  ;;  %v9377_v10 = vld [vmem:[#allocation28_spill] sm:$0xff] }
 0x63b   : > { %5368 = vpow2.f32 %v2115_v58  ;;  %v2033_v59 = vsub.f32 %v9377_v10, %v9376_v53  ;;  %v2119_v55 = vmul.f32 1.442695, %v2034_v14  ;;  %v2123_v14 = vmul.f32 1.442695, %v2036_v61 }
 0x63d   : > { %4747 = vmatmul.mubr.msk.f32.gmra.mrb[160].mxu1 %vm595_vm1, %v3463_v2  ;;  %v7362_v7 = vpop.xlane.xlu1 %1978 }
 0x63e   : > { %3732 = vmatprep.mubr.f32.mxu1 %v9272_v17 }
 0x641   : > { %4748 = vmatmul.mubr.msk.f32.gmra.mrb[162].mxu1 %vm595_vm1, %v3464_v32  ;;  %v7368_v33 = vpop.xlane.xlu1 %1981 }
 0x642   : > { %3738 = vmatprep.mubr.f32.mxu1 %v9272_v17 }
 0x644   : > { %v7371_v22 = vpop.eup %5366 }
 0x645   : > { %9374 = vst [vmem:[#allocation27_spill] sm:$0xff] %v7371_v22  ;;  %v7373_v50 = vpop.eup %5368  ;;  %4749 = vmatmul.mubr.msk.f32.gmra.mrb[164].mxu1 %vm595_vm1, %v3465_v47  ;;  %v7376_v58 = vpop.xlane.xlu1 %1984 }
 0x646   : > { %9375 = vst [vmem:[#allocation51_spill] sm:$0xff] %v7373_v50  ;;  %v2232_v2 = vadd.f32 %v7373_v50, %v7371_v22  ;;  %3744 = vmatprep.mubr.f32.mxu1 %v9272_v17  ;;  %v7389_v47 = vpop.trf.xlu0 }
 0x648   : > { %2233 = vadd.xlane.f32.xlu0 %v2232_v2  ;;  %v2117_v2 = vmul.f32 1.442695, %v2033_v59 }
 0x649   : > { %4750 = vmatmul.mubr.msk.f32.gmra.mrb[166].mxu1 %vm595_vm1, %v3466_v57  ;;  %v7384_v32 = vpop.xlane.xlu1 %1987  ;;  %v9379_v57 = vld [vmem:[#allocation12_spill] sm:$0xff] }
 0x64a   : > { %3750 = vmatprep.mubr.f32.mxu1 %v9272_v17  ;;  %v2035_v50 = vsub.f32 %v9379_v57, %v7128_v56  ;;  %v7401_v36 = vpop.trf.xlu0  ;;  %v9382_v57 = vld [vmem:[#allocation18_spill] sm:$0xff]  ;;  %v9384_v56 = vld [vmem:[#allocation29_spill] sm:$0xff] }
 0x64c   : > { %v2121_v59 = vmul.f32 1.442695, %v2035_v50  ;;  %v9385_v50 = vld [vmem:[#allocation17_spill] sm:$0xff] }
 0x64d   : > { %4751 = vmatmul.mubr.msk.f32.gmra.mrb[168].mxu1 %vm595_vm1, %v3467_v26  ;;  %v2207_v22 = vpop.xlane.xlu1 %2206  ;;  %v9381_v26 = vld [vmem:[#allocation30_spill] sm:$0xff] }
 0x64e   : > { %3756 = vmatprep.mubr.f32.mxu1 %v9272_v17  ;;  %5370 = vrcp.f32 %v2207_v22  ;;  %v2037_v53 = vsub.f32 %v9381_v26, %v7138_v28  ;;  %v2038_v22 = vsub.f32 %v9382_v57, %v7138_v28  ;;  %v7416_v26 = vpop.trf.xlu0 }
 0x650   : > { %v2125_v12 = vmul.f32 1.442695, %v2037_v53 }
 0x651   : > { %v2210_v10 = vpop.xlane.xlu1 %2209  ;;  %4752 = vmatmul.mubr.msk.f32.gmra.mrb[170].mxu1 %vm595_vm1, %v3484_v63  ;;  %v2039_v63 = vsub.f32 %v9384_v56, %v7149_v62 }
 0x652   : > { %5372 = vrcp.f32 %v2210_v10  ;;  %3762 = vmatprep.mubr.f32.mxu1 %v9272_v17  ;;  %v2127_v10 = vmul.f32 1.442695, %v2038_v22 }
 0x653   : > { %5374 = vpow2.f32 %v2117_v2  ;;  %v2040_v2 = vsub.f32 %v9385_v50, %v7149_v62  ;;  %v2129_v28 = vmul.f32 1.442695, %v2039_v63  ;;  %v9387_v62 = vld [vmem:[#allocation25_spill] sm:$0xff] }
 0x654   : > { %5376 = vpow2.f32 %v2119_v55  ;;  %v2042_v22 = vsub.f32 %v9387_v62, %v7167_v30 }
 0x655   : > { %v7407_v42 = vpop.xlane.xlu1 %1990  ;;  %4753 = vmatmul.mubr.msk.f32.gmra.mrb[172].mxu1 %vm595_vm1, %v7339_v29  ;;  %5378 = vpow2.f32 %v2121_v59  ;;  %v2131_v53 = vmul.f32 1.442695, %v2040_v2  ;;  %v9386_v59 = vld [vmem:[#allocation22_spill] sm:$0xff] }
 0x656   : > { %9383 = vst [vmem:[#allocation10_spill] sm:$0xff] %v7407_v42  ;;  %3768 = vmatprep.mubr.f32.mxu1 %v9272_v17  ;;  %5380 = vpow2.f32 %v2123_v14  ;;  %v2041_v57 = vsub.f32 %v9386_v59, %v7167_v30  ;;  %v7442_v59 = vpop.trf.xlu0 }
 0x657   : > { %5382 = vpow2.f32 %v2125_v12 }
 0x658   : > { %v5371_v61 = vpop.eup %5370  ;;  %5384 = vpow2.f32 %v2127_v10  ;;  %v2133_v42 = vmul.f32 1.442695, %v2041_v57 }
 0x659   : > { %v7418_v55 = vpop.xlane.xlu1 %1993  ;;  %4754 = vmatmul.mubr.msk.f32.gmra.mrb[174].mxu1 %vm595_vm1, %v7345_v21  ;;  %v2334_v21 = vmul.f32 %v5371_v61, %v7163_v31  ;;  %v2333_v63 = vmul.f32 %v5371_v61, %v7160_v27  ;;  %5386 = vpow2.f32 %v2129_v28  ;;  %v2135_v61 = vmul.f32 1.442695, %v2042_v22  ;;  %v9394_v22 = vld [vmem:[#allocation19_spill] sm:$0xff] }
 0x65a   : > { %3774 = vmatprep.mubr.f32.mxu1 %v9272_v17 }
 0x65c   : > { %v5373_v29 = vpop.eup %5372  ;;  %v7427_v14 = vpop.f32.mrb[74].mxu1 }
 0x65d   : > { %9388 = vst [vmem:[#allocation28_spill] sm:$0xff] %v7427_v14  ;;  %v7429_v56 = vpop.f32.mrb[75].mxu1  ;;  %v2213_v50 = vpop.xlane.xlu1 %2212  ;;  %4755 = vmatmul.mubr.msk.f32.gmra.mrb[176].mxu1 %vm595_vm1, %v7349_v11  ;;  %v2336_v12 = vmul.f32 %v5373_v29, %v7180_v41  ;;  %v2335_v10 = vmul.f32 %v5373_v29, %v7175_v3  ;;  %v9390_v41 = vld [vmem:[#allocation20_spill] sm:$0xff]  ;;  %v9391_v29 = vld [vmem:[#allocation21_spill] sm:$0xff] }
 0x65e   : > { %9389 = vst [vmem:[#allocation14_spill] sm:$0xff] %v7429_v56  ;;  %v7437_v2 = vpop.eup %5374  ;;  %v2885_v30 = vmax.f32 %v7427_v14, %v7429_v56  ;;  %3780 = vmatprep.mubr.f32.mxu1 %v9272_v17  ;;  %v2043_v27 = vsub.f32 %v9390_v41, %v7183_v38  ;;  %5388 = vrcp.f32 %v2213_v50  ;;  %v2044_v56 = vsub.f32 %v9391_v29, %v7183_v38 }
 0x65f   : > { %v7444_v62 = vpop.eup %5376  ;;  %v4867_v11 = vpack.c.bf16 %v2336_v12, %v2334_v21  ;;  %v4869_v31 = vpack.c.bf16 %v2335_v10, %v2333_v63  ;;  %5390 = vpow2.f32 %v2131_v53  ;;  %v2045_v50 = vsub.f32 %v9394_v22, %v7189_v8 }
 0x660   : > { %v7448_v3 = vpop.f32.mrb[76].mxu1  ;;  %2886 = vmax.xlane.f32.xlu1 %v2885_v30  ;;  %v7456_v28 = vpop.eup %5378  ;;  %v2235_v53 = vadd.f32 %v7444_v62, %v7437_v2  ;;  %v2137_v21 = vmul.f32 1.442695, %v2043_v27  ;;  %v2139_v30 = vmul.f32 1.442695, %v2044_v56  ;;  %v9398_v56 = vld [vmem:[#allocation8_spill] sm:$0xff] }
 0x661   : > { %4868 = vmatprep.subr.bf16.mxu0 %v4867_v11  ;;  %v7452_v14 = vpop.f32.mrb[77].mxu1  ;;  %v2216_v60 = vpop.xlane.xlu1 %2215  ;;  %4756 = vmatmul.mubr.msk.f32.gmra.mrb[178].mxu1 %vm595_vm1, %v7359_v37  ;;  %9392 = vst [vmem:[#allocation12_spill] sm:$0xff] %v7456_v28  ;;  %v9395_v37 = vld [vmem:[#allocation9_spill] sm:$0xff]  ;;  %v2141_v27 = vmul.f32 1.442695, %v2045_v50 }
 0x662   : > { %v2888_v57 = vmax.f32 %v7448_v3, %v7452_v14  ;;  %5392 = vrcp.f32 %v2216_v60  ;;  %4870 = vmatpush1.bf16.xpose.msra.mxu0 %v4869_v31  ;;  %3786 = vmatprep.mubr.f32.mxu1 %v9272_v17  ;;  %v7463_v38 = vpop.eup %5380  ;;  %v2046_v12 = vsub.f32 %v9395_v37, %v7189_v8  ;;  %v7471_v60 = vpop.trf.xlu0 }
 0x663   : > { %9393 = vst [vmem:[#allocation13_spill] sm:$0xff] %v7463_v38  ;;  %5394 = vpow2.f32 %v2133_v42  ;;  %v7473_v10 = vpop.eup %5382  ;;  %v2238_v41 = vadd.f32 %v7463_v38, %v7456_v28 }
 0x664   : > { %v7469_v63 = vpop.f32.mrb[78].mxu1  ;;  %2236 = vadd.xlane.f32.xlu1 %v2235_v53  ;;  %2889 = vmax.xlane.f32.xlu0 %v2888_v57  ;;  %9396 = vst [vmem:[#allocation30_spill] sm:$0xff] %v7473_v10  ;;  %5396 = vpow2.f32 %v2135_v61  ;;  %v7481_v42 = vpop.eup %5384  ;;  %v2047_v61 = vsub.f32 %v9398_v56, %v7205_v16  ;;  %v2143_v29 = vmul.f32 1.442695, %v2046_v12  ;;  %v9399_v57 = vld [vmem:[#allocation11_spill] sm:$0xff] }
 0x665   : > { %v7475_v11 = vpop.f32.mrb[79].mxu1  ;;  %v7477_v31 = vpop.xlane.xlu1 %1996  ;;  %4757 = vmatmul.mubr.msk.f32.gmra.mrb[180].mxu1 %vm595_vm1, %v7365_v46  ;;  %9397 = vst [vmem:[#allocation18_spill] sm:$0xff] %v7481_v42  ;;  %5398 = vpow2.f32 %v2137_v21  ;;  %v2048_v53 = vsub.f32 %v9399_v57, %v7205_v16  ;;  %v2241_v16 = vadd.f32 %v7481_v42, %v7473_v10 }
 0x666   : > { %v2891_v8 = vmax.f32 %v7469_v63, %v7475_v11  ;;  %3792 = vmatprep.mubr.f32.mxu1 %v9272_v17  ;;  %v7494_v22 = vpop.eup %5386  ;;  %5400 = vpow2.f32 %v2139_v30  ;;  %v7507_v12 = vpop.trf.xlu0  ;;  %v2145_v30 = vmul.f32 1.442695, %v2047_v61 }
 0x667   : > { %5402 = vpow2.f32 %v2141_v27  ;;  %v2147_v56 = vmul.f32 1.442695, %v2048_v53 }
 0x668   : > { %v7492_v46 = vpop.f32.mrb[80].mxu1  ;;  %2892 = vmax.xlane.f32.xlu1 %v2891_v8  ;;  %2239 = vadd.xlane.f32.xlu0 %v2238_v41  ;;  %v5389_v50 = vpop.eup %5388  ;;  %5404 = vpow2.f32 %v2143_v29 }
 0x669   : > { %v7496_v37 = vpop.f32.mrb[81].mxu1  ;;  %v7498_v28 = vpop.xlane.xlu1 %1999  ;;  %4758 = vmatmul.mubr.msk.f32.gmra.mrb[182].mxu1 %vm595_vm1, %v7381_v6  ;;  %v2338_v10 = vmul.f32 %v5389_v50, %v7201_v54  ;;  %v2337_v27 = vmul.f32 %v5389_v50, %v7199_v34  ;;  %5406 = vpow2.f32 %v2145_v30  ;;  %v2051_v34 = vsub.f32 %v7004_v43, %v7356_v45 }
 0x66a   : > { %v2894_v21 = vmax.f32 %v7492_v46, %v7496_v37  ;;  %3798 = vmatprep.mubr.f32.mxu1 %v9272_v17  ;;  %v7509_v8 = vpop.eup %5390  ;;  %v2052_v50 = vsub.f32 %v7006_v40, %v7356_v45 }
 0x66b   : > { %v2153_v45 = vmul.f32 1.442695, %v2051_v34  ;;  %v2055_v34 = vsub.f32 %v7016_v18, %v7368_v33 }
 0x66c   : > { %v5393_v41 = vpop.eup %5392  ;;  %v7511_v57 = vpop.f32.mrb[82].mxu1  ;;  %2242 = vadd.xlane.f32.xlu1 %v2241_v16  ;;  %2895 = vmax.xlane.f32.xlu0 %v2894_v21  ;;  %v2244_v21 = vadd.f32 %v7509_v8, %v7494_v22 }
 0x66d   : > { %v7513_v6 = vpop.f32.mrb[83].mxu1  ;;  %v2219_v38 = vpop.xlane.xlu1 %2218  ;;  %4759 = vmatmul.mubr.msk.f32.gmra.mrb[184].mxu1 %vm595_vm1, %v7389_v47  ;;  %v2340_v42 = vmul.f32 %v5393_v41, %v7216_v4  ;;  %v2339_v61 = vmul.f32 %v5393_v41, %v7212_v5 }
 0x66e   : > { %v7521_v29 = vpop.eup %5394  ;;  %v2897_v53 = vmax.f32 %v7511_v57, %v7513_v6  ;;  %3804 = vmatprep.mubr.f32.mxu1 %v9272_v17  ;;  %5408 = vrcp.f32 %v2219_v38  ;;  %v7534_v4 = vpop.trf.xlu0 }
 0x66f   : > { %9400 = vst [vmem:[#allocation29_spill] sm:$0xff] %v7521_v29  ;;  %v7528_v16 = vpop.eup %5396  ;;  %v4871_v54 = vpack.c.bf16 %v2340_v42, %v2338_v10  ;;  %v4873_v47 = vpack.c.bf16 %v2339_v61, %v2337_v27  ;;  %5410 = vpow2.f32 %v2147_v56  ;;  %v2155_v56 = vmul.f32 1.442695, %v2052_v50 }
 0x670   : > { %9401 = vst [vmem:[#allocation17_spill] sm:$0xff] %v7528_v16  ;;  %v7532_v5 = vpop.f32.mrb[84].mxu1  ;;  %2898 = vmax.xlane.f32.xlu1 %v2897_v53  ;;  %2245 = vadd.xlane.f32.xlu0 %v2244_v21  ;;  %v7542_v10 = vpop.eup %5398  ;;  %v2247_v38 = vadd.f32 %v7528_v16, %v7521_v29  ;;  %v2056_v50 = vsub.f32 %v7018_v51, %v7368_v33 }
 0x671   : > { %4872 = vmatprep.subr.bf16.mxu0 %v4871_v54  ;;  %v7538_v41 = vpop.f32.mrb[85].mxu1  ;;  %v2222_v30 = vpop.xlane.xlu1 %2221  ;;  %4760 = vmatmul.mubr.msk.f32.gmra.mrb[186].mxu1 %vm595_vm1, %v7401_v36  ;;  %9402 = vst [vmem:[#allocation22_spill] sm:$0xff] %v7542_v10 }
 0x672   : > { %v2900_v43 = vmax.f32 %v7532_v5, %v7538_v41  ;;  %5412 = vrcp.f32 %v2222_v30  ;;  %4874 = vmatpush1.bf16.xpose.msra.mxu0 %v4873_v47  ;;  %3810 = vmatprep.mubr.f32.mxu1 %v9272_v17  ;;  %v7549_v40 = vpop.eup %5400  ;;  %v7568_v47 = vpop.trf.xlu0 }
 0x673   : > { %9403 = vst [vmem:[#allocation25_spill] sm:$0xff] %v7549_v40  ;;  %v7553_v36 = vpop.eup %5402  ;;  %v2250_v54 = vadd.f32 %v7549_v40, %v7542_v10  ;;  %5414 = vpow2.f32 %v2153_v45  ;;  %v2161_v45 = vmul.f32 1.442695, %v2055_v34 }
 0x674   : > { %v7551_v42 = vpop.f32.mrb[86].mxu1  ;;  %2248 = vadd.xlane.f32.xlu1 %v2247_v38  ;;  %2901 = vmax.xlane.f32.xlu0 %v2900_v43  ;;  %9404 = vst [vmem:[#allocation20_spill] sm:$0xff] %v7553_v36  ;;  %v7561_v53 = vpop.eup %5404  ;;  %5416 = vpow2.f32 %v2155_v56 }
 0x675   : > { %v7555_v27 = vpop.f32.mrb[87].mxu1  ;;  %v7557_v61 = vpop.xlane.xlu1 %2002  ;;  %4761 = vmatmul.mubr.msk.f32.gmra.mrb[188].mxu1 %vm595_vm1, %v7416_v26  ;;  %9405 = vst [vmem:[#allocation21_spill] sm:$0xff] %v7561_v53  ;;  %v2253_v51 = vadd.f32 %v7561_v53, %v7553_v36  ;;  %5418 = vpow2.f32 %v2161_v45 }
 0x676   : > { %v2903_v21 = vmax.f32 %v7551_v42, %v7555_v27  ;;  %3816 = vmatprep.mubr.f32.mxu1 %v9272_v17  ;;  %v7576_v30 = vpop.eup %5406  ;;  %v7593_v40 = vpop.trf.xlu0 }
 0x678   : > { %v7574_v26 = vpop.f32.mrb[88].mxu1  ;;  %2904 = vmax.xlane.f32.xlu1 %v2903_v21  ;;  %2251 = vadd.xlane.f32.xlu0 %v2250_v54  ;;  %v5409_v10 = vpop.eup %5408  ;;  %v2163_v21 = vmul.f32 1.442695, %v2056_v50 }
 0x679   : > { %v7578_v43 = vpop.f32.mrb[89].mxu1  ;;  %v7580_v38 = vpop.xlane.xlu1 %2005  ;;  %4762 = vmatmul.mubr.msk.f32.gmra.mrb[190].mxu1 %vm595_vm1, %v7442_v59  ;;  %v2342_v36 = vmul.f32 %v5409_v10, %v7237_v9  ;;  %v2341_v34 = vmul.f32 %v5409_v10, %v7234_v35  ;;  %v2060_v9 = vsub.f32 %v7030_v13, %v7384_v32 }
 0x67a   : > { %v2906_v18 = vmax.f32 %v7574_v26, %v7578_v43  ;;  %3822 = vmatprep.mubr.f32.mxu1 %v9272_v17  ;;  %v7589_v33 = vpop.eup %5410 }
 0x67b   : > { %v2256_v16 = vadd.f32 %v7589_v33, %v7576_v30 }
 0x67c   : > { %v5413_v56 = vpop.eup %5412  ;;  %v7591_v54 = vpop.f32.mrb[90].mxu1  ;;  %2254 = vadd.xlane.f32.xlu1 %v2253_v51  ;;  %2907 = vmax.xlane.f32.xlu0 %v2906_v18  ;;  %v2059_v51 = vsub.f32 %v7028_v15, %v7384_v32 }
 0x67d   : > { %v7595_v59 = vpop.f32.mrb[91].mxu1  ;;  %v2225_v29 = vpop.xlane.xlu1 %2224  ;;  %4763 = vmatmul.mubr.msk.f32.gmra.mrb[192].mxu1 %vm595_vm1, %v7471_v60  ;;  %v2344_v53 = vmul.f32 %v5413_v56, %v7254_v19  ;;  %v2343_v50 = vmul.f32 %v5413_v56, %v7249_v25  ;;  %v2053_v56 = vsub.f32 %v7010_v1, %v7362_v7  ;;  %v2063_v1 = vsub.f32 %v7041_v23, %v7418_v55 }
 0x67e   : > { %v2909_v18 = vmax.f32 %v7591_v54, %v7595_v59  ;;  %3828 = vmatprep.mubr.f32.mxu1 %v9272_v17  ;;  %5420 = vrcp.f32 %v2225_v29  ;;  %v7618_v10 = vpop.eup %5414  ;;  %v2169_v45 = vmul.f32 1.442695, %v2059_v51  ;;  %v2171_v29 = vmul.f32 1.442695, %v2060_v9 }
 0x67f   : > { %v4875_v19 = vpack.c.bf16 %v2344_v53, %v2342_v36  ;;  %v4877_v60 = vpack.c.bf16 %v2343_v50, %v2341_v34  ;;  %5422 = vpow2.f32 %v2163_v21  ;;  %9406 = vst [vmem:[#allocation19_spill] sm:$0xff] %v7618_v10  ;;  %v7623_v32 = vpop.eup %5416 }
 0x680   : > { %v7612_v35 = vpop.f32.mrb[92].mxu1  ;;  %2910 = vmax.xlane.f32.xlu1 %v2909_v18  ;;  %2257 = vadd.xlane.f32.xlu0 %v2256_v16  ;;  %9407 = vst [vmem:[#allocation9_spill] sm:$0xff] %v7623_v32  ;;  %v2262_v51 = vadd.f32 %v7623_v32, %v7618_v10  ;;  %v7648_v9 = vpop.eup %5418 }
 0x681   : > { %4876 = vmatprep.subr.bf16.mxu0 %v4875_v19  ;;  %v7614_v15 = vpop.f32.mrb[93].mxu1  ;;  %v2228_v25 = vpop.xlane.xlu1 %2227  ;;  %4764 = vmatmul.mubr.msk.f32.gmra.mrb[194].mxu1 %vm595_vm1, %v7507_v12  ;;  %9408 = vst [vmem:[#allocation8_spill] sm:$0xff] %v7648_v9 }
 0x682   : > { %v2912_v13 = vmax.f32 %v7612_v35, %v7614_v15  ;;  %5424 = vrcp.f32 %v2228_v25  ;;  %4878 = vmatpush1.bf16.xpose.msra.mxu0 %v4877_v60  ;;  %3834 = vmatprep.mubr.f32.mxu1 %v9272_v17  ;;  %v2177_v25 = vmul.f32 1.442695, %v2063_v1 }
 0x683   : > { %v1973_v16 = vpop.xlane.xlu0 %1972  ;;  %5426 = vpow2.f32 %v2169_v45 }
 0x684   : > { %v2049_v36 = vsub.f32 %v6998_v20, %v1973_v16  ;;  %v2050_v53 = vsub.f32 %v7000_v52, %v1973_v16  ;;  %2913 = vmax.xlane.f32.xlu0 %v2912_v13  ;;  %v7627_v12 = vpop.f32.mrb[94].mxu1  ;;  %v2054_v20 = vsub.f32 %v7012_v0, %v7362_v7  ;;  %5428 = vpow2.f32 %v2171_v29 }
 0x685   : > { %4765 = vmatmul.mubr.msk.f32.gmra.mrb[196].mxu1 %vm595_vm1, %v7534_v4  ;;  %v7633_v21 = vpop.f32.mrb[95].mxu1  ;;  %v2064_v4 = vsub.f32 %v7043_v24, %v7418_v55  ;;  %v2157_v7 = vmul.f32 1.442695, %v2053_v56  ;;  %v9412_v56 = vld [vmem:[#allocation31_spill] sm:$0xff] }
 0x686   : > { %v2149_v34 = vmul.f32 1.442695, %v2049_v36  ;;  %v2151_v50 = vmul.f32 1.442695, %v2050_v53  ;;  %3840 = vmatprep.mubr.f32.mxu1 %v9272_v17  ;;  %v2915_v52 = vmax.f32 %v7627_v12, %v7633_v21  ;;  %v2159_v55 = vmul.f32 1.442695, %v2054_v20 }
 0x687   : > { %v2179_v45 = vmul.f32 1.442695, %v2064_v4 }
 0x688   : > { %5430 = vpow2.f32 %v2149_v34  ;;  %v7646_v18 = vpop.f32.mrb[96].mxu1  ;;  %2263 = vadd.xlane.f32.xlu0 %v2262_v51  ;;  %v5421_v0 = vpop.eup %5420  ;;  %v2057_v34 = vsub.f32 %v9412_v56, %v7376_v58 }
 0x689   : > { %5432 = vpow2.f32 %v2151_v50  ;;  %v7650_v19 = vpop.f32.mrb[97].mxu1  ;;  %4766 = vmatmul.mubr.msk.f32.gmra.mrb[198].mxu1 %vm595_vm1, %v7568_v47  ;;  %v7657_v24 = vpop.eup %5422  ;;  %v2346_v29 = vmul.f32 %v5421_v0, %v7277_v39  ;;  %v2345_v36 = vmul.f32 %v5421_v0, %v7274_v48  ;;  %v9413_v39 = vld [vmem:[#allocation32_spill] sm:$0xff] }
 0x68a   : > { %v2918_v23 = vmax.f32 %v7646_v18, %v7650_v19  ;;  %3846 = vmatprep.mubr.f32.mxu1 %v9272_v17  ;;  %9409 = vst [vmem:[#allocation11_spill] sm:$0xff] %v7657_v24  ;;  %5434 = vpow2.f32 %v2157_v7  ;;  %v2165_v7 = vmul.f32 1.442695, %v2057_v34  ;;  %v9422_v34 = vld [vmem:[#allocation34_spill] sm:$0xff] }
 0x68b   : > { %5436 = vpow2.f32 %v2159_v55 }
 0x68c   : > { %v5425_v60 = vpop.eup %5424  ;;  %2919 = vmax.xlane.f32.xlu0 %v2918_v23  ;;  %v7659_v13 = vpop.f32.mrb[98].mxu1  ;;  %5438 = vpow2.f32 %v2177_v25 }
 0x68d   : > { %9410 = vst [vmem:[#allocation52_spill] sm:$0xff] %v7659_v13  ;;  %4767 = vmatmul.mubr.msk.f32.gmra.mrb[200].mxu1 %vm595_vm1, %v7593_v40  ;;  %v7663_v47 = vpop.f32.mrb[99].mxu1  ;;  %v2348_v16 = vmul.f32 %v5425_v60, %v7288_v49  ;;  %v2347_v53 = vmul.f32 %v5425_v60, %v7283_v44  ;;  %v2268_v40 = vadd.f32 %v7657_v24, %v7648_v9  ;;  %v7678_v20 = vpop.eup %5426  ;;  %5440 = vpow2.f32 %v2179_v45  ;;  %v9477_v24 = vld [vmem:[#allocation49_spill] sm:$0xff] }
 0x68e   : > { %9411 = vst [vmem:[#allocation53_spill] sm:$0xff] %v7663_v47  ;;  %4484 = vmatprep.mubr.f32.mxu1 %v9272_v17  ;;  %v2058_v49 = vsub.f32 %v9413_v39, %v7376_v58  ;;  %9414 = vst [vmem:[#allocation31_spill] sm:$0xff] %v7678_v20  ;;  %v7682_v1 = vpop.eup %5428  ;;  %5442 = vpow2.f32 %v2165_v7  ;;  %v9431_v17 = vld [vmem:[#allocation35_spill] sm:$0xff]  ;;  %v2009_v9 = vpop.xlane.xlu1 %2008 }
 0x68f   : > { %v4879_v51 = vpack.c.bf16 %v2348_v16, %v2346_v29  ;;  %v4881_v48 = vpack.c.bf16 %v2347_v53, %v2345_v36  ;;  %9415 = vst [vmem:[#allocation32_spill] sm:$0xff] %v7682_v1  ;;  %v9420_v29 = vld [vmem:[#allocation10_spill] sm:$0xff]  ;;  %v9421_v16 = vld [vmem:[#allocation33_spill] sm:$0xff]  ;;  %v2274_v56 = vadd.f32 %v7682_v1, %v7678_v20 }
 0x690   : > { %v7680_v44 = vpop.f32.mrb[100].mxu1  ;;  %2269 = vadd.xlane.f32.xlu0 %v2268_v40  ;;  %v2167_v55 = vmul.f32 1.442695, %v2058_v49  ;;  %v2061_v36 = vsub.f32 %v9421_v16, %v9420_v29  ;;  %v2062_v40 = vsub.f32 %v9422_v34, %v9420_v29  ;;  %v9424_v49 = vld [vmem:[#allocation37_spill] sm:$0xff] }
 0x691   : > { %4880 = vmatprep.subr.bf16.mxu0 %v4879_v51  ;;  %v7684_v4 = vpop.f32.mrb[101].mxu1  ;;  %v2067_v51 = vsub.f32 %v9424_v49, %v7498_v28 }
 0x692   : > { %v7686_v0 = vpop.eup %5430  ;;  %v2924_v58 = vmax.f32 %v7680_v44, %v7684_v4  ;;  %4882 = vmatpush1.bf16.xpose.msra.mxu0 %v4881_v48  ;;  %5444 = vpow2.f32 %v2167_v55  ;;  %v2173_v55 = vmul.f32 1.442695, %v2061_v36  ;;  %v2065_v36 = vsub.f32 %v9431_v17, %v7477_v31  ;;  %v9436_v17 = vld [vmem:[#allocation42_spill] sm:$0xff] }
 0x693   : > { %9416 = vst [vmem:[#allocation54_spill] sm:$0xff] %v7686_v0  ;;  %v7690_v23 = vpop.eup %5432  ;;  %v2185_v49 = vmul.f32 1.442695, %v2067_v51  ;;  %v9434_v51 = vld [vmem:[#allocation41_spill] sm:$0xff] }
 0x694   : > { %9417 = vst [vmem:[#allocation55_spill] sm:$0xff] %v7690_v23  ;;  %2925 = vmax.xlane.f32.xlu0 %v2924_v58  ;;  %v2259_v60 = vadd.f32 %v7690_v23, %v7686_v0  ;;  %v7694_v25 = vpop.f32.mrb[102].mxu1  ;;  %v7706_v39 = vpop.eup %5434  ;;  %v9427_v58 = vld [vmem:[#allocation38_spill] sm:$0xff]  ;;  %5446 = vpow2.f32 %v2173_v55  ;;  %v2072_v55 = vsub.f32 %v9436_v17, %v7580_v38 }
 0x695   : > { %9418 = vst [vmem:[#allocation56_spill] sm:$0xff] %v7694_v25  ;;  %v7696_v45 = vpop.f32.mrb[103].mxu1  ;;  %9423 = vst [vmem:[#allocation10_spill] sm:$0xff] %v7706_v39  ;;  %v7712_v7 = vpop.eup %5436 }
 0x696   : > { %9419 = vst [vmem:[#allocation57_spill] sm:$0xff] %v7696_v45  ;;  %2260 = vadd.xlane.f32.xlu1 %v2259_v60  ;;  %v2927_v53 = vmax.f32 %v7694_v25, %v7696_v45  ;;  %9426 = vst [vmem:[#allocation34_spill] sm:$0xff] %v7712_v7  ;;  %v2068_v60 = vsub.f32 %v9427_v58, %v7498_v28  ;;  %v7718_v50 = vpop.eup %5438  ;;  %v2265_v28 = vadd.f32 %v7712_v7, %v7706_v39  ;;  %v9478_v25 = vld [vmem:[#allocation27_spill] sm:$0xff] }
 0x697   : > { %9429 = vst [vmem:[#allocation38_spill] sm:$0xff] %v7718_v50  ;;  %v7725_v34 = vpop.eup %5440 }
 0x698   : > { %v7710_v48 = vpop.f32.mrb[104].mxu1  ;;  %2275 = vadd.xlane.f32.xlu0 %v2274_v56  ;;  %9430 = vst [vmem:[#allocation58_spill] sm:$0xff] %v7725_v34  ;;  %v2175_v56 = vmul.f32 1.442695, %v2062_v40  ;;  %v2187_v58 = vmul.f32 1.442695, %v2068_v60  ;;  %v2280_v20 = vadd.f32 %v7725_v34, %v7718_v50  ;;  %v7735_v40 = vpop.eup %5442 }
 0x699   : > { %9425 = vst [vmem:[#allocation33_spill] sm:$0xff] %v7710_v48  ;;  %v7716_v16 = vpop.f32.mrb[105].mxu1  ;;  %9433 = vst [vmem:[#allocation35_spill] sm:$0xff] %v7735_v40 }
 0x69a   : > { %9428 = vst [vmem:[#allocation37_spill] sm:$0xff] %v7716_v16  ;;  %v2930_v29 = vmax.f32 %v7710_v48, %v7716_v16  ;;  %2916 = vmax.xlane.f32.xlu1 %v2915_v52  ;;  %5448 = vpow2.f32 %v2175_v56  ;;  %v9432_v52 = vld [vmem:[#allocation36_spill] sm:$0xff]  ;;  %v9437_v56 = vmax.f32 %v7659_v13, %v7663_v47 }
 0x69b   : > { %v2066_v1 = vsub.f32 %v9432_v52, %v7477_v31  ;;  %5450 = vpow2.f32 %v2185_v49 }
 0x69c   : > { %2931 = vmax.xlane.f32.xlu0 %v2930_v29  ;;  %v2071_v29 = vsub.f32 %v9434_v51, %v7580_v38  ;;  %v7739_v60 = vpop.eup %5444  ;;  %5452 = vpow2.f32 %v2187_v58  ;;  %v2195_v51 = vmul.f32 1.442695, %v2072_v55  ;;  %v9440_v58 = vld [vmem:[#allocation39_spill] sm:$0xff] }
 0x69d   : > { %9435 = vst [vmem:[#allocation36_spill] sm:$0xff] %v7739_v60  ;;  %v2183_v31 = vmul.f32 1.442695, %v2066_v1  ;;  %v2271_v49 = vadd.f32 %v7739_v60, %v7735_v40  ;;  %v2069_v38 = vsub.f32 %v9440_v58, %v7557_v61  ;;  %v9441_v1 = vld [vmem:[#allocation40_spill] sm:$0xff] }
 0x69e   : > { %2266 = vadd.xlane.f32.xlu1 %v2265_v28  ;;  %v2181_v28 = vmul.f32 1.442695, %v2065_v36  ;;  %v2193_v52 = vmul.f32 1.442695, %v2071_v29  ;;  %v2070_v29 = vsub.f32 %v9441_v1, %v7557_v61  ;;  %v7758_v17 = vpop.eup %5446 }
 0x69f   : > { %9442 = vst [vmem:[#allocation39_spill] sm:$0xff] %v7758_v17 }
 0x6a0   : > { %2281 = vadd.xlane.f32.xlu0 %v2280_v20  ;;  %v2012_v20 = vpop.xlane.xlu1 %2011  ;;  %5454 = vpow2.f32 %v2181_v28  ;;  %v9446_v28 = vld [vmem:[#allocation48_spill] sm:$0xff] }
 0x6a1   : > { %5456 = vpow2.f32 %v2183_v31  ;;  %v2076_v58 = vsub.f32 %v9446_v28, %v2012_v20  ;;  %v2189_v31 = vmul.f32 1.442695, %v2069_v38 }
 0x6a2   : > { %2922 = vmax.xlane.f32.xlu1 %v9437_v56  ;;  %5458 = vpow2.f32 %v2193_v52  ;;  %v9443_v56 = vld [vmem:[#allocation47_spill] sm:$0xff]  ;;  %v2191_v52 = vmul.f32 1.442695, %v2070_v29 }
 0x6a3   : > { %v2075_v55 = vsub.f32 %v9443_v56, %v2012_v20  ;;  %5460 = vpow2.f32 %v2195_v51  ;;  %v2203_v20 = vmul.f32 1.442695, %v2076_v58 }
 0x6a4   : > { %v7748_v50 = vpop.f32.mrb[106].mxu1  ;;  %v7763_v60 = vpop.eup %5448  ;;  %5462 = vpow2.f32 %v2189_v31 }
 0x6a5   : > { %9438 = vst [vmem:[#allocation41_spill] sm:$0xff] %v7748_v50  ;;  %v7750_v34 = vpop.f32.mrb[107].mxu1  ;;  %9445 = vst [vmem:[#allocation47_spill] sm:$0xff] %v7763_v60  ;;  %v7768_v39 = vpop.eup %5450  ;;  %v2201_v56 = vmul.f32 1.442695, %v2075_v55  ;;  %5464 = vpow2.f32 %v2191_v52  ;;  %v9453_v55 = vld [vmem:[#allocation46_spill] sm:$0xff] }
 0x6a6   : > { %9439 = vst [vmem:[#allocation42_spill] sm:$0xff] %v7750_v34  ;;  %2272 = vadd.xlane.f32.xlu1 %v2271_v49  ;;  %v2933_v36 = vmax.f32 %v7748_v50, %v7750_v34  ;;  %9448 = vst [vmem:[#allocation59_spill] sm:$0xff] %v7768_v39  ;;  %v7772_v1 = vpop.eup %5452  ;;  %v2277_v34 = vadd.f32 %v7763_v60, %v7758_v17  ;;  %v9452_v50 = vld [vmem:[#allocation45_spill] sm:$0xff] }
 0x6a7   : > { %9449 = vst [vmem:[#allocation60_spill] sm:$0xff] %v7772_v1  ;;  %v2073_v38 = vsub.f32 %v9452_v50, %v2009_v9  ;;  %v2286_v29 = vadd.f32 %v7772_v1, %v7768_v39  ;;  %5466 = vpow2.f32 %v2201_v56 }
 0x6a8   : > { %v7761_v40 = vpop.f32.mrb[108].mxu1  ;;  %5468 = vpow2.f32 %v2203_v20 }
 0x6a9   : > { %9444 = vst [vmem:[#allocation40_spill] sm:$0xff] %v7761_v40  ;;  %v7766_v49 = vpop.f32.mrb[109].mxu1  ;;  %v2197_v31 = vmul.f32 1.442695, %v2073_v38 }
 0x6aa   : > { %9447 = vst [vmem:[#allocation48_spill] sm:$0xff] %v7766_v49  ;;  %v2936_v61 = vmax.f32 %v7761_v40, %v7766_v49  ;;  %2928 = vmax.xlane.f32.xlu1 %v2927_v53  ;;  %v7786_v7 = vpop.eup %5454  ;;  %v9476_v49 = vld [vmem:[#allocation51_spill] sm:$0xff] }
 0x6ab   : > { %9454 = vst [vmem:[#allocation45_spill] sm:$0xff] %v7786_v7  ;;  %v7790_v58 = vpop.eup %5456  ;;  %5470 = vpow2.f32 %v2197_v31 }
 0x6ac   : > { %2937 = vmax.xlane.f32.xlu0 %v2936_v61  ;;  %v7776_v51 = vpop.f32.mrb[110].mxu1  ;;  %v2074_v61 = vsub.f32 %v9453_v55, %v2009_v9  ;;  %9456 = vst [vmem:[#allocation63_spill] sm:$0xff] %v7790_v58  ;;  %v2283_v56 = vadd.f32 %v7790_v58, %v7786_v7 }
 0x6ad   : > { %9450 = vst [vmem:[#allocation61_spill] sm:$0xff] %v7776_v51  ;;  %v7778_v28 = vpop.f32.mrb[111].mxu1 }
 0x6ae   : > { %9451 = vst [vmem:[#allocation62_spill] sm:$0xff] %v7778_v28  ;;  %2278 = vadd.xlane.f32.xlu1 %v2277_v34  ;;  %v2939_v53 = vmax.f32 %v7776_v51, %v7778_v28  ;;  %v7794_v34 = vpop.eup %5458  ;;  %v2199_v9 = vmul.f32 1.442695, %v2074_v61 }
 0x6af   : > { %9458 = vst [vmem:[#allocation65_spill] sm:$0xff] %v7794_v34  ;;  %v7798_v52 = vpop.eup %5460 }
 0x6b0   : > { %v7788_v17 = vpop.f32.mrb[112].mxu1  ;;  %2287 = vadd.xlane.f32.xlu0 %v2286_v29  ;;  %9459 = vst [vmem:[#allocation66_spill] sm:$0xff] %v7798_v52  ;;  %v2292_v38 = vadd.f32 %v7798_v52, %v7794_v34  ;;  %5472 = vpow2.f32 %v2199_v9 }
 0x6b1   : > { %9455 = vst [vmem:[#allocation46_spill] sm:$0xff] %v7788_v17  ;;  %v7792_v50 = vpop.f32.mrb[113].mxu1 }
 0x6b2   : > { %9457 = vst [vmem:[#allocation64_spill] sm:$0xff] %v7792_v50  ;;  %v2942_v39 = vmax.f32 %v7788_v17, %v7792_v50  ;;  %2934 = vmax.xlane.f32.xlu1 %v2933_v36  ;;  %v7810_v36 = vpop.eup %5462  ;;  %v9475_v17 = vld [vmem:[#allocation50_spill] sm:$0xff] }
 0x6b3   : > { %9462 = vst [vmem:[#allocation69_spill] sm:$0xff] %v7810_v36 }
 0x6b4   : > { %2943 = vmax.xlane.f32.xlu0 %v2942_v39  ;;  %v7802_v29 = vpop.f32.mrb[114].mxu1  ;;  %v7814_v39 = vpop.eup %5464 }
 0x6b5   : > { %9460 = vst [vmem:[#allocation67_spill] sm:$0xff] %v7802_v29  ;;  %v7804_v55 = vpop.f32.mrb[115].mxu1  ;;  %9464 = vst [vmem:[#allocation71_spill] sm:$0xff] %v7814_v39  ;;  %v7818_v58 = vpop.eup %5466  ;;  %v2289_v9 = vadd.f32 %v7814_v39, %v7810_v36 }
 0x6b6   : > { %9461 = vst [vmem:[#allocation68_spill] sm:$0xff] %v7804_v55  ;;  %2284 = vadd.xlane.f32.xlu1 %v2283_v56  ;;  %v2945_v20 = vmax.f32 %v7802_v29, %v7804_v55  ;;  %9466 = vst [vmem:[#allocation73_spill] sm:$0xff] %v7818_v58  ;;  %v7822_v56 = vpop.eup %5468 }
 0x6b7   : > { %9467 = vst [vmem:[#allocation74_spill] sm:$0xff] %v7822_v56  ;;  %v2298_v1 = vadd.f32 %v7822_v56, %v7818_v58  ;;  %v7834_v55 = vpop.eup %5470 }
 0x6b8   : > { %v7812_v61 = vpop.f32.mrb[116].mxu1  ;;  %2293 = vadd.xlane.f32.xlu0 %v2292_v38  ;;  %9470 = vst [vmem:[#allocation77_spill] sm:$0xff] %v7834_v55 }
 0x6b9   : > { %9463 = vst [vmem:[#allocation70_spill] sm:$0xff] %v7812_v61  ;;  %v7816_v7 = vpop.f32.mrb[117].mxu1 }
 0x6ba   : > { %9465 = vst [vmem:[#allocation72_spill] sm:$0xff] %v7816_v7  ;;  %v2948_v31 = vmax.f32 %v7812_v61, %v7816_v7  ;;  %2940 = vmax.xlane.f32.xlu1 %v2939_v53 }
 0x6bc   : > { %2949 = vmax.xlane.f32.xlu0 %v2948_v31  ;;  %v7826_v34 = vpop.f32.mrb[118].mxu1  ;;  %v7838_v31 = vpop.eup %5472 }
 0x6bd   : > { %9468 = vst [vmem:[#allocation75_spill] sm:$0xff] %v7826_v34  ;;  %v7828_v52 = vpop.f32.mrb[119].mxu1  ;;  %9472 = vst [vmem:[#allocation79_spill] sm:$0xff] %v7838_v31 }
 0x6be   : > { %9469 = vst [vmem:[#allocation76_spill] sm:$0xff] %v7828_v52  ;;  %2290 = vadd.xlane.f32.xlu1 %v2289_v9  ;;  %v2951_v38 = vmax.f32 %v7826_v34, %v7828_v52  ;;  %v2295_v9 = vadd.f32 %v7838_v31, %v7834_v55 }
 0x6c0   : > { %v7836_v53 = vpop.f32.mrb[120].mxu1  ;;  %2299 = vadd.xlane.f32.xlu0 %v2298_v1 }
 0x6c1   : > { %9471 = vst [vmem:[#allocation78_spill] sm:$0xff] %v7836_v53  ;;  %v7840_v29 = vpop.f32.mrb[121].mxu1 }
 0x6c2   : > { %9473 = vst [vmem:[#allocation80_spill] sm:$0xff] %v7840_v29  ;;  %v2954_v36 = vmax.f32 %v7836_v53, %v7840_v29  ;;  %2946 = vmax.xlane.f32.xlu1 %v2945_v20 }
 0x6c4   : > { %2955 = vmax.xlane.f32.xlu0 %v2954_v36  ;;  %v7846_v39 = vpop.f32.mrb[122].mxu1 }
 0x6c5   : > { %v7848_v58 = vpop.f32.mrb[123].mxu1 }
 0x6c6   : > { %2296 = vadd.xlane.f32.xlu1 %v2295_v9  ;;  %v2231_v9 = vpop.xlane.xlu1 %2230 }
 0x6c7   : > { %5474 = vrcp.f32 %v2231_v9 }
 0x6c8   : > { %v7852_v56 = vpop.f32.mrb[124].mxu1 }
 0x6c9   : > { %v7854_v52 = vpop.f32.mrb[125].mxu1 }
 0x6ca   : > { %2952 = vmax.xlane.f32.xlu1 %v2951_v38 }
 0x6cc   : > { %v7858_v36 = vpop.f32.mrb[126].mxu1 }
 0x6cd   : > { %v7860_v34 = vpop.f32.mrb[127].mxu1 }
 0x6d0   : > { %v7864_v31 = vpop.f32.mrb[128].mxu1 }
 0x6d1   : > { %v7866_v29 = vpop.f32.mrb[129].mxu1  ;;  %v5475_v9 = vpop.eup %5474 }
 0x6d2   : > { %v2350_v60 = vmul.f32 %v5475_v9, %v9475_v17  ;;  %v2349_v45 = vmul.f32 %v5475_v9, %v9477_v24 }
 0x6d4   : > { %v7870_v38 = vpop.f32.mrb[130].mxu1 }
 0x6d5   : > { %v2234_v53 = vpop.xlane.xlu0 %2233  ;;  %v7872_v20 = vpop.f32.mrb[131].mxu1 }
 0x6d6   : > { %5476 = vrcp.f32 %v2234_v53 }
 0x6d8   : > { %v7876_v7 = vpop.f32.mrb[132].mxu1 }
 0x6d9   : > { %v7878_v55 = vpop.f32.mrb[133].mxu1 }
 0x6dc   : > { %v7882_v28 = vpop.f32.mrb[134].mxu1 }
 0x6dd   : > { %v7884_v1 = vpop.f32.mrb[135].mxu1 }
 0x6e0   : > { %v5477_v50 = vpop.eup %5476  ;;  %v7888_v53 = vpop.f32.mrb[136].mxu1 }
 0x6e1   : > { %9474 = vst [vmem:[#allocation81_spill] sm:$0xff] %v7888_v53  ;;  %v2352_v40 = vmul.f32 %v5477_v50, %v9476_v49  ;;  %v2351_v47 = vmul.f32 %v5477_v50, %v9478_v25  ;;  %v7894_v61 = vpop.f32.mrb[137].mxu1 }
 0x6e2   : > { %9479 = vst [vmem:[#allocation50_spill] sm:$0xff] %v7894_v61 }
 0x6e3   : > { %v4883_v10 = vpack.c.bf16 %v2352_v40, %v2350_v60  ;;  %v4885_v0 = vpack.c.bf16 %v2351_v47, %v2349_v45  ;;  %v9486_v45 = vld [vmem:[#allocation28_spill] sm:$0xff]  ;;  %v9487_v60 = vld [vmem:[#allocation14_spill] sm:$0xff] }
 0x6e4   : > { %v7898_v23 = vpop.f32.mrb[138].mxu1 }
 0x6e5   : > { %9480 = vst [vmem:[#allocation51_spill] sm:$0xff] %v7898_v23  ;;  %4884 = vmatprep.subr.bf16.mxu0 %v4883_v10  ;;  %v7900_v51 = vpop.f32.mrb[139].mxu1 }
 0x6e6   : > { %9481 = vst [vmem:[#allocation49_spill] sm:$0xff] %v7900_v51  ;;  %4886 = vmatpush1.bf16.xpose.msra.mxu0 %v4885_v0 }
 0x6e8   : > { %v7904_v49 = vpop.f32.mrb[140].mxu1 }
 0x6e9   : > { %9482 = vst [vmem:[#allocation27_spill] sm:$0xff] %v7904_v49  ;;  %v7906_v24 = vpop.f32.mrb[141].mxu1 }
 0x6ea   : > { %9483 = vst [vmem:[#allocation82_spill] sm:$0xff] %v7906_v24 }
 0x6ec   : > { %v7910_v50 = vpop.f32.mrb[142].mxu1 }
 0x6ed   : > { %9484 = vst [vmem:[#allocation83_spill] sm:$0xff] %v7910_v50  ;;  %v2887_v40 = vpop.xlane.xlu1 %2886  ;;  %v7912_v47 = vpop.f32.mrb[143].mxu1 }
 0x6ee   : > { %9485 = vst [vmem:[#allocation84_spill] sm:$0xff] %v7912_v47  ;;  %v2981_v10 = vsub.f32 %v9486_v45, %v2887_v40  ;;  %v2982_v9 = vsub.f32 %v9487_v60, %v2887_v40 }
 0x6f0   : > { %v3045_v17 = vmul.f32 1.442695, %v2981_v10  ;;  %v3047_v13 = vmul.f32 1.442695, %v2982_v9  ;;  %v7918_v32 = vpop.f32.mrb[144].mxu1 }
 0x6f1   : > { %9488 = vst [vmem:[#allocation28_spill] sm:$0xff] %v7918_v32  ;;  %v2237_v16 = vpop.xlane.xlu1 %2236  ;;  %v2890_v48 = vpop.xlane.xlu0 %2889 }
 0x6f2   : > { %5478 = vpow2.f32 %v3045_v17  ;;  %v2983_v25 = vsub.f32 %v7448_v3, %v2890_v48  ;;  %v2984_v24 = vsub.f32 %v7452_v14, %v2890_v48  ;;  %v7922_v49 = vpop.f32.mrb[145].mxu1 }
 0x6f3   : > { %9489 = vst [vmem:[#allocation14_spill] sm:$0xff] %v7922_v49  ;;  %5480 = vpow2.f32 %v3047_v13 }
 0x6f4   : > { %5482 = vrcp.f32 %v2237_v16  ;;  %v3049_v45 = vmul.f32 1.442695, %v2983_v25  ;;  %v3051_v60 = vmul.f32 1.442695, %v2984_v24  ;;  %v7926_v10 = vpop.f32.mrb[146].mxu1 }
 0x6f5   : > { %9490 = vst [vmem:[#allocation85_spill] sm:$0xff] %v7926_v10  ;;  %v2893_v9 = vpop.xlane.xlu1 %2892  ;;  %v2240_v0 = vpop.xlane.xlu0 %2239 }
 0x6f6   : > { %5484 = vpow2.f32 %v3049_v45  ;;  %v2985_v17 = vsub.f32 %v7469_v63, %v2893_v9  ;;  %v2986_v3 = vsub.f32 %v7475_v11, %v2893_v9  ;;  %v7930_v47 = vpop.f32.mrb[147].mxu1 }
 0x6f7   : > { %9491 = vst [vmem:[#allocation86_spill] sm:$0xff] %v7930_v47  ;;  %5486 = vpow2.f32 %v3051_v60 }
 0x6f8   : > { %v3053_v13 = vmul.f32 1.442695, %v2985_v17  ;;  %v3055_v48 = vmul.f32 1.442695, %v2986_v3  ;;  %5488 = vrcp.f32 %v2240_v0  ;;  %v7934_v16 = vpop.f32.mrb[148].mxu1 }
 0x6f9   : > { %9492 = vst [vmem:[#allocation87_spill] sm:$0xff] %v7934_v16  ;;  %v2243_v24 = vpop.xlane.xlu1 %2242  ;;  %v2896_v25 = vpop.xlane.xlu0 %2895 }
 0x6fa   : > { %5490 = vpow2.f32 %v3053_v13  ;;  %v2987_v45 = vsub.f32 %v7492_v46, %v2896_v25  ;;  %v2988_v63 = vsub.f32 %v7496_v37, %v2896_v25  ;;  %v7938_v40 = vpop.f32.mrb[149].mxu1 }
 0x6fb   : > { %9493 = vst [vmem:[#allocation88_spill] sm:$0xff] %v7938_v40  ;;  %5492 = vpow2.f32 %v3055_v48 }
 0x6fc   : > { %v7942_v60 = vpop.eup %5478  ;;  %5494 = vrcp.f32 %v2243_v24  ;;  %v3057_v9 = vmul.f32 1.442695, %v2987_v45  ;;  %v3059_v0 = vmul.f32 1.442695, %v2988_v63  ;;  %v7944_v17 = vpop.f32.mrb[150].mxu1 }
 0x6fd   : > { %9494 = vst [vmem:[#allocation89_spill] sm:$0xff] %v7942_v60  ;;  %9495 = vst [vmem:[#allocation90_spill] sm:$0xff] %v7944_v17  ;;  %v7946_v3 = vpop.eup %5480  ;;  %v2899_v13 = vpop.xlane.xlu1 %2898  ;;  %v9502_v17 = vld [vmem:[#allocation12_spill] sm:$0xff] }
 0x6fe   : > { %9496 = vst [vmem:[#allocation91_spill] sm:$0xff] %v7946_v3  ;;  %v2246_v14 = vpop.xlane.xlu0 %2245  ;;  %v5483_v46 = vpop.eup %5482  ;;  %5496 = vpow2.f32 %v3057_v9  ;;  %v2989_v37 = vsub.f32 %v7511_v57, %v2899_v13  ;;  %v2990_v48 = vsub.f32 %v7513_v6, %v2899_v13  ;;  %v3173_v25 = vadd.f32 %v7946_v3, %v7942_v60 }
 0x6ff   : > { %v7952_v11 = vpop.f32.mrb[151].mxu1  ;;  %5498 = vpow2.f32 %v3059_v0  ;;  %v2354_v60 = vmul.f32 %v5483_v46, %v7444_v62  ;;  %v2353_v3 = vmul.f32 %v5483_v46, %v7437_v2 }
 0x700   : > { %9497 = vst [vmem:[#allocation92_spill] sm:$0xff] %v7952_v11  ;;  %v7956_v45 = vpop.eup %5484  ;;  %v3061_v63 = vmul.f32 1.442695, %v2989_v37  ;;  %v3063_v47 = vmul.f32 1.442695, %v2990_v48  ;;  %5500 = vrcp.f32 %v2246_v14  ;;  %3174 = vadd.xlane.f32.xlu1 %v3173_v25  ;;  %v7958_v9 = vpop.f32.mrb[152].mxu1 }
 0x701   : > { %9498 = vst [vmem:[#allocation93_spill] sm:$0xff] %v7956_v45  ;;  %9499 = vst [vmem:[#allocation94_spill] sm:$0xff] %v7958_v9  ;;  %v7960_v57 = vpop.eup %5486  ;;  %v2249_v6 = vpop.xlane.xlu1 %2248  ;;  %v9501_v48 = vld [vmem:[#allocation13_spill] sm:$0xff] }
 0x702   : > { %v2902_v13 = vpop.xlane.xlu0 %2901  ;;  %v5489_v0 = vpop.eup %5488  ;;  %5502 = vpow2.f32 %v3061_v63  ;;  %v3176_v14 = vadd.f32 %v7960_v57, %v7956_v45 }
 0x703   : > { %v2991_v24 = vsub.f32 %v7532_v5, %v2902_v13  ;;  %v2992_v11 = vsub.f32 %v7538_v41, %v2902_v13  ;;  %v7968_v37 = vpop.f32.mrb[153].mxu1  ;;  %5504 = vpow2.f32 %v3063_v47  ;;  %v2356_v25 = vmul.f32 %v5489_v0, %v9501_v48 }
 0x704   : > { %9500 = vst [vmem:[#allocation95_spill] sm:$0xff] %v7968_v37  ;;  %v2355_v10 = vmul.f32 %v5489_v0, %v9502_v17  ;;  %v7974_v2 = vpop.eup %5490  ;;  %5506 = vrcp.f32 %v2249_v6  ;;  %v9504_v41 = vmax.f32 %v7846_v39, %v7848_v58  ;;  %3177 = vadd.xlane.f32.xlu0 %v3176_v14  ;;  %v7979_v63 = vpop.f32.mrb[154].mxu1 }
 0x705   : > { %9503 = vst [vmem:[#allocation13_spill] sm:$0xff] %v7974_v2  ;;  %v3065_v46 = vmul.f32 1.442695, %v2991_v24  ;;  %v3067_v5 = vmul.f32 1.442695, %v2992_v11  ;;  %v7981_v47 = vpop.eup %5492  ;;  %v2905_v13 = vpop.xlane.xlu1 %2904  ;;  %v4887_v48 = vpack.c.bf16 %v2356_v25, %v2354_v60 }
 0x706   : > { %2958 = vmax.xlane.f32.xlu1 %v9504_v41  ;;  %9505 = vst [vmem:[#allocation12_spill] sm:$0xff] %v7981_v47  ;;  %v2252_v17 = vpop.xlane.xlu0 %2251  ;;  %v4889_v0 = vpack.c.bf16 %v2355_v10, %v2353_v3  ;;  %v5495_v45 = vpop.eup %5494  ;;  %v2993_v62 = vsub.f32 %v7551_v42, %v2905_v13  ;;  %v2994_v24 = vsub.f32 %v7555_v27, %v2905_v13 }
 0x707   : > { %5508 = vpow2.f32 %v3065_v46  ;;  %v3179_v11 = vadd.f32 %v7981_v47, %v7974_v2  ;;  %v7987_v6 = vpop.f32.mrb[155].mxu1  ;;  %4888 = vmatprep.subr.bf16.mxu0 %v4887_v48  ;;  %v9509_v3 = vmax.f32 %v7852_v56, %v7854_v52  ;;  %v9511_v48 = vld [vmem:[#allocation30_spill] sm:$0xff] }
 0x708   : > { %5510 = vpow2.f32 %v3067_v5  ;;  %v7991_v41 = vpop.eup %5496  ;;  %v3069_v60 = vmul.f32 1.442695, %v2993_v62  ;;  %v3071_v10 = vmul.f32 1.442695, %v2994_v24  ;;  %4890 = vmatpush1.bf16.xpose.msra.mxu0 %v4889_v0  ;;  %v7993_v42 = vpop.f32.mrb[156].mxu1  ;;  %v9510_v5 = vld [vmem:[#allocation18_spill] sm:$0xff]  ;;  %v2357_v14 = vmul.f32 %v5495_v45, %v9511_v48 }
 0x709   : > { %9506 = vst [vmem:[#allocation96_spill] sm:$0xff] %v7991_v41  ;;  %5512 = vrcp.f32 %v2252_v17  ;;  %9507 = vst [vmem:[#allocation97_spill] sm:$0xff] %v7993_v42  ;;  %v7995_v27 = vpop.eup %5498  ;;  %2961 = vmax.xlane.f32.xlu0 %v9509_v3  ;;  %v2255_v25 = vpop.xlane.xlu1 %2254  ;;  %v2358_v13 = vmul.f32 %v5495_v45, %v9510_v5 }
 0x70a   : > { %3180 = vadd.xlane.f32.xlu1 %v3179_v11  ;;  %9508 = vst [vmem:[#allocation98_spill] sm:$0xff] %v7995_v27  ;;  %v2908_v46 = vpop.xlane.xlu0 %2907  ;;  %v5501_v2 = vpop.eup %5500  ;;  %5514 = vpow2.f32 %v3069_v60  ;;  %v3182_v0 = vadd.f32 %v7995_v27, %v7991_v41 }
 0x70b   : > { %v2995_v62 = vsub.f32 %v7574_v26, %v2908_v46  ;;  %v2996_v17 = vsub.f32 %v7578_v43, %v2908_v46  ;;  %v8006_v24 = vpop.f32.mrb[157].mxu1  ;;  %5516 = vpow2.f32 %v3071_v10  ;;  %v2360_v11 = vmul.f32 %v5501_v2, %v7509_v8 }
 0x70c   : > { %9512 = vst [vmem:[#allocation18_spill] sm:$0xff] %v8006_v24  ;;  %v2359_v3 = vmul.f32 %v5501_v2, %v7494_v22  ;;  %v8012_v45 = vpop.eup %5502  ;;  %v9514_v26 = vmax.f32 %v7858_v36, %v7860_v34  ;;  %v8017_v43 = vpop.f32.mrb[158].mxu1  ;;  %5518 = vrcp.f32 %v2255_v25 }
 0x70d   : > { %9513 = vst [vmem:[#allocation30_spill] sm:$0xff] %v8012_v45  ;;  %v3073_v60 = vmul.f32 1.442695, %v2995_v62  ;;  %v3075_v48 = vmul.f32 1.442695, %v2996_v17  ;;  %v8019_v46 = vpop.eup %5504  ;;  %3183 = vadd.xlane.f32.xlu0 %v3182_v0  ;;  %v2911_v8 = vpop.xlane.xlu1 %2910  ;;  %v4891_v10 = vpack.c.bf16 %v2360_v11, %v2358_v13  ;;  %v9518_v11 = vmax.f32 %v7864_v31, %v7866_v29 }
 0x70e   : > { %2964 = vmax.xlane.f32.xlu1 %v9514_v26  ;;  %9515 = vst [vmem:[#allocation99_spill] sm:$0xff] %v8019_v46  ;;  %v2258_v22 = vpop.xlane.xlu0 %2257  ;;  %v4893_v2 = vpack.c.bf16 %v2359_v3, %v2357_v14  ;;  %v5507_v41 = vpop.eup %5506  ;;  %v2997_v5 = vsub.f32 %v7591_v54, %v2911_v8  ;;  %v2998_v62 = vsub.f32 %v7595_v59, %v2911_v8  ;;  %v9520_v8 = vld [vmem:[#allocation29_spill] sm:$0xff] }
 0x70f   : > { %5520 = vpow2.f32 %v3073_v60  ;;  %v3185_v17 = vadd.f32 %v8019_v46, %v8012_v45  ;;  %v8025_v26 = vpop.f32.mrb[159].mxu1  ;;  %4892 = vmatprep.subr.bf16.mxu0 %v4891_v10  ;;  %v9519_v60 = vld [vmem:[#allocation17_spill] sm:$0xff]  ;;  %v2361_v10 = vmul.f32 %v5507_v41, %v9520_v8 }
 0x710   : > { %5522 = vpow2.f32 %v3075_v48  ;;  %v3077_v13 = vmul.f32 1.442695, %v2997_v5  ;;  %v3079_v14 = vmul.f32 1.442695, %v2998_v62  ;;  %4894 = vmatpush1.bf16.xpose.msra.mxu0 %v4893_v2  ;;  %v8031_v54 = vpop.f32.mrb[160].mxu1  ;;  %v2362_v48 = vmul.f32 %v5507_v41, %v9519_v60 }
 0x711   : > { %v8029_v0 = vpop.eup %5508  ;;  %5524 = vrcp.f32 %v2258_v22  ;;  %2967 = vmax.xlane.f32.xlu0 %v9518_v11  ;;  %v8040_v25 = vpop.f32.mrb[161].mxu1  ;;  %v9522_v11 = vld [vmem:[#allocation22_spill] sm:$0xff] }
 0x712   : > { %9516 = vst [vmem:[#allocation100_spill] sm:$0xff] %v8029_v0  ;;  %3186 = vadd.xlane.f32.xlu1 %v3185_v17  ;;  %v8033_v59 = vpop.eup %5510  ;;  %v2914_v3 = vpop.xlane.xlu0 %2913  ;;  %5526 = vpow2.f32 %v3077_v13  ;;  %v9521_v17 = vld [vmem:[#allocation25_spill] sm:$0xff] }
 0x713   : > { %9517 = vst [vmem:[#allocation101_spill] sm:$0xff] %v8033_v59  ;;  %v5513_v5 = vpop.eup %5512  ;;  %v2999_v22 = vsub.f32 %v7612_v35, %v2914_v3  ;;  %v3000_v2 = vsub.f32 %v7614_v15, %v2914_v3  ;;  %v3188_v62 = vadd.f32 %v8033_v59, %v8029_v0  ;;  %5528 = vpow2.f32 %v3079_v14 }
 0x714   : > { %v2364_v45 = vmul.f32 %v5513_v5, %v9521_v17  ;;  %v2363_v46 = vmul.f32 %v5513_v5, %v9522_v11  ;;  %v8050_v41 = vpop.eup %5514  ;;  %v9524_v35 = vmax.f32 %v7870_v38, %v7872_v20  ;;  %v8055_v15 = vpop.f32.mrb[162].mxu1 }
 0x715   : > { %9523 = vst [vmem:[#allocation17_spill] sm:$0xff] %v8050_v41  ;;  %v3081_v8 = vmul.f32 1.442695, %v2999_v22  ;;  %v3083_v27 = vmul.f32 1.442695, %v3000_v2  ;;  %v8057_v13 = vpop.eup %5516  ;;  %3189 = vadd.xlane.f32.xlu0 %v3188_v62  ;;  %v8059_v5 = vpop.f32.mrb[163].mxu1 }
 0x716   : > { %2970 = vmax.xlane.f32.xlu1 %v9524_v35  ;;  %9525 = vst [vmem:[#allocation29_spill] sm:$0xff] %v8057_v13  ;;  %v4895_v14 = vpack.c.bf16 %v2364_v45, %v2362_v48  ;;  %v2264_v3 = vpop.xlane.xlu0 %2263  ;;  %v4897_v17 = vpack.c.bf16 %v2363_v46, %v2361_v10  ;;  %v3191_v11 = vadd.f32 %v8057_v13, %v8050_v41  ;;  %v5519_v2 = vpop.eup %5518  ;;  %v9530_v13 = vld [vmem:[#allocation20_spill] sm:$0xff] }
 0x717   : > { %5530 = vpow2.f32 %v3081_v8  ;;  %v9528_v46 = vmax.f32 %v7876_v7, %v7878_v55 }
 0x718   : > { %5532 = vpow2.f32 %v3083_v27  ;;  %4896 = vmatprep.subr.bf16.mxu0 %v4895_v14  ;;  %v8067_v62 = vpop.f32.mrb[164].mxu1 }
 0x719   : > { %v8065_v35 = vpop.eup %5520  ;;  %4898 = vmatpush1.bf16.xpose.msra.mxu0 %v4897_v17  ;;  %2973 = vmax.xlane.f32.xlu0 %v9528_v46  ;;  %v8074_v10 = vpop.f32.mrb[165].mxu1  ;;  %v2365_v46 = vmul.f32 %v5519_v2, %v9530_v13  ;;  %v9541_v13 = vld [vmem:[#allocation82_spill] sm:$0xff] }
 0x71a   : > { %9526 = vst [vmem:[#allocation25_spill] sm:$0xff] %v8065_v35  ;;  %3192 = vadd.xlane.f32.xlu1 %v3191_v11  ;;  %v8069_v45 = vpop.eup %5522  ;;  %v2920_v48 = vpop.xlane.xlu0 %2919  ;;  %v9529_v11 = vld [vmem:[#allocation21_spill] sm:$0xff] }
 0x71b   : > { %9527 = vst [vmem:[#allocation22_spill] sm:$0xff] %v8069_v45  ;;  %v5525_v8 = vpop.eup %5524  ;;  %v3003_v22 = vsub.f32 %v7646_v18, %v2920_v48  ;;  %v3004_v27 = vsub.f32 %v7650_v19, %v2920_v48  ;;  %v3194_v14 = vadd.f32 %v8069_v45, %v8065_v35  ;;  %v2366_v60 = vmul.f32 %v5519_v2, %v9529_v11 }
 0x71c   : > { %v2368_v41 = vmul.f32 %v5525_v8, %v7589_v33  ;;  %v2367_v0 = vmul.f32 %v5525_v8, %v7576_v30  ;;  %v8086_v59 = vpop.eup %5526  ;;  %v9532_v19 = vmax.f32 %v7882_v28, %v7884_v1  ;;  %v8091_v48 = vpop.f32.mrb[166].mxu1 }
 0x71d   : > { %9531 = vst [vmem:[#allocation21_spill] sm:$0xff] %v8086_v59  ;;  %v3089_v47 = vmul.f32 1.442695, %v3003_v22  ;;  %v3091_v18 = vmul.f32 1.442695, %v3004_v27  ;;  %v8093_v35 = vpop.eup %5528  ;;  %3195 = vadd.xlane.f32.xlu0 %v3194_v14  ;;  %v8095_v45 = vpop.f32.mrb[167].mxu1 }
 0x71e   : > { %2976 = vmax.xlane.f32.xlu1 %v9532_v19  ;;  %9533 = vst [vmem:[#allocation20_spill] sm:$0xff] %v8093_v35  ;;  %v4899_v11 = vpack.c.bf16 %v2368_v41, %v2366_v60  ;;  %v2270_v17 = vpop.xlane.xlu0 %2269  ;;  %v4901_v33 = vpack.c.bf16 %v2367_v0, %v2365_v46  ;;  %v3197_v30 = vadd.f32 %v8093_v35, %v8086_v59 }
 0x71f   : > { %5534 = vpow2.f32 %v3089_v47  ;;  %v9536_v47 = vmax.f32 %v7888_v53, %v7894_v61  ;;  %v9553_v53 = vld [vmem:[#allocation53_spill] sm:$0xff] }
 0x720   : > { %5536 = vpow2.f32 %v3091_v18  ;;  %4900 = vmatprep.subr.bf16.mxu0 %v4899_v11  ;;  %v8103_v2 = vpop.f32.mrb[168].mxu1  ;;  %v9537_v11 = vmax.f32 %v7898_v23, %v7900_v51 }
 0x721   : > { %v8101_v22 = vpop.eup %5530  ;;  %4902 = vmatpush1.bf16.xpose.msra.mxu0 %v4901_v33  ;;  %5538 = vrcp.f32 %v2264_v3  ;;  %2979 = vmax.xlane.f32.xlu0 %v9536_v47  ;;  %v8110_v41 = vpop.f32.mrb[169].mxu1 }
 0x722   : > { %9534 = vst [vmem:[#allocation102_spill] sm:$0xff] %v8101_v22  ;;  %3198 = vadd.xlane.f32.xlu1 %v3197_v30  ;;  %v8105_v60 = vpop.eup %5532  ;;  %v2926_v0 = vpop.xlane.xlu0 %2925 }
 0x723   : > { %9535 = vst [vmem:[#allocation103_spill] sm:$0xff] %v8105_v60  ;;  %v3007_v8 = vsub.f32 %v7680_v44, %v2926_v0  ;;  %v3008_v27 = vsub.f32 %v7684_v4, %v2926_v0  ;;  %v3200_v46 = vadd.f32 %v8105_v60, %v8101_v22  ;;  %v2261_v18 = vpop.xlane.xlu1 %2260  ;;  %v9544_v60 = vld [vmem:[#allocation33_spill] sm:$0xff] }
 0x724   : > { %5540 = vrcp.f32 %v2261_v18  ;;  %v8121_v33 = vpop.f32.mrb[170].mxu1 }
 0x725   : > { %v3097_v19 = vmul.f32 1.442695, %v3007_v8  ;;  %v3099_v3 = vmul.f32 1.442695, %v3008_v27  ;;  %3201 = vadd.xlane.f32.xlu0 %v3200_v46  ;;  %v8123_v44 = vpop.f32.mrb[171].mxu1  ;;  %v9540_v46 = vld [vmem:[#allocation27_spill] sm:$0xff] }
 0x726   : > { %3854 = vmax.xlane.f32.xlu1 %v9537_v11  ;;  %v2276_v4 = vpop.xlane.xlu0 %2275  ;;  %v9542_v14 = vmax.f32 %v9540_v46, %v9541_v13  ;;  %v9548_v46 = vld [vmem:[#allocation55_spill] sm:$0xff] }
 0x727   : > { %5542 = vpow2.f32 %v3097_v19  ;;  %v2917_v47 = vpop.xlane.xlu1 %2916 }
 0x728   : > { %5544 = vpow2.f32 %v3099_v3  ;;  %v3001_v8 = vsub.f32 %v7627_v12, %v2917_v47  ;;  %v3002_v27 = vsub.f32 %v7633_v21, %v2917_v47  ;;  %v8131_v18 = vpop.f32.mrb[172].mxu1  ;;  %v9545_v21 = vld [vmem:[#allocation37_spill] sm:$0xff] }
 0x729   : > { %v8127_v0 = vpop.eup %5534  ;;  %3857 = vmax.xlane.f32.xlu0 %v9542_v14  ;;  %v8138_v19 = vpop.f32.mrb[173].mxu1  ;;  %5546 = vrcp.f32 %v2270_v17 }
 0x72a   : > { %9538 = vst [vmem:[#allocation104_spill] sm:$0xff] %v8127_v0  ;;  %v8133_v11 = vpop.eup %5536  ;;  %9543 = vst [vmem:[#allocation106_spill] sm:$0xff] %v8138_v19  ;;  %v2932_v22 = vpop.xlane.xlu0 %2931  ;;  %v3085_v30 = vmul.f32 1.442695, %v3001_v8  ;;  %v3087_v3 = vmul.f32 1.442695, %v3002_v27 }
 0x72b   : > { %9539 = vst [vmem:[#allocation105_spill] sm:$0xff] %v8133_v11  ;;  %v3011_v12 = vsub.f32 %v9544_v60, %v2932_v22  ;;  %v5539_v35 = vpop.eup %5538  ;;  %v3012_v47 = vsub.f32 %v9545_v21, %v2932_v22  ;;  %v2267_v51 = vpop.xlane.xlu1 %2266  ;;  %v3206_v23 = vadd.f32 %v8133_v11, %v8127_v0  ;;  %v9547_v60 = vld [vmem:[#allocation9_spill] sm:$0xff]  ;;  %v9550_v11 = vld [vmem:[#allocation19_spill] sm:$0xff] }
 0x72c   : > { %5548 = vpow2.f32 %v3085_v30  ;;  %v8146_v13 = vpop.f32.mrb[174].mxu1  ;;  %v2372_v22 = vmul.f32 %v5539_v35, %v9547_v60  ;;  %v9549_v30 = vld [vmem:[#allocation54_spill] sm:$0xff]  ;;  %v2371_v61 = vmul.f32 %v5539_v35, %v9550_v11 }
 0x72d   : > { %v3105_v14 = vmul.f32 1.442695, %v3011_v12  ;;  %5550 = vpow2.f32 %v3087_v3  ;;  %v3107_v8 = vmul.f32 1.442695, %v3012_v47  ;;  %3207 = vadd.xlane.f32.xlu0 %v3206_v23  ;;  %v8148_v27 = vpop.f32.mrb[175].mxu1  ;;  %v9552_v23 = vld [vmem:[#allocation52_spill] sm:$0xff] }
 0x72e   : > { %9546 = vst [vmem:[#allocation33_spill] sm:$0xff] %v8148_v27  ;;  %v5541_v59 = vpop.eup %5540 }
 0x72f   : > { %5552 = vpow2.f32 %v3105_v14  ;;  %v2923_v21 = vpop.xlane.xlu1 %2922  ;;  %v2370_v0 = vmul.f32 %v5541_v59, %v9548_v46  ;;  %v2369_v12 = vmul.f32 %v5541_v59, %v9549_v30 }
 0x730   : > { %5554 = vpow2.f32 %v3107_v8  ;;  %v3005_v47 = vsub.f32 %v9552_v23, %v2923_v21  ;;  %v3006_v14 = vsub.f32 %v9553_v53, %v2923_v21  ;;  %v8160_v19 = vpop.f32.mrb[176].mxu1  ;;  %v9556_v8 = vmax.f32 %v7918_v32, %v7922_v49 }
 0x731   : > { %v8156_v3 = vpop.eup %5542  ;;  %5556 = vrcp.f32 %v2267_v51  ;;  %9554 = vst [vmem:[#allocation9_spill] sm:$0xff] %v8160_v19  ;;  %v8167_v46 = vpop.f32.mrb[177].mxu1  ;;  %v4903_v59 = vpack.c.bf16 %v2372_v22, %v2370_v0  ;;  %v4905_v60 = vpack.c.bf16 %v2371_v61, %v2369_v12  ;;  %v9574_v19 = vld [vmem:[#allocation10_spill] sm:$0xff] }
 0x732   : > { %9551 = vst [vmem:[#allocation37_spill] sm:$0xff] %v8156_v3  ;;  %v8162_v17 = vpop.eup %5544  ;;  %3863 = vmax.xlane.f32.xlu0 %v9556_v8  ;;  %9557 = vst [vmem:[#allocation54_spill] sm:$0xff] %v8167_v46  ;;  %v3093_v35 = vmul.f32 1.442695, %v3005_v47  ;;  %v3095_v11 = vmul.f32 1.442695, %v3006_v14  ;;  %5558 = vrcp.f32 %v2276_v4  ;;  %v2282_v8 = vpop.xlane.xlu0 %2281 }
 0x733   : > { %9555 = vst [vmem:[#allocation55_spill] sm:$0xff] %v8162_v17  ;;  %v3212_v53 = vadd.f32 %v8162_v17, %v8156_v3  ;;  %v2273_v21 = vpop.xlane.xlu1 %2272  ;;  %4904 = vmatprep.subr.bf16.mxu0 %v4903_v59  ;;  %v5547_v23 = vpop.eup %5546  ;;  %v9563_v14 = vld [vmem:[#allocation56_spill] sm:$0xff]  ;;  %v9569_v17 = vld [vmem:[#allocation11_spill] sm:$0xff] }
 0x734   : > { %5560 = vpow2.f32 %v3093_v35  ;;  %4906 = vmatpush1.bf16.xpose.msra.mxu0 %v4905_v60  ;;  %v8173_v30 = vpop.f32.mrb[178].mxu1  ;;  %v9564_v60 = vld [vmem:[#allocation57_spill] sm:$0xff]  ;;  %v2376_v49 = vmul.f32 %v5547_v23, %v9569_v17 }
 0x735   : > { %9558 = vst [vmem:[#allocation19_spill] sm:$0xff] %v8173_v30  ;;  %5562 = vpow2.f32 %v3095_v11  ;;  %v8175_v61 = vpop.f32.mrb[179].mxu1  ;;  %v9572_v30 = vld [vmem:[#allocation48_spill] sm:$0xff] }
 0x736   : > { %3213 = vadd.xlane.f32.xlu0 %v3212_v53  ;;  %9559 = vst [vmem:[#allocation52_spill] sm:$0xff] %v8175_v61  ;;  %v8177_v0 = vpop.eup %5548  ;;  %5564 = vrcp.f32 %v2273_v21  ;;  %v9567_v21 = vmax.f32 %v7934_v16, %v7938_v40 }
 0x737   : > { %9560 = vst [vmem:[#allocation53_spill] sm:$0xff] %v8177_v0  ;;  %v8181_v12 = vpop.eup %5550  ;;  %v2929_v4 = vpop.xlane.xlu1 %2928  ;;  %5566 = vrcp.f32 %v2282_v8 }
 0x738   : > { %9561 = vst [vmem:[#allocation107_spill] sm:$0xff] %v8181_v12  ;;  %v3009_v59 = vsub.f32 %v9563_v14, %v2929_v4  ;;  %v3010_v35 = vsub.f32 %v9564_v60, %v2929_v4  ;;  %v8187_v51 = vpop.f32.mrb[180].mxu1  ;;  %v3203_v11 = vadd.f32 %v8181_v12, %v8177_v0  ;;  %v9570_v14 = vld [vmem:[#allocation8_spill] sm:$0xff] }
 0x739   : > { %v8183_v47 = vpop.eup %5552  ;;  %9565 = vst [vmem:[#allocation56_spill] sm:$0xff] %v8187_v51  ;;  %v8196_v22 = vpop.f32.mrb[181].mxu1  ;;  %v2375_v32 = vmul.f32 %v5547_v23, %v9570_v14  ;;  %v9571_v12 = vld [vmem:[#allocation40_spill] sm:$0xff] }
 0x73a   : > { %9562 = vst [vmem:[#allocation108_spill] sm:$0xff] %v8183_v47  ;;  %v8191_v53 = vpop.eup %5554  ;;  %3869 = vmax.xlane.f32.xlu0 %v9567_v21  ;;  %9568 = vst [vmem:[#allocation109_spill] sm:$0xff] %v8196_v22  ;;  %v2938_v3 = vpop.xlane.xlu0 %2937  ;;  %v3101_v60 = vmul.f32 1.442695, %v3009_v59  ;;  %v3103_v61 = vmul.f32 1.442695, %v3010_v35  ;;  %3204 = vadd.xlane.f32.xlu1 %v3203_v11 }
 0x73b   : > { %9566 = vst [vmem:[#allocation57_spill] sm:$0xff] %v8191_v53  ;;  %v5557_v4 = vpop.eup %5556  ;;  %v3015_v8 = vsub.f32 %v9571_v12, %v2938_v3  ;;  %v3016_v46 = vsub.f32 %v9572_v30, %v2938_v3  ;;  %v2279_v40 = vpop.xlane.xlu1 %2278  ;;  %v9573_v21 = vld [vmem:[#allocation34_spill] sm:$0xff]  ;;  %v3218_v17 = vadd.f32 %v8191_v53, %v8183_v47  ;;  %v9587_v47 = vld [vmem:[#allocation35_spill] sm:$0xff] }
 0x73c   : > { %v2374_v16 = vmul.f32 %v5557_v4, %v9573_v21  ;;  %v2373_v27 = vmul.f32 %v5557_v4, %v9574_v19  ;;  %5568 = vpow2.f32 %v3101_v60  ;;  %v8208_v59 = vpop.f32.mrb[182].mxu1  ;;  %v5559_v35 = vpop.eup %5558  ;;  %v9578_v19 = vld [vmem:[#allocation84_spill] sm:$0xff]  ;;  %v9588_v53 = vld [vmem:[#allocation31_spill] sm:$0xff] }
 0x73d   : > { %v3113_v23 = vmul.f32 1.442695, %v3015_v8  ;;  %9575 = vst [vmem:[#allocation11_spill] sm:$0xff] %v8208_v59  ;;  %5570 = vpow2.f32 %v3103_v61  ;;  %v3115_v11 = vmul.f32 1.442695, %v3016_v46  ;;  %v8210_v12 = vpop.f32.mrb[183].mxu1  ;;  %v9579_v4 = vmax.f32 %v7910_v50, %v9578_v19 }
 0x73e   : > { %v4907_v14 = vpack.c.bf16 %v2376_v49, %v2374_v16  ;;  %v4909_v0 = vpack.c.bf16 %v2375_v32, %v2373_v27  ;;  %3219 = vadd.xlane.f32.xlu0 %v3218_v17  ;;  %9576 = vst [vmem:[#allocation8_spill] sm:$0xff] %v8210_v12  ;;  %v2288_v3 = vpop.xlane.xlu0 %2287  ;;  %v8212_v30 = vpop.eup %5560  ;;  %v9581_v16 = vld [vmem:[#allocation41_spill] sm:$0xff]  ;;  %v9582_v46 = vld [vmem:[#allocation42_spill] sm:$0xff] }
 0x73f   : > { %9577 = vst [vmem:[#allocation40_spill] sm:$0xff] %v8212_v30  ;;  %5572 = vpow2.f32 %v3113_v23  ;;  %3860 = vmax.xlane.f32.xlu1 %v9579_v4  ;;  %v8219_v8 = vpop.eup %5562  ;;  %v2935_v49 = vpop.xlane.xlu1 %2934  ;;  %v9583_v23 = vmax.f32 %v7958_v9, %v7968_v37  ;;  %v9590_v9 = vld [vmem:[#allocation64_spill] sm:$0xff] }
 0x740   : > { %9580 = vst [vmem:[#allocation48_spill] sm:$0xff] %v8219_v8  ;;  %5574 = vpow2.f32 %v3115_v11  ;;  %4908 = vmatprep.subr.bf16.mxu0 %v4907_v14  ;;  %v5565_v32 = vpop.eup %5564  ;;  %v3013_v27 = vsub.f32 %v9581_v16, %v2935_v49  ;;  %v3014_v61 = vsub.f32 %v9582_v46, %v2935_v49  ;;  %v8223_v21 = vpop.f32.mrb[184].mxu1  ;;  %v3209_v17 = vadd.f32 %v8219_v8, %v8212_v30  ;;  %v9585_v14 = vld [vmem:[#allocation36_spill] sm:$0xff]  ;;  %v9589_v8 = vld [vmem:[#allocation46_spill] sm:$0xff] }
 0x741   : > { %5576 = vrcp.f32 %v2279_v40  ;;  %4910 = vmatpush1.bf16.xpose.msra.mxu0 %v4909_v0  ;;  %v8230_v4 = vpop.f32.mrb[185].mxu1  ;;  %v2378_v60 = vmul.f32 %v5565_v32, %v9585_v14  ;;  %v9586_v40 = vld [vmem:[#allocation32_spill] sm:$0xff]  ;;  %v2377_v16 = vmul.f32 %v5565_v32, %v9587_v47  ;;  %v2379_v49 = vmul.f32 %v5559_v35, %v9588_v53 }
 0x742   : > { %3875 = vmax.xlane.f32.xlu0 %v9583_v23  ;;  %9584 = vst [vmem:[#allocation34_spill] sm:$0xff] %v8230_v4  ;;  %v2944_v11 = vpop.xlane.xlu0 %2943  ;;  %v2380_v0 = vmul.f32 %v5559_v35, %v9586_v40  ;;  %v3109_v46 = vmul.f32 1.442695, %v3013_v27  ;;  %v3111_v19 = vmul.f32 1.442695, %v3014_v61  ;;  %v5567_v23 = vpop.eup %5566  ;;  %5578 = vrcp.f32 %v2288_v3  ;;  %v9595_v3 = vld [vmem:[#allocation86_spill] sm:$0xff] }
 0x743   : > { %3210 = vadd.xlane.f32.xlu1 %v3209_v17  ;;  %v3019_v37 = vsub.f32 %v9589_v8, %v2944_v11  ;;  %v3020_v50 = vsub.f32 %v9590_v9, %v2944_v11  ;;  %v2285_v12 = vpop.xlane.xlu1 %2284  ;;  %v4913_v59 = vpack.c.bf16 %v2379_v49, %v2377_v16  ;;  %v9594_v8 = vld [vmem:[#allocation85_spill] sm:$0xff]  ;;  %v9600_v11 = vld [vmem:[#allocation62_spill] sm:$0xff] }
 0x744   : > { %v4911_v14 = vpack.c.bf16 %v2380_v0, %v2378_v60  ;;  %5580 = vpow2.f32 %v3109_v46  ;;  %v8240_v47 = vpop.f32.mrb[186].mxu1  ;;  %v9596_v61 = vmax.f32 %v9594_v8, %v9595_v3  ;;  %v9605_v9 = vld [vmem:[#allocation38_spill] sm:$0xff] }
 0x745   : > { %v3121_v40 = vmul.f32 1.442695, %v3019_v37  ;;  %9591 = vst [vmem:[#allocation10_spill] sm:$0xff] %v8240_v47  ;;  %5582 = vpow2.f32 %v3111_v19  ;;  %v3123_v53 = vmul.f32 1.442695, %v3020_v50  ;;  %v8242_v35 = vpop.f32.mrb[187].mxu1 }
 0x746   : > { %4912 = vmatprep.subr.bf16.mxu0 %v4911_v14  ;;  %9592 = vst [vmem:[#allocation41_spill] sm:$0xff] %v8242_v35  ;;  %v2294_v32 = vpop.xlane.xlu0 %2293  ;;  %v8244_v27 = vpop.eup %5568  ;;  %v9599_v50 = vld [vmem:[#allocation61_spill] sm:$0xff]  ;;  %v9609_v47 = vld [vmem:[#allocation39_spill] sm:$0xff] }
 0x747   : > { %9593 = vst [vmem:[#allocation42_spill] sm:$0xff] %v8244_v27  ;;  %5584 = vpow2.f32 %v3121_v40  ;;  %3866 = vmax.xlane.f32.xlu1 %v9596_v61  ;;  %v8251_v37 = vpop.eup %5570  ;;  %v2941_v60 = vpop.xlane.xlu1 %2940 }
 0x748   : > { %9597 = vst [vmem:[#allocation36_spill] sm:$0xff] %v8251_v37  ;;  %5586 = vpow2.f32 %v3123_v53  ;;  %v3017_v17 = vsub.f32 %v9599_v50, %v2941_v60  ;;  %v3018_v0 = vsub.f32 %v9600_v11, %v2941_v60  ;;  %v8257_v16 = vpop.f32.mrb[188].mxu1  ;;  %v3215_v49 = vadd.f32 %v8251_v37, %v8244_v27  ;;  %v9604_v53 = vld [vmem:[#allocation58_spill] sm:$0xff]  ;;  %v9607_v27 = vld [vmem:[#allocation72_spill] sm:$0xff] }
 0x749   : > { %v8253_v19 = vpop.eup %5572  ;;  %5588 = vrcp.f32 %v2285_v12  ;;  %4914 = vmatpush1.bf16.xpose.msra.mxu0 %v4913_v59  ;;  %9601 = vst [vmem:[#allocation35_spill] sm:$0xff] %v8257_v16  ;;  %v8263_v14 = vpop.f32.mrb[189].mxu1  ;;  %v2384_v61 = vmul.f32 %v5567_v23, %v9604_v53  ;;  %v2383_v12 = vmul.f32 %v5567_v23, %v9605_v9  ;;  %v9606_v11 = vld [vmem:[#allocation70_spill] sm:$0xff] }
 0x74a   : > { %9598 = vst [vmem:[#allocation32_spill] sm:$0xff] %v8253_v19  ;;  %v8261_v46 = vpop.eup %5574  ;;  %5590 = vrcp.f32 %v2294_v32  ;;  %9603 = vst [vmem:[#allocation46_spill] sm:$0xff] %v8263_v14  ;;  %v2950_v40 = vpop.xlane.xlu0 %2949  ;;  %v3117_v30 = vmul.f32 1.442695, %v3017_v17  ;;  %v3119_v50 = vmul.f32 1.442695, %v3018_v0 }
 0x74b   : > { %9602 = vst [vmem:[#allocation31_spill] sm:$0xff] %v8261_v46  ;;  %v5577_v59 = vpop.eup %5576  ;;  %3216 = vadd.xlane.f32.xlu1 %v3215_v49  ;;  %v3023_v3 = vsub.f32 %v9606_v11, %v2950_v40  ;;  %v3024_v37 = vsub.f32 %v9607_v27, %v2950_v40  ;;  %v2291_v8 = vpop.xlane.xlu1 %2290  ;;  %v9608_v32 = vld [vmem:[#allocation47_spill] sm:$0xff]  ;;  %v3224_v53 = vadd.f32 %v8261_v46, %v8253_v19 }
 0x74c   : > { %v2382_v35 = vmul.f32 %v5577_v59, %v9608_v32  ;;  %v2381_v4 = vmul.f32 %v5577_v59, %v9609_v47  ;;  %5592 = vpow2.f32 %v3117_v30  ;;  %v8275_v9 = vpop.f32.mrb[190].mxu1  ;;  %v5579_v17 = vpop.eup %5578  ;;  %v9613_v47 = vld [vmem:[#allocation90_spill] sm:$0xff]  ;;  %v9614_v59 = vld [vmem:[#allocation92_spill] sm:$0xff] }
 0x74d   : > { %v3129_v23 = vmul.f32 1.442695, %v3023_v3  ;;  %9610 = vst [vmem:[#allocation64_spill] sm:$0xff] %v8275_v9  ;;  %5594 = vpow2.f32 %v3119_v50  ;;  %v3131_v0 = vmul.f32 1.442695, %v3024_v37  ;;  %3225 = vadd.xlane.f32.xlu0 %v3224_v53  ;;  %v8277_v11 = vpop.f32.mrb[191].mxu1  ;;  %v9615_v32 = vmax.f32 %v9613_v47, %v9614_v59 }
 0x74e   : > { %v4915_v49 = vpack.c.bf16 %v2384_v61, %v2382_v35  ;;  %v4917_v60 = vpack.c.bf16 %v2383_v12, %v2381_v4  ;;  %9611 = vst [vmem:[#allocation61_spill] sm:$0xff] %v8277_v11  ;;  %v2300_v27 = vpop.xlane.xlu0 %2299  ;;  %v8279_v40 = vpop.eup %5580  ;;  %v9618_v37 = vld [vmem:[#allocation67_spill] sm:$0xff]  ;;  %v9619_v12 = vld [vmem:[#allocation68_spill] sm:$0xff]  ;;  %v9628_v47 = vld [vmem:[#allocation45_spill] sm:$0xff] }
 0x74f   : > { %9612 = vst [vmem:[#allocation62_spill] sm:$0xff] %v8279_v40  ;;  %5596 = vpow2.f32 %v3129_v23  ;;  %3872 = vmax.xlane.f32.xlu1 %v9615_v32  ;;  %v8286_v3 = vpop.eup %5582  ;;  %v2947_v35 = vpop.xlane.xlu1 %2946  ;;  %v9626_v9 = vld [vmem:[#allocation80_spill] sm:$0xff] }
 0x750   : > { %9616 = vst [vmem:[#allocation58_spill] sm:$0xff] %v8286_v3  ;;  %5598 = vpow2.f32 %v3131_v0  ;;  %4916 = vmatprep.subr.bf16.mxu0 %v4915_v49  ;;  %v3021_v61 = vsub.f32 %v9618_v37, %v2947_v35  ;;  %v3022_v50 = vsub.f32 %v9619_v12, %v2947_v35  ;;  %v8292_v53 = vpop.f32.mrb[192].mxu1  ;;  %v3221_v23 = vadd.f32 %v8286_v3, %v8279_v40  ;;  %v9624_v37 = vld [vmem:[#allocation59_spill] sm:$0xff]  ;;  %v9625_v3 = vld [vmem:[#allocation78_spill] sm:$0xff] }
 0x751   : > { %v8288_v4 = vpop.eup %5584  ;;  %5600 = vrcp.f32 %v2291_v8  ;;  %4918 = vmatpush1.bf16.xpose.msra.mxu0 %v4917_v60  ;;  %v9621_v0 = vmax.f32 %v7993_v42, %v8006_v24  ;;  %v8301_v49 = vpop.f32.mrb[193].mxu1  ;;  %v9623_v60 = vld [vmem:[#allocation60_spill] sm:$0xff]  ;;  %v2387_v19 = vmul.f32 %v5579_v17, %v9624_v37  ;;  %v9627_v42 = vld [vmem:[#allocation63_spill] sm:$0xff] }
 0x752   : > { %9617 = vst [vmem:[#allocation38_spill] sm:$0xff] %v8288_v4  ;;  %v8296_v32 = vpop.eup %5586  ;;  %5602 = vrcp.f32 %v2300_v27  ;;  %9622 = vst [vmem:[#allocation72_spill] sm:$0xff] %v8301_v49  ;;  %v2956_v8 = vpop.xlane.xlu0 %2955  ;;  %v2388_v30 = vmul.f32 %v5579_v17, %v9623_v60  ;;  %v3125_v12 = vmul.f32 1.442695, %v3021_v61  ;;  %v3127_v46 = vmul.f32 1.442695, %v3022_v50 }
 0x753   : > { %9620 = vst [vmem:[#allocation70_spill] sm:$0xff] %v8296_v32  ;;  %3881 = vmax.xlane.f32.xlu0 %v9621_v0  ;;  %v5589_v35 = vpop.eup %5588  ;;  %3222 = vadd.xlane.f32.xlu1 %v3221_v23  ;;  %v3027_v27 = vsub.f32 %v9625_v3, %v2956_v8  ;;  %v3028_v24 = vsub.f32 %v9626_v9, %v2956_v8  ;;  %v2297_v0 = vpop.xlane.xlu1 %2296 }
 0x754   : > { %v5591_v11 = vpop.eup %5590  ;;  %v2386_v59 = vmul.f32 %v5589_v35, %v9627_v42  ;;  %v2385_v14 = vmul.f32 %v5589_v35, %v9628_v47  ;;  %v3230_v17 = vadd.f32 %v8296_v32, %v8288_v4  ;;  %5604 = vpow2.f32 %v3125_v12  ;;  %v8313_v50 = vpop.f32.mrb[194].mxu1  ;;  %v9638_v47 = vld [vmem:[#allocation66_spill] sm:$0xff]  ;;  %v9639_v4 = vld [vmem:[#allocation69_spill] sm:$0xff] }
 0x755   : > { %v3137_v61 = vmul.f32 1.442695, %v3027_v27  ;;  %5606 = vpow2.f32 %v3127_v46  ;;  %v3139_v23 = vmul.f32 1.442695, %v3028_v24  ;;  %v8315_v3 = vpop.f32.mrb[195].mxu1  ;;  %v9630_v42 = vmax.f32 %v7979_v63, %v7987_v6 }
 0x756   : > { %v4919_v60 = vpack.c.bf16 %v2388_v30, %v2386_v59  ;;  %v4921_v37 = vpack.c.bf16 %v2387_v19, %v2385_v14  ;;  %v8317_v9 = vpop.eup %5592  ;;  %v9633_v19 = vld [vmem:[#allocation75_spill] sm:$0xff]  ;;  %v9634_v59 = vld [vmem:[#allocation76_spill] sm:$0xff]  ;;  %v2392_v40 = vmul.f32 %v5591_v11, %v9638_v47 }
 0x757   : > { %3231 = vadd.xlane.f32.xlu0 %v3230_v17  ;;  %9629 = vst [vmem:[#allocation47_spill] sm:$0xff] %v8317_v9  ;;  %5608 = vpow2.f32 %v3137_v61  ;;  %3878 = vmax.xlane.f32.xlu1 %v9630_v42  ;;  %v8324_v8 = vpop.eup %5594  ;;  %v2953_v24 = vpop.xlane.xlu1 %2952  ;;  %v9636_v17 = vmax.f32 %v8031_v54, %v8040_v25 }
 0x758   : > { %9631 = vst [vmem:[#allocation39_spill] sm:$0xff] %v8324_v8  ;;  %5610 = vpow2.f32 %v3139_v23  ;;  %4920 = vmatprep.subr.bf16.mxu0 %v4919_v60  ;;  %v3025_v14 = vsub.f32 %v9633_v19, %v2953_v24  ;;  %v3026_v30 = vsub.f32 %v9634_v59, %v2953_v24  ;;  %v8330_v35 = vpop.f32.mrb[196].mxu1  ;;  %v3227_v12 = vadd.f32 %v8324_v8, %v8317_v9  ;;  %v9637_v19 = vld [vmem:[#allocation71_spill] sm:$0xff] }
 0x759   : > { %v8326_v46 = vpop.eup %5596  ;;  %5612 = vrcp.f32 %v2297_v0  ;;  %4922 = vmatpush1.bf16.xpose.msra.mxu0 %v4921_v37  ;;  %v8339_v61 = vpop.f32.mrb[197].mxu1 }
 0x75a   : > { %9632 = vst [vmem:[#allocation67_spill] sm:$0xff] %v8326_v46  ;;  %v8334_v27 = vpop.eup %5598  ;;  %v3133_v0 = vmul.f32 1.442695, %v3025_v14  ;;  %v3135_v60 = vmul.f32 1.442695, %v3026_v30 }
 0x75b   : > { %9635 = vst [vmem:[#allocation68_spill] sm:$0xff] %v8334_v27  ;;  %3887 = vmax.xlane.f32.xlu0 %v9636_v17  ;;  %v5601_v23 = vpop.eup %5600  ;;  %3228 = vadd.xlane.f32.xlu1 %v3227_v12  ;;  %v3236_v42 = vadd.f32 %v8334_v27, %v8326_v46  ;;  %v9640_v17 = vld [vmem:[#allocation65_spill] sm:$0xff] }
 0x75c   : > { %v5603_v24 = vpop.eup %5602  ;;  %v2390_v59 = vmul.f32 %v5601_v23, %v9637_v19  ;;  %v2389_v9 = vmul.f32 %v5601_v23, %v9639_v4  ;;  %v2391_v32 = vmul.f32 %v5591_v11, %v9640_v17  ;;  %5614 = vpow2.f32 %v3133_v0  ;;  %v8349_v8 = vpop.f32.mrb[198].mxu1  ;;  %v9646_v17 = vld [vmem:[#allocation79_spill] sm:$0xff]  ;;  %v9648_v4 = vld [vmem:[#allocation77_spill] sm:$0xff] }
 0x75d   : > { %5616 = vpow2.f32 %v3135_v60  ;;  %v8351_v12 = vpop.f32.mrb[199].mxu1  ;;  %v9643_v19 = vmax.f32 %v8017_v43, %v8025_v26  ;;  %v9645_v23 = vmax.f32 %v8067_v62, %v8074_v10 }
 0x75e   : > { %v4923_v14 = vpack.c.bf16 %v2392_v40, %v2390_v59  ;;  %v4925_v30 = vpack.c.bf16 %v2391_v32, %v2389_v9  ;;  %9641 = vst [vmem:[#allocation60_spill] sm:$0xff] %v8351_v12  ;;  %v8353_v37 = vpop.eup %5604 }
 0x75f   : > { %3237 = vadd.xlane.f32.xlu0 %v3236_v42  ;;  %9642 = vst [vmem:[#allocation59_spill] sm:$0xff] %v8353_v37  ;;  %3884 = vmax.xlane.f32.xlu1 %v9643_v19  ;;  %v8360_v47 = vpop.eup %5606 }
 0x760   : > { %9644 = vst [vmem:[#allocation78_spill] sm:$0xff] %v8360_v47  ;;  %4924 = vmatprep.subr.bf16.mxu0 %v4923_v14  ;;  %v8364_v40 = vpop.f32.mrb[200].mxu1  ;;  %v3233_v32 = vadd.f32 %v8360_v47, %v8353_v37  ;;  %v9649_v37 = vld [vmem:[#allocation73_spill] sm:$0xff] }
 0x761   : > { %v8362_v11 = vpop.eup %5608  ;;  %4926 = vmatpush1.bf16.xpose.msra.mxu0 %v4925_v30  ;;  %v8373_v0 = vpop.f32.mrb[201].mxu1  ;;  %v9647_v30 = vld [vmem:[#allocation74_spill] sm:$0xff]  ;;  %v2395_v27 = vmul.f32 %v5603_v24, %v9649_v37 }
 0x762   : > { %v8368_v9 = vpop.eup %5610  ;;  %v2396_v19 = vmul.f32 %v5603_v24, %v9647_v30  ;;  %v9654_v37 = vld [vmem:[#allocation26_spill] sm:$0xff] }
 0x763   : > { %3893 = vmax.xlane.f32.xlu0 %v9645_v23  ;;  %v5613_v60 = vpop.eup %5612  ;;  %3234 = vadd.xlane.f32.xlu1 %v3233_v32  ;;  %v3242_v59 = vadd.f32 %v8368_v9, %v8362_v11  ;;  %v9650_v32 = vmax.f32 %v8055_v15, %v8059_v5 }
 0x764   : > { %v2394_v14 = vmul.f32 %v5613_v60, %v9646_v17  ;;  %v2393_v46 = vmul.f32 %v5613_v60, %v9648_v4  ;;  %v9651_v4 = vmax.f32 %v8103_v2, %v8110_v41 }
 0x766   : > { %v4927_v47 = vpack.c.bf16 %v2396_v19, %v2394_v14  ;;  %v4929_v23 = vpack.c.bf16 %v2395_v27, %v2393_v46  ;;  %v8383_v12 = vpop.eup %5614  ;;  %v9652_v46 = vmax.f32 %v8091_v48, %v8095_v45  ;;  %v9653_v27 = vld [vmem:[#allocation23_spill] sm:$0xff] }
 0x767   : > { %3243 = vadd.xlane.f32.xlu0 %v3242_v59  ;;  %3890 = vmax.xlane.f32.xlu1 %v9650_v32  ;;  %v8388_v42 = vpop.eup %5616 }
 0x768   : > { %4928 = vmatprep.subr.bf16.mxu0 %v4927_v47  ;;  %v3239_v17 = vadd.f32 %v8388_v42, %v8383_v12 }
 0x769   : > { %4930 = vmatpush1.bf16.xpose.msra.mxu0 %v4929_v23 }
 0x76b   : > { %3899 = vmax.xlane.f32.xlu0 %v9651_v4  ;;  %3240 = vadd.xlane.f32.xlu1 %v3239_v17 }
 0x76f   : > { %3896 = vmax.xlane.f32.xlu1 %v9652_v46 }
 0x770   : > { %2462 = vmatmul.mubr.f32.vlgmr.msra.gmra.mrb[80].mxu0 %v9653_v27 }
 0x771   : > { %3429 = vmatprep.mubr.f32.mxu0 %v9654_v37 }
 0x78d   : > { %v3175_v24 = vpop.xlane.xlu1 %3174 }
 0x78e   : > { %5618 = vrcp.f32 %v3175_v24 }
 0x791   : > { %v3178_v60 = vpop.xlane.xlu0 %3177 }
 0x792   : > { %5620 = vrcp.f32 %v3178_v60 }
 0x793   : > { %v2959_v47 = vpop.xlane.xlu1 %2958 }
 0x794   : > { %v3029_v59 = vsub.f32 %v7846_v39, %v2959_v47  ;;  %v3030_v14 = vsub.f32 %v7848_v58, %v2959_v47 }
 0x796   : > { %v3141_v30 = vmul.f32 1.442695, %v3029_v59  ;;  %v3143_v19 = vmul.f32 1.442695, %v3030_v14  ;;  %v2962_v32 = vpop.xlane.xlu0 %2961 }
 0x797   : > { %v3181_v23 = vpop.xlane.xlu1 %3180  ;;  %v3031_v17 = vsub.f32 %v7852_v56, %v2962_v32  ;;  %v3032_v4 = vsub.f32 %v7854_v52, %v2962_v32  ;;  %v9655_v56 = vld [vmem:[#allocation91_spill] sm:$0xff]  ;;  %v9656_v32 = vld [vmem:[#allocation93_spill] sm:$0xff] }
 0x798   : > { %5622 = vpow2.f32 %v3141_v30  ;;  %v5619_v24 = vpop.eup %5618 }
 0x799   : > { %5624 = vpow2.f32 %v3143_v19  ;;  %v3145_v46 = vmul.f32 1.442695, %v3031_v17  ;;  %v3147_v27 = vmul.f32 1.442695, %v3032_v4  ;;  %v3302_v19 = vmul.f32 %v5619_v24, %v9655_v56  ;;  %v9657_v4 = vld [vmem:[#allocation89_spill] sm:$0xff] }
 0x79a   : > { %5626 = vrcp.f32 %v3181_v23  ;;  %v3184_v47 = vpop.xlane.xlu0 %3183 }
 0x79b   : > { %v2965_v37 = vpop.xlane.xlu1 %2964  ;;  %5628 = vpow2.f32 %v3145_v46 }
 0x79c   : > { %v3033_v39 = vsub.f32 %v7858_v36, %v2965_v37  ;;  %v3034_v58 = vsub.f32 %v7860_v34, %v2965_v37  ;;  %v5621_v60 = vpop.eup %5620  ;;  %5630 = vpow2.f32 %v3147_v27  ;;  %v3301_v36 = vmul.f32 %v5619_v24, %v9657_v4 }
 0x79d   : > { %5632 = vrcp.f32 %v3184_v47  ;;  %v3304_v52 = vmul.f32 %v5621_v60, %v7960_v57  ;;  %v3303_v17 = vmul.f32 %v5621_v60, %v9656_v32 }
 0x79e   : > { %v3149_v59 = vmul.f32 1.442695, %v3033_v39  ;;  %v3151_v14 = vmul.f32 1.442695, %v3034_v58  ;;  %v2968_v23 = vpop.xlane.xlu0 %2967 }
 0x79f   : > { %v3187_v30 = vpop.xlane.xlu1 %3186  ;;  %v3035_v34 = vsub.f32 %v7864_v31, %v2968_v23  ;;  %v3036_v46 = vsub.f32 %v7866_v29, %v2968_v23  ;;  %v4931_v27 = vpack.c.bf16 %v3304_v52, %v3302_v19  ;;  %v4933_v39 = vpack.c.bf16 %v3303_v17, %v3301_v36 }
 0x7a0   : > { %5634 = vpow2.f32 %v3149_v59 }
 0x7a1   : > { %5636 = vpow2.f32 %v3151_v14  ;;  %v3153_v47 = vmul.f32 1.442695, %v3035_v34  ;;  %v3155_v56 = vmul.f32 1.442695, %v3036_v46  ;;  %4932 = vmatprep.subr.bf16.mxu0 %v4931_v27  ;;  %v9660_v34 = vmax.f32 %v8121_v33, %v8123_v44  ;;  %v9661_v46 = vld [vmem:[#allocation12_spill] sm:$0xff] }
 0x7a2   : > { %v8412_v37 = vpop.eup %5622  ;;  %5638 = vrcp.f32 %v3187_v30  ;;  %v3190_v59 = vpop.xlane.xlu0 %3189  ;;  %4934 = vmatpush1.bf16.xpose.msra.mxu0 %v4933_v39  ;;  %v9662_v39 = vld [vmem:[#allocation98_spill] sm:$0xff] }
 0x7a3   : > { %9658 = vst [vmem:[#allocation80_spill] sm:$0xff] %v8412_v37  ;;  %v8414_v58 = vpop.eup %5624  ;;  %v2971_v57 = vpop.xlane.xlu1 %2970  ;;  %5640 = vpow2.f32 %v3153_v47 }
 0x7a4   : > { %v3037_v60 = vsub.f32 %v7870_v38, %v2971_v57  ;;  %v3038_v24 = vsub.f32 %v7872_v20, %v2971_v57  ;;  %v3245_v29 = vadd.f32 %v8414_v58, %v8412_v37  ;;  %v5627_v31 = vpop.eup %5626  ;;  %5642 = vpow2.f32 %v3155_v56  ;;  %v9663_v56 = vld [vmem:[#allocation13_spill] sm:$0xff] }
 0x7a5   : > { %v8420_v52 = vpop.eup %5628  ;;  %5644 = vrcp.f32 %v3190_v59  ;;  %v3306_v27 = vmul.f32 %v5627_v31, %v9661_v46  ;;  %v3305_v57 = vmul.f32 %v5627_v31, %v9663_v56 }
 0x7a6   : > { %v3157_v14 = vmul.f32 1.442695, %v3037_v60  ;;  %v3159_v19 = vmul.f32 1.442695, %v3038_v24  ;;  %3246 = vadd.xlane.f32.xlu1 %v3245_v29  ;;  %v8422_v30 = vpop.eup %5630  ;;  %v2974_v38 = vpop.xlane.xlu0 %2973  ;;  %v9664_v60 = vld [vmem:[#allocation96_spill] sm:$0xff] }
 0x7a7   : > { %v3193_v32 = vpop.xlane.xlu1 %3192  ;;  %v5633_v20 = vpop.eup %5632  ;;  %v3039_v17 = vsub.f32 %v7876_v7, %v2974_v38  ;;  %v3040_v23 = vsub.f32 %v7878_v55, %v2974_v38  ;;  %v3248_v4 = vadd.f32 %v8422_v30, %v8420_v52 }
 0x7a8   : > { %5646 = vpow2.f32 %v3157_v14  ;;  %v3308_v47 = vmul.f32 %v5633_v20, %v9662_v39  ;;  %v3307_v24 = vmul.f32 %v5633_v20, %v9664_v60  ;;  %v9671_v60 = vld [vmem:[#allocation50_spill] sm:$0xff] }
 0x7a9   : > { %5648 = vpow2.f32 %v3159_v19  ;;  %v3161_v55 = vmul.f32 1.442695, %v3039_v17  ;;  %v3163_v59 = vmul.f32 1.442695, %v3040_v23  ;;  %3249 = vadd.xlane.f32.xlu0 %v3248_v4 }
 0x7aa   : > { %v8428_v36 = vpop.eup %5634  ;;  %3902 = vmax.xlane.f32.xlu1 %v9660_v34  ;;  %5650 = vrcp.f32 %v3193_v32  ;;  %v4935_v38 = vpack.c.bf16 %v3308_v47, %v3306_v27  ;;  %v3196_v34 = vpop.xlane.xlu0 %3195  ;;  %v4937_v46 = vpack.c.bf16 %v3307_v24, %v3305_v57  ;;  %v9670_v47 = vld [vmem:[#allocation81_spill] sm:$0xff] }
 0x7ab   : > { %9659 = vst [vmem:[#allocation63_spill] sm:$0xff] %v8428_v36  ;;  %v8437_v7 = vpop.eup %5636  ;;  %v2977_v29 = vpop.xlane.xlu1 %2976  ;;  %5652 = vpow2.f32 %v3161_v55 }
 0x7ac   : > { %9665 = vst [vmem:[#allocation45_spill] sm:$0xff] %v8437_v7  ;;  %v3041_v14 = vsub.f32 %v7882_v28, %v2977_v29  ;;  %v3042_v19 = vsub.f32 %v7884_v1, %v2977_v29  ;;  %v3251_v31 = vadd.f32 %v8437_v7, %v8428_v36  ;;  %v5639_v39 = vpop.eup %5638  ;;  %5654 = vpow2.f32 %v3163_v59  ;;  %4936 = vmatprep.subr.bf16.mxu0 %v4935_v38  ;;  %v9668_v1 = vld [vmem:[#allocation106_spill] sm:$0xff]  ;;  %v9673_v29 = vld [vmem:[#allocation99_spill] sm:$0xff] }
 0x7ad   : > { %v8443_v32 = vpop.eup %5640  ;;  %5656 = vrcp.f32 %v3196_v34  ;;  %4938 = vmatpush1.bf16.xpose.msra.mxu0 %v4937_v46  ;;  %v9669_v23 = vmax.f32 %v8131_v18, %v9668_v1  ;;  %v9675_v34 = vld [vmem:[#allocation30_spill] sm:$0xff]  ;;  %v9680_v36 = vld [vmem:[#allocation51_spill] sm:$0xff] }
 0x7ae   : > { %v3165_v20 = vmul.f32 1.442695, %v3041_v14  ;;  %v3167_v56 = vmul.f32 1.442695, %v3042_v19  ;;  %9666 = vst [vmem:[#allocation75_spill] sm:$0xff] %v8443_v32  ;;  %3252 = vadd.xlane.f32.xlu1 %v3251_v31  ;;  %v8445_v17 = vpop.eup %5642  ;;  %v2980_v4 = vpop.xlane.xlu0 %2979  ;;  %v3310_v14 = vmul.f32 %v5639_v39, %v9673_v29  ;;  %v9674_v19 = vld [vmem:[#allocation101_spill] sm:$0xff]  ;;  %v3309_v46 = vmul.f32 %v5639_v39, %v9675_v34 }
 0x7af   : > { %v3199_v28 = vpop.xlane.xlu1 %3198  ;;  %9667 = vst [vmem:[#allocation76_spill] sm:$0xff] %v8445_v17  ;;  %3905 = vmax.xlane.f32.xlu0 %v9669_v23  ;;  %v5645_v27 = vpop.eup %5644  ;;  %v3043_v57 = vsub.f32 %v9670_v47, %v2980_v4  ;;  %v3044_v24 = vsub.f32 %v9671_v60, %v2980_v4  ;;  %v3254_v55 = vadd.f32 %v8445_v17, %v8443_v32  ;;  %v9676_v31 = vld [vmem:[#allocation100_spill] sm:$0xff]  ;;  %v9678_v4 = vld [vmem:[#allocation33_spill] sm:$0xff] }
 0x7b0   : > { %5658 = vpow2.f32 %v3165_v20  ;;  %v3312_v38 = vmul.f32 %v5645_v27, %v9674_v19  ;;  %v3311_v20 = vmul.f32 %v5645_v27, %v9676_v31  ;;  %v9679_v60 = vmax.f32 %v8146_v13, %v9678_v4  ;;  %v9681_v29 = vld [vmem:[#allocation49_spill] sm:$0xff]  ;;  %v9687_v31 = vld [vmem:[#allocation27_spill] sm:$0xff] }
 0x7b1   : > { %5660 = vpow2.f32 %v3167_v56  ;;  %v3169_v56 = vmul.f32 1.442695, %v3043_v57  ;;  %v3171_v47 = vmul.f32 1.442695, %v3044_v24 }
 0x7b2   : > { %v8454_v59 = vpop.eup %5646  ;;  %5662 = vrcp.f32 %v3199_v28  ;;  %3908 = vmax.xlane.f32.xlu1 %v9679_v60  ;;  %v4939_v19 = vpack.c.bf16 %v3312_v38, %v3310_v14  ;;  %v3202_v37 = vpop.xlane.xlu0 %3201  ;;  %v4941_v39 = vpack.c.bf16 %v3311_v20, %v3309_v46 }
 0x7b3   : > { %9672 = vst [vmem:[#allocation71_spill] sm:$0xff] %v8454_v59  ;;  %v8460_v23 = vpop.eup %5648  ;;  %v3855_v32 = vpop.xlane.xlu1 %3854  ;;  %3255 = vadd.xlane.f32.xlu0 %v3254_v55  ;;  %5664 = vpow2.f32 %v3169_v56  ;;  %v9685_v55 = vld [vmem:[#allocation54_spill] sm:$0xff] }
 0x7b4   : > { %9677 = vst [vmem:[#allocation66_spill] sm:$0xff] %v8460_v23  ;;  %v3949_v17 = vsub.f32 %v9680_v36, %v3855_v32  ;;  %v3950_v7 = vsub.f32 %v9681_v29, %v3855_v32  ;;  %v5651_v34 = vpop.eup %5650  ;;  %v3257_v28 = vadd.f32 %v8460_v23, %v8454_v59  ;;  %5666 = vpow2.f32 %v3171_v47  ;;  %4940 = vmatprep.subr.bf16.mxu0 %v4939_v19  ;;  %v9684_v32 = vld [vmem:[#allocation9_spill] sm:$0xff]  ;;  %v9691_v29 = vld [vmem:[#allocation22_spill] sm:$0xff] }
 0x7b5   : > { %v8469_v24 = vpop.eup %5652  ;;  %5668 = vrcp.f32 %v3202_v37  ;;  %4942 = vmatpush1.bf16.xpose.msra.mxu0 %v4941_v39  ;;  %v9686_v14 = vmax.f32 %v9684_v32, %v9685_v55  ;;  %v9690_v47 = vld [vmem:[#allocation29_spill] sm:$0xff]  ;;  %v9696_v55 = vld [vmem:[#allocation52_spill] sm:$0xff] }
 0x7b6   : > { %v4013_v27 = vmul.f32 1.442695, %v3949_v17  ;;  %v4015_v57 = vmul.f32 1.442695, %v3950_v7  ;;  %9682 = vst [vmem:[#allocation69_spill] sm:$0xff] %v8469_v24  ;;  %3258 = vadd.xlane.f32.xlu1 %v3257_v28  ;;  %v8471_v36 = vpop.eup %5654  ;;  %v3858_v38 = vpop.xlane.xlu0 %3857  ;;  %v9688_v17 = vld [vmem:[#allocation82_spill] sm:$0xff]  ;;  %v3314_v60 = vmul.f32 %v5651_v34, %v9690_v47 }
 0x7b7   : > { %9683 = vst [vmem:[#allocation65_spill] sm:$0xff] %v8471_v36  ;;  %3911 = vmax.xlane.f32.xlu0 %v9686_v14  ;;  %v5657_v46 = vpop.eup %5656  ;;  %v3951_v20 = vsub.f32 %v9687_v31, %v3858_v38  ;;  %v3952_v7 = vsub.f32 %v9688_v17, %v3858_v38  ;;  %v3260_v56 = vadd.f32 %v8471_v36, %v8469_v24  ;;  %v9692_v39 = vld [vmem:[#allocation17_spill] sm:$0xff]  ;;  %v9695_v31 = vld [vmem:[#allocation19_spill] sm:$0xff] }
 0x7b8   : > { %5670 = vpow2.f32 %v4013_v27  ;;  %v3316_v19 = vmul.f32 %v5657_v46, %v9691_v29  ;;  %v3313_v28 = vmul.f32 %v5651_v34, %v9692_v39  ;;  %v9693_v27 = vld [vmem:[#allocation25_spill] sm:$0xff]  ;;  %v9697_v38 = vmax.f32 %v9695_v31, %v9696_v55  ;;  %v9702_v39 = vld [vmem:[#allocation14_spill] sm:$0xff]  ;;  %v9710_v55 = vld [vmem:[#allocation8_spill] sm:$0xff] }
 0x7b9   : > { %5672 = vpow2.f32 %v4015_v57  ;;  %v3315_v14 = vmul.f32 %v5657_v46, %v9693_v27  ;;  %v4017_v57 = vmul.f32 1.442695, %v3951_v20  ;;  %v4019_v23 = vmul.f32 1.442695, %v3952_v7 }
 0x7ba   : > { %v8480_v37 = vpop.eup %5658  ;;  %3914 = vmax.xlane.f32.xlu1 %v9697_v38  ;;  %v4943_v17 = vpack.c.bf16 %v3316_v19, %v3314_v60  ;;  %v3208_v24 = vpop.xlane.xlu0 %3207  ;;  %v9700_v20 = vmax.f32 %v8187_v51, %v8196_v22  ;;  %v9701_v60 = vld [vmem:[#allocation28_spill] sm:$0xff] }
 0x7bb   : > { %9689 = vst [vmem:[#allocation79_spill] sm:$0xff] %v8480_v37  ;;  %v8486_v59 = vpop.eup %5660  ;;  %3261 = vadd.xlane.f32.xlu0 %v3260_v56  ;;  %v4945_v36 = vpack.c.bf16 %v3315_v14, %v3313_v28  ;;  %5674 = vpow2.f32 %v4017_v57  ;;  %v9704_v14 = vld [vmem:[#allocation20_spill] sm:$0xff]  ;;  %v9705_v57 = vld [vmem:[#allocation103_spill] sm:$0xff] }
 0x7bc   : > { %9694 = vst [vmem:[#allocation74_spill] sm:$0xff] %v8486_v59  ;;  %v3263_v47 = vadd.f32 %v8486_v59, %v8480_v37  ;;  %v5663_v29 = vpop.eup %5662  ;;  %5676 = vpow2.f32 %v4019_v23  ;;  %4944 = vmatprep.subr.bf16.mxu0 %v4943_v17  ;;  %v9706_v17 = vld [vmem:[#allocation21_spill] sm:$0xff]  ;;  %v9707_v37 = vld [vmem:[#allocation102_spill] sm:$0xff] }
 0x7bd   : > { %v8493_v34 = vpop.eup %5664  ;;  %4946 = vmatpush1.bf16.xpose.msra.mxu0 %v4945_v36  ;;  %v3318_v36 = vmul.f32 %v5663_v29, %v9704_v14 }
 0x7be   : > { %9698 = vst [vmem:[#allocation77_spill] sm:$0xff] %v8493_v34  ;;  %3264 = vadd.xlane.f32.xlu1 %v3263_v47  ;;  %v8495_v46 = vpop.eup %5666  ;;  %v3317_v47 = vmul.f32 %v5663_v29, %v9706_v17  ;;  %v9719_v17 = vld [vmem:[#allocation41_spill] sm:$0xff] }
 0x7bf   : > { %9699 = vst [vmem:[#allocation73_spill] sm:$0xff] %v8495_v46  ;;  %3917 = vmax.xlane.f32.xlu0 %v9700_v20  ;;  %v3864_v7 = vpop.xlane.xlu0 %3863  ;;  %v5669_v56 = vpop.eup %5668  ;;  %v3266_v23 = vadd.f32 %v8495_v46, %v8493_v34 }
 0x7c0   : > { %v3955_v19 = vsub.f32 %v9701_v60, %v3864_v7  ;;  %v3956_v28 = vsub.f32 %v9702_v39, %v3864_v7  ;;  %v3320_v38 = vmul.f32 %v5669_v56, %v9705_v57  ;;  %v3319_v59 = vmul.f32 %v5669_v56, %v9707_v37  ;;  %v9709_v60 = vld [vmem:[#allocation11_spill] sm:$0xff]  ;;  %v9714_v56 = vld [vmem:[#allocation34_spill] sm:$0xff] }
 0x7c1   : > { %v9711_v7 = vmax.f32 %v9709_v60, %v9710_v55 }
 0x7c2   : > { %v8504_v27 = vpop.eup %5670  ;;  %v4025_v22 = vmul.f32 1.442695, %v3955_v19  ;;  %v4027_v51 = vmul.f32 1.442695, %v3956_v28  ;;  %v4947_v39 = vpack.c.bf16 %v3320_v38, %v3318_v36  ;;  %v4949_v46 = vpack.c.bf16 %v3319_v59, %v3317_v47  ;;  %v9717_v36 = vld [vmem:[#allocation88_spill] sm:$0xff] }
 0x7c3   : > { %9703 = vst [vmem:[#allocation23_spill] sm:$0xff] %v8504_v27  ;;  %v8510_v20 = vpop.eup %5672  ;;  %3920 = vmax.xlane.f32.xlu1 %v9711_v7  ;;  %3267 = vadd.xlane.f32.xlu0 %v3266_v23  ;;  %v3214_v34 = vpop.xlane.xlu0 %3213  ;;  %v9715_v19 = vmax.f32 %v8223_v21, %v9714_v56  ;;  %v9716_v23 = vld [vmem:[#allocation87_spill] sm:$0xff]  ;;  %v9733_v56 = vld [vmem:[#allocation85_spill] sm:$0xff] }
 0x7c4   : > { %9708 = vst [vmem:[#allocation26_spill] sm:$0xff] %v8510_v20  ;;  %v4141_v14 = vadd.f32 %v8510_v20, %v8504_v27  ;;  %5678 = vpow2.f32 %v4025_v22  ;;  %4948 = vmatprep.subr.bf16.mxu0 %v4947_v39 }
 0x7c5   : > { %5680 = vpow2.f32 %v4027_v51  ;;  %v8517_v29 = vpop.eup %5674  ;;  %4950 = vmatpush1.bf16.xpose.msra.mxu0 %v4949_v46  ;;  %v9718_v46 = vld [vmem:[#allocation10_spill] sm:$0xff] }
 0x7c6   : > { %9712 = vst [vmem:[#allocation91_spill] sm:$0xff] %v8517_v29  ;;  %5682 = vrcp.f32 %v3208_v24  ;;  %v8519_v37 = vpop.eup %5676  ;;  %v9720_v47 = vmax.f32 %v9718_v46, %v9719_v17 }
 0x7c7   : > { %4142 = vadd.xlane.f32.xlu1 %v4141_v14  ;;  %9713 = vst [vmem:[#allocation93_spill] sm:$0xff] %v8519_v37  ;;  %3923 = vmax.xlane.f32.xlu0 %v9715_v19  ;;  %v3870_v28 = vpop.xlane.xlu0 %3869  ;;  %v3205_v38 = vpop.xlane.xlu1 %3204  ;;  %v4144_v51 = vadd.f32 %v8519_v37, %v8517_v29  ;;  %v9721_v14 = vld [vmem:[#allocation83_spill] sm:$0xff] }
 0x7c8   : > { %v3959_v59 = vsub.f32 %v9716_v23, %v3870_v28  ;;  %v3960_v57 = vsub.f32 %v9717_v36, %v3870_v28  ;;  %5684 = vrcp.f32 %v3205_v38  ;;  %v9722_v23 = vld [vmem:[#allocation84_spill] sm:$0xff] }
 0x7ca   : > { %v4033_v22 = vmul.f32 1.442695, %v3959_v59  ;;  %v4035_v24 = vmul.f32 1.442695, %v3960_v57  ;;  %v9725_v57 = vld [vmem:[#allocation46_spill] sm:$0xff] }
 0x7cb   : > { %3926 = vmax.xlane.f32.xlu1 %v9720_v47  ;;  %4145 = vadd.xlane.f32.xlu0 %v4144_v51  ;;  %v3220_v7 = vpop.xlane.xlu0 %3219  ;;  %v9726_v29 = vmax.f32 %v8257_v16, %v9725_v57  ;;  %v9729_v57 = vld [vmem:[#allocation105_spill] sm:$0xff] }
 0x7cc   : > { %5686 = vpow2.f32 %v4033_v22  ;;  %v3861_v39 = vpop.xlane.xlu1 %3860  ;;  %v9727_v22 = vld [vmem:[#allocation94_spill] sm:$0xff] }
 0x7cd   : > { %5688 = vpow2.f32 %v4035_v24  ;;  %v3953_v19 = vsub.f32 %v9721_v14, %v3861_v39  ;;  %v3954_v28 = vsub.f32 %v9722_v23, %v3861_v39  ;;  %v9728_v24 = vld [vmem:[#allocation95_spill] sm:$0xff] }
 0x7ce   : > { %v8533_v36 = vpop.eup %5678  ;;  %5690 = vrcp.f32 %v3214_v34  ;;  %v9730_v34 = vld [vmem:[#allocation107_spill] sm:$0xff] }
 0x7cf   : > { %9723 = vst [vmem:[#allocation89_spill] sm:$0xff] %v8533_v36  ;;  %v8535_v27 = vpop.eup %5680  ;;  %v4021_v38 = vmul.f32 1.442695, %v3953_v19  ;;  %v4023_v59 = vmul.f32 1.442695, %v3954_v28  ;;  %3929 = vmax.xlane.f32.xlu0 %v9726_v29  ;;  %v3876_v47 = vpop.xlane.xlu0 %3875 }
 0x7d0   : > { %9724 = vst [vmem:[#allocation12_spill] sm:$0xff] %v8535_v27  ;;  %v5683_v51 = vpop.eup %5682  ;;  %v3963_v37 = vsub.f32 %v9727_v22, %v3876_v47  ;;  %v3964_v20 = vsub.f32 %v9728_v24, %v3876_v47  ;;  %v3211_v14 = vpop.xlane.xlu1 %3210  ;;  %v4150_v39 = vadd.f32 %v8535_v27, %v8533_v36  ;;  %v9731_v22 = vld [vmem:[#allocation53_spill] sm:$0xff]  ;;  %v9732_v47 = vld [vmem:[#allocation104_spill] sm:$0xff] }
 0x7d1   : > { %5692 = vpow2.f32 %v4021_v38  ;;  %v3324_v29 = vmul.f32 %v5683_v51, %v9729_v57  ;;  %v3323_v24 = vmul.f32 %v5683_v51, %v9732_v47  ;;  %v9734_v38 = vld [vmem:[#allocation86_spill] sm:$0xff] }
 0x7d2   : > { %5694 = vpow2.f32 %v4023_v59  ;;  %v4041_v23 = vmul.f32 1.442695, %v3963_v37  ;;  %v4043_v19 = vmul.f32 1.442695, %v3964_v20  ;;  %v5685_v28 = vpop.eup %5684 }
 0x7d3   : > { %5696 = vrcp.f32 %v3211_v14  ;;  %4151 = vadd.xlane.f32.xlu0 %v4150_v39  ;;  %v3322_v17 = vmul.f32 %v5685_v28, %v9730_v34  ;;  %v3321_v46 = vmul.f32 %v5685_v28, %v9731_v22  ;;  %v9737_v34 = vmax.f32 %v8292_v53, %v8301_v49  ;;  %v9741_v22 = vld [vmem:[#allocation92_spill] sm:$0xff] }
 0x7d4   : > { %5698 = vpow2.f32 %v4041_v23  ;;  %v3867_v16 = vpop.xlane.xlu1 %3866 }
 0x7d5   : > { %5700 = vpow2.f32 %v4043_v19  ;;  %v3957_v36 = vsub.f32 %v9733_v56, %v3867_v16  ;;  %v3958_v59 = vsub.f32 %v9734_v38, %v3867_v16  ;;  %v4951_v20 = vpack.c.bf16 %v3324_v29, %v3322_v17  ;;  %v9740_v29 = vld [vmem:[#allocation90_spill] sm:$0xff] }
 0x7d6   : > { %v8550_v37 = vpop.eup %5686  ;;  %v4953_v14 = vpack.c.bf16 %v3323_v24, %v3321_v46  ;;  %5702 = vrcp.f32 %v3220_v7 }
 0x7d7   : > { %9735 = vst [vmem:[#allocation98_spill] sm:$0xff] %v8550_v37  ;;  %v8552_v39 = vpop.eup %5688  ;;  %v4029_v57 = vmul.f32 1.442695, %v3957_v36  ;;  %v4031_v23 = vmul.f32 1.442695, %v3958_v59  ;;  %3935 = vmax.xlane.f32.xlu0 %v9737_v34  ;;  %4952 = vmatprep.subr.bf16.mxu0 %v4951_v20  ;;  %v9743_v59 = vld [vmem:[#allocation48_spill] sm:$0xff] }
 0x7d8   : > { %9736 = vst [vmem:[#allocation13_spill] sm:$0xff] %v8552_v39  ;;  %v3217_v28 = vpop.xlane.xlu1 %3216  ;;  %v4156_v56 = vadd.f32 %v8552_v39, %v8550_v37  ;;  %4954 = vmatpush1.bf16.xpose.msra.mxu0 %v4953_v14  ;;  %v5691_v16 = vpop.eup %5690  ;;  %v9744_v14 = vld [vmem:[#allocation55_spill] sm:$0xff] }
 0x7d9   : > { %5704 = vpow2.f32 %v4029_v57  ;;  %v3328_v57 = vmul.f32 %v5691_v16, %v9744_v14 }
 0x7da   : > { %5706 = vpow2.f32 %v4031_v23  ;;  %v3226_v46 = vpop.xlane.xlu0 %3225  ;;  %v9745_v23 = vld [vmem:[#allocation40_spill] sm:$0xff] }
 0x7db   : > { %v8559_v17 = vpop.eup %5692  ;;  %5708 = vrcp.f32 %v3217_v28  ;;  %4157 = vadd.xlane.f32.xlu0 %v4156_v56  ;;  %v9746_v28 = vld [vmem:[#allocation37_spill] sm:$0xff] }
 0x7dc   : > { %9738 = vst [vmem:[#allocation96_spill] sm:$0xff] %v8559_v17  ;;  %v8561_v36 = vpop.eup %5694  ;;  %v3873_v51 = vpop.xlane.xlu1 %3872  ;;  %v3327_v56 = vmul.f32 %v5691_v16, %v9746_v28  ;;  %5710 = vrcp.f32 %v3226_v46 }
 0x7dd   : > { %9739 = vst [vmem:[#allocation106_spill] sm:$0xff] %v8561_v36  ;;  %v5697_v19 = vpop.eup %5696  ;;  %v3961_v7 = vsub.f32 %v9740_v29, %v3873_v51  ;;  %v3962_v47 = vsub.f32 %v9741_v22, %v3873_v51  ;;  %v4147_v24 = vadd.f32 %v8561_v36, %v8559_v17  ;;  %v9748_v51 = vmax.f32 %v8330_v35, %v8339_v61  ;;  %v9749_v17 = vld [vmem:[#allocation97_spill] sm:$0xff] }
 0x7de   : > { %v8567_v38 = vpop.eup %5698  ;;  %v3326_v20 = vmul.f32 %v5697_v19, %v9743_v59  ;;  %v3325_v34 = vmul.f32 %v5697_v19, %v9745_v23  ;;  %v9750_v59 = vld [vmem:[#allocation18_spill] sm:$0xff] }
 0x7df   : > { %9742 = vst [vmem:[#allocation81_spill] sm:$0xff] %v8567_v38  ;;  %v8573_v37 = vpop.eup %5700  ;;  %v4037_v39 = vmul.f32 1.442695, %v3961_v7  ;;  %v4039_v29 = vmul.f32 1.442695, %v3962_v47  ;;  %3941 = vmax.xlane.f32.xlu0 %v9748_v51  ;;  %4148 = vadd.xlane.f32.xlu1 %v4147_v24  ;;  %v9755_v51 = vld [vmem:[#allocation57_spill] sm:$0xff] }
 0x7e0   : > { %9747 = vst [vmem:[#allocation50_spill] sm:$0xff] %v8573_v37  ;;  %v3882_v22 = vpop.xlane.xlu0 %3881  ;;  %v3223_v14 = vpop.xlane.xlu1 %3222  ;;  %v4955_v49 = vpack.c.bf16 %v3328_v57, %v3326_v20  ;;  %v4957_v19 = vpack.c.bf16 %v3327_v56, %v3325_v34  ;;  %v4162_v16 = vadd.f32 %v8573_v37, %v8567_v38  ;;  %v9751_v20 = vld [vmem:[#allocation64_spill] sm:$0xff]  ;;  %v9752_v57 = vld [vmem:[#allocation61_spill] sm:$0xff] }
 0x7e1   : > { %v3967_v27 = vsub.f32 %v9749_v17, %v3882_v22  ;;  %v3968_v36 = vsub.f32 %v9750_v59, %v3882_v22  ;;  %5712 = vpow2.f32 %v4037_v39  ;;  %v5703_v46 = vpop.eup %5702  ;;  %v9753_v39 = vmax.f32 %v9751_v20, %v9752_v57  ;;  %v9754_v56 = vld [vmem:[#allocation36_spill] sm:$0xff]  ;;  %v9756_v59 = vld [vmem:[#allocation42_spill] sm:$0xff] }
 0x7e2   : > { %5714 = vpow2.f32 %v4039_v29  ;;  %4956 = vmatprep.subr.bf16.mxu0 %v4955_v49  ;;  %v3332_v22 = vmul.f32 %v5703_v46, %v9755_v51 }
 0x7e3   : > { %v4049_v7 = vmul.f32 1.442695, %v3967_v27  ;;  %v4051_v47 = vmul.f32 1.442695, %v3968_v36  ;;  %v8582_v23 = vpop.eup %5704  ;;  %5716 = vrcp.f32 %v3223_v14  ;;  %4958 = vmatpush1.bf16.xpose.msra.mxu0 %v4957_v19  ;;  %4163 = vadd.xlane.f32.xlu0 %v4162_v16  ;;  %v9757_v19 = vld [vmem:[#allocation108_spill] sm:$0xff] }
 0x7e4   : > { %v3232_v17 = vpop.xlane.xlu0 %3231  ;;  %v8584_v24 = vpop.eup %5706  ;;  %3932 = vmax.xlane.f32.xlu1 %v9753_v39  ;;  %v3331_v16 = vmul.f32 %v5703_v46, %v9757_v19 }
 0x7e5   : > { %5718 = vpow2.f32 %v4049_v7  ;;  %v3879_v34 = vpop.xlane.xlu1 %3878  ;;  %v5709_v28 = vpop.eup %5708  ;;  %v4153_v36 = vadd.f32 %v8584_v24, %v8582_v23 }
 0x7e6   : > { %5720 = vpow2.f32 %v4051_v47  ;;  %v3965_v27 = vsub.f32 %v7979_v63, %v3879_v34  ;;  %v3966_v49 = vsub.f32 %v7987_v6, %v3879_v34  ;;  %v3330_v29 = vmul.f32 %v5709_v28, %v9754_v56  ;;  %v5711_v37 = vpop.eup %5710 }
 0x7e7   : > { %v3329_v14 = vmul.f32 %v5709_v28, %v9756_v59  ;;  %5722 = vrcp.f32 %v3232_v17  ;;  %v9758_v47 = vmax.f32 %v8364_v40, %v8373_v0 }
 0x7e8   : > { %v4045_v7 = vmul.f32 1.442695, %v3965_v27  ;;  %v4047_v39 = vmul.f32 1.442695, %v3966_v49  ;;  %v3888_v63 = vpop.xlane.xlu0 %3887  ;;  %4154 = vadd.xlane.f32.xlu1 %v4153_v36  ;;  %v4959_v38 = vpack.c.bf16 %v3332_v22, %v3330_v29 }
 0x7e9   : > { %3947 = vmax.xlane.f32.xlu0 %v9758_v47  ;;  %v3971_v6 = vsub.f32 %v8031_v54, %v3888_v63  ;;  %v3972_v34 = vsub.f32 %v8040_v25, %v3888_v63  ;;  %v3229_v56 = vpop.xlane.xlu1 %3228  ;;  %v4961_v51 = vpack.c.bf16 %v3331_v16, %v3329_v14  ;;  %v9759_v25 = vmax.f32 %v8313_v50, %v8315_v3  ;;  %v9761_v14 = vld [vmem:[#allocation58_spill] sm:$0xff]  ;;  %v9762_v16 = vld [vmem:[#allocation31_spill] sm:$0xff]  ;;  %v9764_v63 = vld [vmem:[#allocation32_spill] sm:$0xff] }
 0x7ea   : > { %5724 = vpow2.f32 %v4045_v7  ;;  %4960 = vmatprep.subr.bf16.mxu0 %v4959_v38  ;;  %v3336_v7 = vmul.f32 %v5711_v37, %v9762_v16 }
 0x7eb   : > { %5726 = vpow2.f32 %v4047_v39  ;;  %v4057_v46 = vmul.f32 1.442695, %v3971_v6  ;;  %v4059_v17 = vmul.f32 1.442695, %v3972_v34  ;;  %v8602_v28 = vpop.eup %5712  ;;  %4962 = vmatpush1.bf16.xpose.msra.mxu0 %v4961_v51  ;;  %v9763_v39 = vld [vmem:[#allocation62_spill] sm:$0xff]  ;;  %v3335_v6 = vmul.f32 %v5711_v37, %v9764_v63 }
 0x7ec   : > { %5728 = vrcp.f32 %v3229_v56  ;;  %v3238_v27 = vpop.xlane.xlu0 %3237  ;;  %v8604_v49 = vpop.eup %5714  ;;  %3938 = vmax.xlane.f32.xlu1 %v9759_v25 }
 0x7ed   : > { %5730 = vpow2.f32 %v4057_v46  ;;  %v3885_v54 = vpop.xlane.xlu1 %3884  ;;  %v5717_v36 = vpop.eup %5716  ;;  %v4159_v38 = vadd.f32 %v8604_v49, %v8602_v28 }
 0x7ee   : > { %5732 = vpow2.f32 %v4059_v17  ;;  %v3969_v29 = vsub.f32 %v8017_v43, %v3885_v54  ;;  %v3970_v22 = vsub.f32 %v8025_v26, %v3885_v54  ;;  %v3334_v19 = vmul.f32 %v5717_v36, %v9761_v14 }
 0x7ef   : > { %v8613_v59 = vpop.eup %5718  ;;  %v3333_v47 = vmul.f32 %v5717_v36, %v9763_v39  ;;  %5734 = vrcp.f32 %v3238_v27 }
 0x7f0   : > { %9760 = vst [vmem:[#allocation99_spill] sm:$0xff] %v8613_v59  ;;  %v8619_v34 = vpop.eup %5720  ;;  %v4053_v56 = vmul.f32 1.442695, %v3969_v29  ;;  %v4055_v43 = vmul.f32 1.442695, %v3970_v22  ;;  %v3894_v51 = vpop.xlane.xlu0 %3893  ;;  %4160 = vadd.xlane.f32.xlu1 %v4159_v38  ;;  %v4963_v25 = vpack.c.bf16 %v3336_v7, %v3334_v19 }
 0x7f1   : > { %v3975_v26 = vsub.f32 %v8067_v62, %v3894_v51  ;;  %v3976_v46 = vsub.f32 %v8074_v10, %v3894_v51  ;;  %v3235_v17 = vpop.xlane.xlu1 %3234  ;;  %v4965_v54 = vpack.c.bf16 %v3335_v6, %v3333_v47  ;;  %v5723_v14 = vpop.eup %5722  ;;  %v4168_v36 = vadd.f32 %v8619_v34, %v8613_v59  ;;  %v9765_v10 = vld [vmem:[#allocation60_spill] sm:$0xff]  ;;  %v9767_v6 = vld [vmem:[#allocation39_spill] sm:$0xff] }
 0x7f2   : > { %5736 = vpow2.f32 %v4053_v56  ;;  %4964 = vmatprep.subr.bf16.mxu0 %v4963_v25  ;;  %v9766_v22 = vmax.f32 %v8349_v8, %v9765_v10 }
 0x7f3   : > { %5738 = vpow2.f32 %v4055_v43  ;;  %v4065_v37 = vmul.f32 1.442695, %v3975_v26  ;;  %v4067_v16 = vmul.f32 1.442695, %v3976_v46  ;;  %4966 = vmatpush1.bf16.xpose.msra.mxu0 %v4965_v54  ;;  %4169 = vadd.xlane.f32.xlu0 %v4168_v36  ;;  %v9768_v43 = vld [vmem:[#allocation70_spill] sm:$0xff]  ;;  %v9769_v26 = vld [vmem:[#allocation47_spill] sm:$0xff] }
 0x7f4   : > { %v8625_v27 = vpop.eup %5724  ;;  %5740 = vrcp.f32 %v3235_v17  ;;  %v3244_v62 = vpop.xlane.xlu0 %3243  ;;  %3944 = vmax.xlane.f32.xlu1 %v9766_v22  ;;  %v3340_v51 = vmul.f32 %v5723_v14, %v9768_v43  ;;  %v9770_v17 = vld [vmem:[#allocation38_spill] sm:$0xff] }
 0x7f5   : > { %v8627_v29 = vpop.eup %5726  ;;  %5742 = vpow2.f32 %v4065_v37  ;;  %v3891_v38 = vpop.xlane.xlu1 %3890  ;;  %v3339_v25 = vmul.f32 %v5723_v14, %v9770_v17  ;;  %v9772_v17 = vld [vmem:[#allocation68_spill] sm:$0xff] }
 0x7f6   : > { %v5729_v19 = vpop.eup %5728  ;;  %5744 = vpow2.f32 %v4067_v16  ;;  %v3973_v7 = vsub.f32 %v8055_v15, %v3891_v38  ;;  %v3974_v39 = vsub.f32 %v8059_v5, %v3891_v38  ;;  %v4165_v47 = vadd.f32 %v8627_v29, %v8625_v27 }
 0x7f7   : > { %v8636_v63 = vpop.eup %5730  ;;  %v3338_v56 = vmul.f32 %v5729_v19, %v9767_v6  ;;  %v3337_v46 = vmul.f32 %v5729_v19, %v9769_v26  ;;  %5746 = vrcp.f32 %v3244_v62  ;;  %v9771_v26 = vld [vmem:[#allocation78_spill] sm:$0xff] }
 0x7f8   : > { %v8642_v54 = vpop.eup %5732  ;;  %v4061_v36 = vmul.f32 1.442695, %v3973_v7  ;;  %v4063_v15 = vmul.f32 1.442695, %v3974_v39  ;;  %v3900_v37 = vpop.xlane.xlu0 %3899  ;;  %4166 = vadd.xlane.f32.xlu1 %v4165_v47 }
 0x7f9   : > { %v3979_v5 = vsub.f32 %v8103_v2, %v3900_v37  ;;  %v3980_v16 = vsub.f32 %v8110_v41, %v3900_v37  ;;  %v3241_v22 = vpop.xlane.xlu1 %3240  ;;  %v4967_v38 = vpack.c.bf16 %v3340_v51, %v3338_v56  ;;  %v4969_v6 = vpack.c.bf16 %v3339_v25, %v3337_v46  ;;  %v5735_v59 = vpop.eup %5734  ;;  %v9774_v37 = vld [vmem:[#allocation67_spill] sm:$0xff] }
 0x7fa   : > { %5748 = vpow2.f32 %v4061_v36  ;;  %v4174_v19 = vadd.f32 %v8642_v54, %v8636_v63  ;;  %v3344_v25 = vmul.f32 %v5735_v59, %v9772_v17  ;;  %v9773_v36 = vld [vmem:[#allocation59_spill] sm:$0xff] }
 0x7fb   : > { %5750 = vpow2.f32 %v4063_v15  ;;  %v4073_v14 = vmul.f32 1.442695, %v3979_v5  ;;  %v4075_v43 = vmul.f32 1.442695, %v3980_v16  ;;  %4968 = vmatprep.subr.bf16.mxu0 %v4967_v38  ;;  %v3343_v5 = vmul.f32 %v5735_v59, %v9774_v37 }
 0x7fc   : > { %v8648_v62 = vpop.eup %5736  ;;  %5752 = vrcp.f32 %v3241_v22  ;;  %4970 = vmatpush1.bf16.xpose.msra.mxu0 %v4969_v6  ;;  %4175 = vadd.xlane.f32.xlu0 %v4174_v19 }
 0x7fd   : > { %v8650_v2 = vpop.eup %5738  ;;  %5754 = vpow2.f32 %v4073_v14  ;;  %v3897_v41 = vpop.xlane.xlu1 %3896 }
 0x7fe   : > { %v5741_v7 = vpop.eup %5740  ;;  %5756 = vpow2.f32 %v4075_v43  ;;  %v3977_v39 = vsub.f32 %v8091_v48, %v3897_v41  ;;  %v3978_v47 = vsub.f32 %v8095_v45, %v3897_v41  ;;  %v4171_v56 = vadd.f32 %v8650_v2, %v8648_v62 }
 0x7ff   : > { %v8656_v51 = vpop.eup %5742  ;;  %v3342_v46 = vmul.f32 %v5741_v7, %v9771_v26  ;;  %v3341_v15 = vmul.f32 %v5741_v7, %v9773_v36 }
 0x800   : > { %v8662_v16 = vpop.eup %5744  ;;  %v4069_v22 = vmul.f32 1.442695, %v3977_v39  ;;  %v4071_v38 = vmul.f32 1.442695, %v3978_v47  ;;  %4172 = vadd.xlane.f32.xlu1 %v4171_v56 }
 0x801   : > { %v4971_v48 = vpack.c.bf16 %v3344_v25, %v3342_v46  ;;  %v4973_v45 = vpack.c.bf16 %v3343_v5, %v3341_v15  ;;  %v4180_v6 = vadd.f32 %v8662_v16, %v8656_v51  ;;  %v5747_v19 = vpop.eup %5746 }
 0x802   : > { %5758 = vpow2.f32 %v4069_v22  ;;  %v3348_v47 = vmul.f32 %v5747_v19, %v8368_v9  ;;  %v3347_v26 = vmul.f32 %v5747_v19, %v8362_v11 }
 0x803   : > { %5760 = vpow2.f32 %v4071_v38  ;;  %4972 = vmatprep.subr.bf16.mxu0 %v4971_v48  ;;  %4181 = vadd.xlane.f32.xlu0 %v4180_v6 }
 0x804   : > { %v8666_v14 = vpop.eup %5748  ;;  %4974 = vmatpush1.bf16.xpose.msra.mxu0 %v4973_v45 }
 0x805   : > { %v8668_v43 = vpop.eup %5750 }
 0x806   : > { %v5753_v59 = vpop.eup %5752  ;;  %v4177_v41 = vadd.f32 %v8668_v43, %v8666_v14 }
 0x807   : > { %v8672_v7 = vpop.eup %5754  ;;  %v3346_v39 = vmul.f32 %v5753_v59, %v8388_v42  ;;  %v3345_v56 = vmul.f32 %v5753_v59, %v8383_v12 }
 0x808   : > { %v8678_v46 = vpop.eup %5756  ;;  %4178 = vadd.xlane.f32.xlu1 %v4177_v41 }
 0x809   : > { %v4975_v17 = vpack.c.bf16 %v3348_v47, %v3346_v39  ;;  %v4977_v25 = vpack.c.bf16 %v3347_v26, %v3345_v56  ;;  %v4186_v36 = vadd.f32 %v8678_v46, %v8672_v7 }
 0x80b   : > { %4976 = vmatprep.subr.bf16.mxu0 %v4975_v17  ;;  %4187 = vadd.xlane.f32.xlu0 %v4186_v36 }
 0x80c   : > { %v8682_v15 = vpop.eup %5758  ;;  %4978 = vmatpush1.bf16.xpose.msra.mxu0 %v4977_v25 }
 0x80d   : > { %v8684_v42 = vpop.eup %5760 }
 0x80e   : > { %v4183_v12 = vadd.f32 %v8684_v42, %v8682_v15 }
 0x810   : > { %4184 = vadd.xlane.f32.xlu1 %v4183_v12 }
 0x833   : > { %v3247_v11 = vpop.xlane.xlu1 %3246 }
 0x834   : > { %5762 = vrcp.f32 %v3247_v11 }
 0x836   : > { %v3250_v22 = vpop.xlane.xlu0 %3249 }
 0x837   : > { %v3903_v9 = vpop.xlane.xlu1 %3902  ;;  %5764 = vrcp.f32 %v3250_v22  ;;  %v9776_v22 = vld [vmem:[#allocation80_spill] sm:$0xff] }
 0x838   : > { %v3981_v37 = vsub.f32 %v8121_v33, %v3903_v9  ;;  %v3982_v5 = vsub.f32 %v8123_v44, %v3903_v9  ;;  %v9775_v9 = vld [vmem:[#allocation43_spill] sm:$0xff] }
 0x83a   : > { %v4077_v38 = vmul.f32 1.442695, %v3981_v37  ;;  %v4079_v48 = vmul.f32 1.442695, %v3982_v5 }
 0x83b   : > { %v3253_v45 = vpop.xlane.xlu1 %3252 }
 0x83c   : > { %5766 = vpow2.f32 %v4077_v38  ;;  %v3906_v6 = vpop.xlane.xlu0 %3905 }
 0x83d   : > { %5768 = vpow2.f32 %v4079_v48  ;;  %v3983_v19 = vsub.f32 %v8131_v18, %v3906_v6  ;;  %v3984_v59 = vsub.f32 %v9668_v1, %v3906_v6 }
 0x83e   : > { %5770 = vrcp.f32 %v3253_v45  ;;  %v5763_v26 = vpop.eup %5762  ;;  %v9777_v45 = vld [vmem:[#allocation44_spill] sm:$0xff] }
 0x83f   : > { %v4081_v41 = vmul.f32 1.442695, %v3983_v19  ;;  %v4083_v39 = vmul.f32 1.442695, %v3984_v59  ;;  %v3909_v47 = vpop.xlane.xlu1 %3908  ;;  %v3349_v38 = vmul.f32 %v5763_v26, %v9776_v22  ;;  %v9778_v59 = vld [vmem:[#allocation54_spill] sm:$0xff] }
 0x840   : > { %v3985_v33 = vsub.f32 %v8146_v13, %v3909_v47  ;;  %v3986_v44 = vsub.f32 %v9678_v4, %v3909_v47  ;;  %v3256_v56 = vpop.xlane.xlu0 %3255  ;;  %v3350_v4 = vmul.f32 %v5763_v26, %v8414_v58  ;;  %v9779_v26 = vld [vmem:[#allocation52_spill] sm:$0xff] }
 0x841   : > { %5772 = vpow2.f32 %v4081_v41  ;;  %v5765_v17 = vpop.eup %5764 }
 0x842   : > { %5774 = vpow2.f32 %v4083_v39  ;;  %v4085_v25 = vmul.f32 1.442695, %v3985_v33  ;;  %v4087_v36 = vmul.f32 1.442695, %v3986_v44  ;;  %v3352_v1 = vmul.f32 %v5765_v17, %v8422_v30 }
 0x843   : > { %5776 = vrcp.f32 %v3256_v56  ;;  %v2463_v12 = vpop.f32.mrb[80].mxu0  ;;  %v3259_v18 = vpop.xlane.xlu1 %3258  ;;  %v3351_v11 = vmul.f32 %v5765_v17, %v8420_v52 }
 0x844   : > { %5778 = vpow2.f32 %v4085_v25  ;;  %v5061_v37 = vpack.c.bf16 %v2463_v12, %v9775_v9  ;;  %v2465_v13 = vpop.f32.mrb[81].mxu0  ;;  %v3912_v5 = vpop.xlane.xlu0 %3911  ;;  %v4979_v52 = vpack.c.bf16 %v3352_v1, %v3350_v4 }
 0x845   : > { %5780 = vpow2.f32 %v4087_v36  ;;  %v5059_v6 = vpack.c.bf16 %v2465_v13, %v9777_v45  ;;  %v3987_v19 = vsub.f32 %v9684_v32, %v3912_v5  ;;  %v3988_v30 = vsub.f32 %v9778_v59, %v3912_v5  ;;  %v9781_v5 = vld [vmem:[#allocation109_spill] sm:$0xff] }
 0x846   : > { %v8699_v48 = vpop.eup %5766  ;;  %v4981_v39 = vpack.c.bf16 %v3351_v11, %v3349_v38  ;;  %5782 = vrcp.f32 %v3259_v18  ;;  %4980 = vmatprep.subr.bf16.mxu0 %v4979_v52  ;;  %v9782_v45 = vld [vmem:[#allocation45_spill] sm:$0xff] }
 0x847   : > { %v8704_v41 = vpop.eup %5768  ;;  %v4089_v47 = vmul.f32 1.442695, %v3987_v19  ;;  %v4091_v33 = vmul.f32 1.442695, %v3988_v30  ;;  %5060 = vmatprep.subr.bf16.mxu1 %v5059_v6  ;;  %v3915_v44 = vpop.xlane.xlu1 %3914  ;;  %v9783_v19 = vld [vmem:[#allocation76_spill] sm:$0xff]  ;;  %v9784_v30 = vld [vmem:[#allocation63_spill] sm:$0xff] }
 0x848   : > { %v4189_v58 = vadd.f32 %v8704_v41, %v8699_v48  ;;  %5062 = vmatpush1.bf16.msra.mxu1 %v5061_v37  ;;  %v3989_v56 = vsub.f32 %v9695_v31, %v3915_v44  ;;  %v3990_v17 = vsub.f32 %v9779_v26, %v3915_v44  ;;  %v3262_v32 = vpop.xlane.xlu0 %3261  ;;  %4982 = vmatpush1.bf16.xpose.msra.mxu0 %v4981_v39  ;;  %v5771_v25 = vpop.eup %5770  ;;  %v9780_v37 = vld [vmem:[#allocation56_spill] sm:$0xff]  ;;  %v9785_v39 = vld [vmem:[#allocation75_spill] sm:$0xff] }
 0x849   : > { %5784 = vpow2.f32 %v4089_v47  ;;  %v3354_v6 = vmul.f32 %v5771_v25, %v9782_v45  ;;  %v3353_v52 = vmul.f32 %v5771_v25, %v9784_v30 }
 0x84a   : > { %4190 = vadd.xlane.f32.xlu1 %v4189_v58  ;;  %5786 = vpow2.f32 %v4091_v33  ;;  %v4093_v36 = vmul.f32 1.442695, %v3989_v56  ;;  %v4095_v12 = vmul.f32 1.442695, %v3990_v17 }
 0x84b   : > { %v8710_v1 = vpop.eup %5772  ;;  %5788 = vrcp.f32 %v3262_v32  ;;  %v3265_v11 = vpop.xlane.xlu1 %3264 }
 0x84c   : > { %v8712_v9 = vpop.eup %5774  ;;  %5790 = vpow2.f32 %v4093_v36  ;;  %v3918_v18 = vpop.xlane.xlu0 %3917 }
 0x84d   : > { %v5777_v31 = vpop.eup %5776  ;;  %5792 = vpow2.f32 %v4095_v12  ;;  %v3991_v13 = vsub.f32 %v9780_v37, %v3918_v18  ;;  %v3992_v4 = vsub.f32 %v9781_v5, %v3918_v18  ;;  %v4192_v22 = vadd.f32 %v8712_v9, %v8710_v1 }
 0x84e   : > { %v8718_v38 = vpop.eup %5778  ;;  %v3356_v59 = vmul.f32 %v5777_v31, %v9783_v19  ;;  %v3355_v47 = vmul.f32 %v5777_v31, %v9785_v39  ;;  %5794 = vrcp.f32 %v3265_v11 }
 0x84f   : > { %v8724_v33 = vpop.eup %5780  ;;  %v4097_v44 = vmul.f32 1.442695, %v3991_v13  ;;  %v4099_v58 = vmul.f32 1.442695, %v3992_v4  ;;  %4193 = vadd.xlane.f32.xlu0 %v4192_v22  ;;  %v9786_v22 = vld [vmem:[#allocation34_spill] sm:$0xff] }
 0x850   : > { %v3921_v56 = vpop.xlane.xlu1 %3920  ;;  %v4983_v32 = vpack.c.bf16 %v3356_v59, %v3354_v6  ;;  %v3268_v36 = vpop.xlane.xlu0 %3267  ;;  %v4985_v12 = vpack.c.bf16 %v3355_v47, %v3353_v52  ;;  %v4195_v25 = vadd.f32 %v8724_v33, %v8718_v38  ;;  %v9787_v59 = vld [vmem:[#allocation66_spill] sm:$0xff]  ;;  %v9788_v52 = vld [vmem:[#allocation65_spill] sm:$0xff]  ;;  %v9789_v47 = vld [vmem:[#allocation71_spill] sm:$0xff] }
 0x851   : > { %v3993_v26 = vsub.f32 %v9709_v60, %v3921_v56  ;;  %v3994_v17 = vsub.f32 %v9710_v55, %v3921_v56  ;;  %5796 = vpow2.f32 %v4097_v44  ;;  %v5783_v18 = vpop.eup %5782 }
 0x852   : > { %5798 = vpow2.f32 %v4099_v58  ;;  %4984 = vmatprep.subr.bf16.mxu0 %v4983_v32  ;;  %4196 = vadd.xlane.f32.xlu1 %v4195_v25  ;;  %v3358_v30 = vmul.f32 %v5783_v18, %v9787_v59  ;;  %v3357_v44 = vmul.f32 %v5783_v18, %v9789_v47  ;;  %v9790_v58 = vld [vmem:[#allocation69_spill] sm:$0xff]  ;;  %v9794_v47 = vld [vmem:[#allocation46_spill] sm:$0xff] }
 0x853   : > { %v4101_v31 = vmul.f32 1.442695, %v3993_v26  ;;  %v4103_v37 = vmul.f32 1.442695, %v3994_v17  ;;  %v8730_v11 = vpop.eup %5784  ;;  %5800 = vrcp.f32 %v3268_v36  ;;  %4986 = vmatpush1.bf16.xpose.msra.mxu0 %v4985_v12  ;;  %v9791_v36 = vld [vmem:[#allocation10_spill] sm:$0xff]  ;;  %v9792_v25 = vld [vmem:[#allocation41_spill] sm:$0xff] }
 0x854   : > { %v4143_v60 = vpop.xlane.xlu1 %4142  ;;  %v8732_v13 = vpop.eup %5786 }
 0x855   : > { %5802 = vpow2.f32 %v4101_v31  ;;  %v3924_v55 = vpop.xlane.xlu0 %3923  ;;  %v5789_v5 = vpop.eup %5788  ;;  %v4198_v6 = vadd.f32 %v8732_v13, %v8730_v11 }
 0x856   : > { %5804 = vpow2.f32 %v4103_v37  ;;  %v3995_v4 = vsub.f32 %v8223_v21, %v3924_v55  ;;  %v3996_v45 = vsub.f32 %v9786_v22, %v3924_v55  ;;  %v8738_v19 = vpop.eup %5790  ;;  %v3360_v39 = vmul.f32 %v5789_v5, %v9788_v52 }
 0x857   : > { %v3359_v56 = vmul.f32 %v5789_v5, %v9790_v58  ;;  %v8744_v26 = vpop.eup %5792  ;;  %5806 = vrcp.f32 %v4143_v60  ;;  %4199 = vadd.xlane.f32.xlu0 %v4198_v6 }
 0x858   : > { %v4105_v17 = vmul.f32 1.442695, %v3995_v4  ;;  %v4107_v21 = vmul.f32 1.442695, %v3996_v45  ;;  %v3927_v32 = vpop.xlane.xlu1 %3926  ;;  %v4987_v37 = vpack.c.bf16 %v3360_v39, %v3358_v30  ;;  %v5795_v59 = vpop.eup %5794  ;;  %v4201_v18 = vadd.f32 %v8744_v26, %v8738_v19  ;;  %v9793_v30 = vld [vmem:[#allocation35_spill] sm:$0xff] }
 0x859   : > { %v3997_v12 = vsub.f32 %v9791_v36, %v3927_v32  ;;  %v3998_v31 = vsub.f32 %v9792_v25, %v3927_v32  ;;  %v4146_v55 = vpop.xlane.xlu0 %4145  ;;  %v4989_v22 = vpack.c.bf16 %v3359_v56, %v3357_v44  ;;  %v9797_v32 = vld [vmem:[#allocation73_spill] sm:$0xff] }
 0x85a   : > { %5808 = vpow2.f32 %v4105_v17  ;;  %4988 = vmatprep.subr.bf16.mxu0 %v4987_v37  ;;  %4202 = vadd.xlane.f32.xlu1 %v4201_v18  ;;  %v9796_v17 = vld [vmem:[#allocation74_spill] sm:$0xff] }
 0x85b   : > { %5810 = vpow2.f32 %v4107_v21  ;;  %v4109_v5 = vmul.f32 1.442695, %v3997_v12  ;;  %v4111_v52 = vmul.f32 1.442695, %v3998_v31  ;;  %v8750_v60 = vpop.eup %5796  ;;  %4990 = vmatpush1.bf16.xpose.msra.mxu0 %v4989_v22  ;;  %v3362_v21 = vmul.f32 %v5795_v59, %v9796_v17  ;;  %v9798_v12 = vld [vmem:[#allocation79_spill] sm:$0xff]  ;;  %v9799_v31 = vld [vmem:[#allocation77_spill] sm:$0xff] }
 0x85c   : > { %5812 = vrcp.f32 %v4146_v55  ;;  %v8752_v4 = vpop.eup %5798  ;;  %v3361_v25 = vmul.f32 %v5795_v59, %v9798_v12  ;;  %v9803_v12 = vld [vmem:[#allocation26_spill] sm:$0xff] }
 0x85d   : > { %5814 = vpow2.f32 %v4109_v5  ;;  %v3930_v45 = vpop.xlane.xlu0 %3929  ;;  %v5801_v6 = vpop.eup %5800  ;;  %v4204_v58 = vadd.f32 %v8752_v4, %v8750_v60 }
 0x85e   : > { %5816 = vpow2.f32 %v4111_v52  ;;  %v3999_v39 = vsub.f32 %v9793_v30, %v3930_v45  ;;  %v4000_v44 = vsub.f32 %v9794_v47, %v3930_v45  ;;  %v3364_v36 = vmul.f32 %v5801_v6, %v9797_v32 }
 0x85f   : > { %v8758_v56 = vpop.eup %5802  ;;  %v3363_v37 = vmul.f32 %v5801_v6, %v9799_v31  ;;  %4205 = vadd.xlane.f32.xlu0 %v4204_v58  ;;  %v9802_v58 = vld [vmem:[#allocation72_spill] sm:$0xff]  ;;  %v9804_v31 = vld [vmem:[#allocation93_spill] sm:$0xff] }
 0x860   : > { %9795 = vst [vmem:[#allocation101_spill] sm:$0xff] %v8758_v56  ;;  %v8764_v55 = vpop.eup %5804  ;;  %v4113_v22 = vmul.f32 1.442695, %v3999_v39  ;;  %v4115_v18 = vmul.f32 1.442695, %v4000_v44  ;;  %v4991_v5 = vpack.c.bf16 %v3364_v36, %v3362_v21 }
 0x861   : > { %9800 = vst [vmem:[#allocation30_spill] sm:$0xff] %v8764_v55  ;;  %v4152_v52 = vpop.xlane.xlu0 %4151  ;;  %v4993_v45 = vpack.c.bf16 %v3363_v37, %v3361_v25  ;;  %v4207_v30 = vadd.f32 %v8764_v55, %v8758_v56  ;;  %v5807_v47 = vpop.eup %5806 }
 0x862   : > { %5818 = vpow2.f32 %v4113_v22  ;;  %4992 = vmatprep.subr.bf16.mxu0 %v4991_v5  ;;  %v4270_v25 = vmul.f32 %v5807_v47, %v9803_v12  ;;  %v9805_v22 = vld [vmem:[#allocation23_spill] sm:$0xff]  ;;  %v9807_v12 = vld [vmem:[#allocation24_spill] sm:$0xff] }
 0x863   : > { %5820 = vpow2.f32 %v4115_v18  ;;  %4208 = vadd.xlane.f32.xlu1 %v4207_v30  ;;  %4994 = vmatpush1.bf16.xpose.msra.mxu0 %v4993_v45  ;;  %v4269_v18 = vmul.f32 %v5807_v47, %v9805_v22  ;;  %v9806_v5 = vld [vmem:[#allocation91_spill] sm:$0xff]  ;;  %v9808_v47 = vld [vmem:[#allocation16_spill] sm:$0xff] }
 0x864   : > { %v8768_v17 = vpop.eup %5808 }
 0x865   : > { %9801 = vst [vmem:[#allocation100_spill] sm:$0xff] %v8768_v17  ;;  %v8770_v59 = vpop.eup %5810  ;;  %v3936_v6 = vpop.xlane.xlu0 %3935 }
 0x866   : > { %v5813_v39 = vpop.eup %5812  ;;  %v4003_v44 = vsub.f32 %v8292_v53, %v3936_v6  ;;  %v4004_v21 = vsub.f32 %v9802_v58, %v3936_v6  ;;  %v4210_v32 = vadd.f32 %v8770_v59, %v8768_v17 }
 0x867   : > { %v8776_v36 = vpop.eup %5814  ;;  %v4272_v37 = vmul.f32 %v5813_v39, %v9804_v31  ;;  %v4271_v45 = vmul.f32 %v5813_v39, %v9806_v5 }
 0x868   : > { %v8782_v30 = vpop.eup %5816  ;;  %v4121_v56 = vmul.f32 1.442695, %v4003_v44  ;;  %v4123_v55 = vmul.f32 1.442695, %v4004_v21  ;;  %4211 = vadd.xlane.f32.xlu0 %v4210_v32 }
 0x869   : > { %v4995_v53 = vpack.c.bf16 %v4272_v37, %v4270_v25  ;;  %v4158_v6 = vpop.xlane.xlu0 %4157  ;;  %v4997_v58 = vpack.c.bf16 %v4271_v45, %v4269_v18  ;;  %v4213_v17 = vadd.f32 %v8782_v30, %v8776_v36 }
 0x86a   : > { %5822 = vpow2.f32 %v4121_v56  ;;  %3430 = vmatmul.mubr.f32.vlgmr.msra.gmra.mrb[82].mxu0 %v9807_v12 }
 0x86b   : > { %5824 = vpow2.f32 %v4123_v55  ;;  %4996 = vmatprep.subr.bf16.mxu0 %v4995_v53  ;;  %4397 = vmatprep.mubr.f32.mxu0 %v9808_v47 }
 0x86c   : > { %v8787_v31 = vpop.eup %5818  ;;  %5826 = vrcp.f32 %v4152_v52  ;;  %4998 = vmatpush1.bf16.xpose.msra.mxu0 %v4997_v58  ;;  %4214 = vadd.xlane.f32.xlu1 %v4213_v17  ;;  %v4149_v21 = vpop.xlane.xlu1 %4148 }
 0x86d   : > { %v8790_v39 = vpop.eup %5820  ;;  %v3942_v44 = vpop.xlane.xlu0 %3941  ;;  %5828 = vrcp.f32 %v4149_v21 }
 0x86e   : > { %v4007_v32 = vsub.f32 %v8330_v35, %v3942_v44  ;;  %v4008_v25 = vsub.f32 %v8339_v61, %v3942_v44  ;;  %v4216_v56 = vadd.f32 %v8790_v39, %v8787_v31 }
 0x870   : > { %v4129_v55 = vmul.f32 1.442695, %v4007_v32  ;;  %v4131_v37 = vmul.f32 1.442695, %v4008_v25  ;;  %4217 = vadd.xlane.f32.xlu0 %v4216_v56  ;;  %v9809_v25 = vld [vmem:[#allocation106_spill] sm:$0xff] }
 0x871   : > { %v4164_v52 = vpop.xlane.xlu0 %4163  ;;  %v3933_v22 = vpop.xlane.xlu1 %3932 }
 0x872   : > { %5830 = vpow2.f32 %v4129_v55  ;;  %v4001_v18 = vsub.f32 %v9751_v20, %v3933_v22  ;;  %v4002_v17 = vsub.f32 %v9752_v57, %v3933_v22  ;;  %v9810_v55 = vld [vmem:[#allocation12_spill] sm:$0xff] }
 0x873   : > { %5832 = vpow2.f32 %v4131_v37 }
 0x874   : > { %v8798_v5 = vpop.eup %5822  ;;  %v4117_v61 = vmul.f32 1.442695, %v4001_v18  ;;  %v4119_v45 = vmul.f32 1.442695, %v4002_v17  ;;  %5834 = vrcp.f32 %v4158_v6  ;;  %v9811_v6 = vld [vmem:[#allocation96_spill] sm:$0xff] }
 0x875   : > { %v8800_v35 = vpop.eup %5824  ;;  %v4155_v44 = vpop.xlane.xlu1 %4154 }
 0x876   : > { %v3948_v53 = vpop.xlane.xlu0 %3947  ;;  %v5827_v58 = vpop.eup %5826  ;;  %v4222_v21 = vadd.f32 %v8800_v35, %v8798_v5  ;;  %5836 = vpow2.f32 %v4117_v61 }
 0x877   : > { %v4011_v12 = vsub.f32 %v8364_v40, %v3948_v53  ;;  %v4012_v47 = vsub.f32 %v8373_v0, %v3948_v53  ;;  %v5829_v20 = vpop.eup %5828  ;;  %5838 = vpow2.f32 %v4119_v45  ;;  %v4276_v37 = vmul.f32 %v5827_v58, %v9810_v55  ;;  %v9812_v0 = vld [vmem:[#allocation89_spill] sm:$0xff] }
 0x878   : > { %4223 = vadd.xlane.f32.xlu0 %v4222_v21  ;;  %5840 = vrcp.f32 %v4155_v44  ;;  %v4274_v56 = vmul.f32 %v5829_v20, %v9809_v25  ;;  %v4273_v22 = vmul.f32 %v5829_v20, %v9811_v6  ;;  %v4275_v18 = vmul.f32 %v5827_v58, %v9812_v0 }
 0x879   : > { %v4137_v57 = vmul.f32 1.442695, %v4011_v12  ;;  %v4139_v32 = vmul.f32 1.442695, %v4012_v47  ;;  %v3939_v40 = vpop.xlane.xlu1 %3938 }
 0x87a   : > { %v4005_v17 = vsub.f32 %v8313_v50, %v3939_v40  ;;  %v4006_v61 = vsub.f32 %v8315_v3, %v3939_v40  ;;  %v4999_v45 = vpack.c.bf16 %v4276_v37, %v4274_v56  ;;  %v5001_v12 = vpack.c.bf16 %v4275_v18, %v4273_v22  ;;  %v9813_v40 = vld [vmem:[#allocation13_spill] sm:$0xff] }
 0x87b   : > { %5842 = vpow2.f32 %v4137_v57 }
 0x87c   : > { %5844 = vpow2.f32 %v4139_v32  ;;  %v8812_v53 = vpop.eup %5830  ;;  %v4125_v44 = vmul.f32 1.442695, %v4005_v17  ;;  %v4127_v21 = vmul.f32 1.442695, %v4006_v61  ;;  %5000 = vmatprep.subr.bf16.mxu0 %v4999_v45  ;;  %v9814_v17 = vld [vmem:[#allocation98_spill] sm:$0xff] }
 0x87d   : > { %v8814_v47 = vpop.eup %5832  ;;  %5846 = vrcp.f32 %v4164_v52  ;;  %v4161_v20 = vpop.xlane.xlu1 %4160  ;;  %5002 = vmatpush1.bf16.xpose.msra.mxu0 %v5001_v12 }
 0x87e   : > { %v4228_v58 = vadd.f32 %v8814_v47, %v8812_v53  ;;  %5848 = vpow2.f32 %v4125_v44  ;;  %v5835_v57 = vpop.eup %5834 }
 0x87f   : > { %5850 = vpow2.f32 %v4127_v21  ;;  %v4280_v0 = vmul.f32 %v5835_v57, %v9813_v40  ;;  %v4279_v61 = vmul.f32 %v5835_v57, %v9814_v17 }
 0x880   : > { %4229 = vadd.xlane.f32.xlu0 %v4228_v58  ;;  %v8818_v50 = vpop.eup %5836  ;;  %5852 = vrcp.f32 %v4161_v20  ;;  %v4170_v56 = vpop.xlane.xlu0 %4169 }
 0x881   : > { %v8820_v3 = vpop.eup %5838  ;;  %v3945_v32 = vpop.xlane.xlu1 %3944  ;;  %5854 = vrcp.f32 %v4170_v56  ;;  %v9815_v56 = vld [vmem:[#allocation50_spill] sm:$0xff] }
 0x882   : > { %v5841_v25 = vpop.eup %5840  ;;  %v4009_v55 = vsub.f32 %v8349_v8, %v3945_v32  ;;  %v4010_v52 = vsub.f32 %v9765_v10, %v3945_v32  ;;  %v4219_v37 = vadd.f32 %v8820_v3, %v8818_v50 }
 0x883   : > { %v4278_v22 = vmul.f32 %v5841_v25, %v8584_v24  ;;  %v4277_v18 = vmul.f32 %v5841_v25, %v8582_v23 }
 0x884   : > { %v4133_v12 = vmul.f32 1.442695, %v4009_v55  ;;  %v4135_v44 = vmul.f32 1.442695, %v4010_v52  ;;  %4220 = vadd.xlane.f32.xlu1 %v4219_v37 }
 0x885   : > { %v8826_v6 = vpop.eup %5842  ;;  %v4167_v8 = vpop.xlane.xlu1 %4166  ;;  %v5003_v10 = vpack.c.bf16 %v4280_v0, %v4278_v22  ;;  %v5005_v21 = vpack.c.bf16 %v4279_v61, %v4277_v18  ;;  %v9816_v22 = vld [vmem:[#allocation81_spill] sm:$0xff] }
 0x886   : > { %v8832_v45 = vpop.eup %5844  ;;  %5856 = vpow2.f32 %v4133_v12 }
 0x887   : > { %v4234_v20 = vadd.f32 %v8832_v45, %v8826_v6  ;;  %v5847_v24 = vpop.eup %5846  ;;  %5858 = vpow2.f32 %v4135_v44  ;;  %5004 = vmatprep.subr.bf16.mxu0 %v5003_v10 }
 0x888   : > { %v8836_v23 = vpop.eup %5848  ;;  %5860 = vrcp.f32 %v4167_v8  ;;  %5006 = vmatpush1.bf16.xpose.msra.mxu0 %v5005_v21  ;;  %v4284_v55 = vmul.f32 %v5847_v24, %v9815_v56  ;;  %v4283_v40 = vmul.f32 %v5847_v24, %v9816_v22  ;;  %v9817_v24 = vld [vmem:[#allocation99_spill] sm:$0xff] }
 0x889   : > { %4235 = vadd.xlane.f32.xlu0 %v4234_v20  ;;  %v4176_v58 = vpop.xlane.xlu0 %4175  ;;  %v8838_v57 = vpop.eup %5850 }
 0x88a   : > { %v5853_v32 = vpop.eup %5852  ;;  %v4225_v25 = vadd.f32 %v8838_v57, %v8836_v23  ;;  %5862 = vrcp.f32 %v4176_v58 }
 0x88b   : > { %v4282_v52 = vmul.f32 %v5853_v32, %v8604_v49  ;;  %v4281_v37 = vmul.f32 %v5853_v32, %v8602_v28  ;;  %v5855_v61 = vpop.eup %5854 }
 0x88c   : > { %4226 = vadd.xlane.f32.xlu1 %v4225_v25  ;;  %v4288_v28 = vmul.f32 %v5855_v61, %v8619_v34  ;;  %v4287_v58 = vmul.f32 %v5855_v61, %v9817_v24 }
 0x88d   : > { %v4173_v0 = vpop.xlane.xlu1 %4172  ;;  %v5007_v18 = vpack.c.bf16 %v4284_v55, %v4282_v52  ;;  %v5009_v17 = vpack.c.bf16 %v4283_v40, %v4281_v37 }
 0x88e   : > { %5864 = vrcp.f32 %v4173_v0 }
 0x88f   : > { %5008 = vmatprep.subr.bf16.mxu0 %v5007_v18 }
 0x890   : > { %v8846_v12 = vpop.eup %5856  ;;  %5010 = vmatpush1.bf16.xpose.msra.mxu0 %v5009_v17  ;;  %v4182_v44 = vpop.xlane.xlu0 %4181 }
 0x891   : > { %v8848_v8 = vpop.eup %5858  ;;  %5866 = vrcp.f32 %v4182_v44 }
 0x892   : > { %v5861_v10 = vpop.eup %5860  ;;  %v4231_v49 = vadd.f32 %v8848_v8, %v8846_v12 }
 0x893   : > { %v4286_v21 = vmul.f32 %v5861_v10, %v8627_v29  ;;  %v4285_v20 = vmul.f32 %v5861_v10, %v8625_v27 }
 0x894   : > { %4232 = vadd.xlane.f32.xlu1 %v4231_v49  ;;  %v5863_v25 = vpop.eup %5862 }
 0x895   : > { %v4179_v32 = vpop.xlane.xlu1 %4178  ;;  %v5011_v56 = vpack.c.bf16 %v4288_v28, %v4286_v21  ;;  %v5013_v55 = vpack.c.bf16 %v4287_v58, %v4285_v20  ;;  %v4292_v34 = vmul.f32 %v5863_v25, %v8642_v54  ;;  %v4291_v27 = vmul.f32 %v5863_v25, %v8636_v63 }
 0x896   : > { %5868 = vrcp.f32 %v4179_v32 }
 0x897   : > { %5012 = vmatprep.subr.bf16.mxu0 %v5011_v56 }
 0x898   : > { %v5865_v52 = vpop.eup %5864  ;;  %5014 = vmatpush1.bf16.xpose.msra.mxu0 %v5013_v55  ;;  %v4188_v37 = vpop.xlane.xlu0 %4187 }
 0x899   : > { %v4290_v22 = vmul.f32 %v5865_v52, %v8650_v2  ;;  %v4289_v29 = vmul.f32 %v5865_v52, %v8648_v62  ;;  %5870 = vrcp.f32 %v4188_v37 }
 0x89b   : > { %v5015_v40 = vpack.c.bf16 %v4292_v34, %v4290_v22  ;;  %v5017_v18 = vpack.c.bf16 %v4291_v27, %v4289_v29  ;;  %v5867_v17 = vpop.eup %5866 }
 0x89c   : > { %v4296_v10 = vmul.f32 %v5867_v17, %v8662_v16  ;;  %v4295_v62 = vmul.f32 %v5867_v17, %v8656_v51 }
 0x89d   : > { %v4185_v0 = vpop.xlane.xlu1 %4184  ;;  %5016 = vmatprep.subr.bf16.mxu0 %v5015_v40 }
 0x89e   : > { %5872 = vrcp.f32 %v4185_v0 }
 0x8a0   : > { %v5869_v61 = vpop.eup %5868  ;;  %5018 = vmatpush1.bf16.xpose.msra.mxu0 %v5017_v18 }
 0x8a1   : > { %v4294_v44 = vmul.f32 %v5869_v61, %v8668_v43  ;;  %v4293_v2 = vmul.f32 %v5869_v61, %v8666_v14 }
 0x8a3   : > { %v5019_v54 = vpack.c.bf16 %v4296_v10, %v4294_v44  ;;  %v5021_v49 = vpack.c.bf16 %v4295_v62, %v4293_v2  ;;  %v5871_v63 = vpop.eup %5870 }
 0x8a4   : > { %v4300_v20 = vmul.f32 %v5871_v63, %v8678_v46  ;;  %v4299_v43 = vmul.f32 %v5871_v63, %v8672_v7 }
 0x8a5   : > { %5020 = vmatprep.subr.bf16.mxu0 %v5019_v54 }
 0x8a8   : > { %v5873_v28 = vpop.eup %5872  ;;  %5022 = vmatpush1.bf16.xpose.msra.mxu0 %v5021_v49 }
 0x8a9   : > { %v4298_v21 = vmul.f32 %v5873_v28, %v8684_v42  ;;  %v4297_v24 = vmul.f32 %v5873_v28, %v8682_v15  ;;  %v9818_v28 = vld [vmem:[#allocation30_spill] sm:$0xff] }
 0x8ab   : > { %v5023_v58 = vpack.c.bf16 %v4300_v20, %v4298_v21  ;;  %v5025_v16 = vpack.c.bf16 %v4299_v43, %v4297_v24  ;;  %v9819_v20 = vld [vmem:[#allocation101_spill] sm:$0xff]  ;;  %v9820_v24 = vld [vmem:[#allocation100_spill] sm:$0xff] }
 0x8ad   : > { %5024 = vmatprep.subr.bf16.mxu0 %v5023_v58 }
 0x8b0   : > { %5026 = vmatpush1.bf16.xpose.msra.mxu0 %v5025_v16 }
 0x8d7   : > { %v4191_v14 = vpop.xlane.xlu1 %4190 }
 0x8d8   : > { %5874 = vrcp.f32 %v4191_v14 }
 0x8dc   : > { %v4194_v51 = vpop.xlane.xlu0 %4193 }
 0x8dd   : > { %5876 = vrcp.f32 %v4194_v51 }
 0x8df   : > { %v4197_v32 = vpop.xlane.xlu1 %4196 }
 0x8e0   : > { %5878 = vrcp.f32 %v4197_v32 }
 0x8e2   : > { %v5875_v56 = vpop.eup %5874 }
 0x8e3   : > { %v4302_v46 = vmul.f32 %v5875_v56, %v8704_v41  ;;  %v4301_v7 = vmul.f32 %v5875_v56, %v8699_v48 }
 0x8e4   : > { %v4200_v25 = vpop.xlane.xlu0 %4199 }
 0x8e5   : > { %5880 = vrcp.f32 %v4200_v25 }
 0x8e7   : > { %v5877_v42 = vpop.eup %5876  ;;  %v4203_v55 = vpop.xlane.xlu1 %4202 }
 0x8e8   : > { %v4304_v15 = vmul.f32 %v5877_v42, %v8712_v9  ;;  %v4303_v52 = vmul.f32 %v5877_v42, %v8710_v1  ;;  %5882 = vrcp.f32 %v4203_v55 }
 0x8ea   : > { %v5027_v37 = vpack.c.bf16 %v4304_v15, %v4302_v46  ;;  %v5029_v22 = vpack.c.bf16 %v4303_v52, %v4301_v7  ;;  %v5879_v29 = vpop.eup %5878 }
 0x8eb   : > { %v4306_v0 = vmul.f32 %v5879_v29, %v8724_v33  ;;  %v4305_v9 = vmul.f32 %v5879_v29, %v8718_v38 }
 0x8ec   : > { %5028 = vmatprep.subr.bf16.mxu0 %v5027_v37  ;;  %v4206_v34 = vpop.xlane.xlu0 %4205 }
 0x8ed   : > { %5884 = vrcp.f32 %v4206_v34  ;;  %5030 = vmatpush1.bf16.xpose.msra.mxu0 %v5029_v22 }
 0x8ef   : > { %v5881_v40 = vpop.eup %5880 }
 0x8f0   : > { %v4209_v27 = vpop.xlane.xlu1 %4208  ;;  %v4308_v41 = vmul.f32 %v5881_v40, %v8732_v13  ;;  %v4307_v48 = vmul.f32 %v5881_v40, %v8730_v11 }
 0x8f1   : > { %5886 = vrcp.f32 %v4209_v27 }
 0x8f2   : > { %v5031_v18 = vpack.c.bf16 %v4308_v41, %v4306_v0  ;;  %v5033_v1 = vpack.c.bf16 %v4307_v48, %v4305_v9  ;;  %v5883_v61 = vpop.eup %5882 }
 0x8f3   : > { %v4310_v10 = vmul.f32 %v5883_v61, %v8744_v26  ;;  %v4309_v33 = vmul.f32 %v5883_v61, %v8738_v19 }
 0x8f4   : > { %5032 = vmatprep.subr.bf16.mxu0 %v5031_v18 }
 0x8f5   : > { %v4212_v17 = vpop.xlane.xlu0 %4211  ;;  %5034 = vmatpush1.bf16.xpose.msra.mxu0 %v5033_v1 }
 0x8f6   : > { %5888 = vrcp.f32 %v4212_v17 }
 0x8f7   : > { %v5885_v44 = vpop.eup %5884 }
 0x8f8   : > { %v4312_v2 = vmul.f32 %v5885_v44, %v8752_v4  ;;  %v4311_v13 = vmul.f32 %v5885_v44, %v8750_v60 }
 0x8f9   : > { %v4215_v38 = vpop.xlane.xlu1 %4214 }
 0x8fa   : > { %v5035_v54 = vpack.c.bf16 %v4312_v2, %v4310_v10  ;;  %v5037_v11 = vpack.c.bf16 %v4311_v13, %v4309_v33  ;;  %5890 = vrcp.f32 %v4215_v38  ;;  %v4407_v38 = vld [vmem:[#allocation2 + $0x18] sm:$0xff] }
 0x8fb   : > { %v5887_v49 = vpop.eup %5886 }
 0x8fc   : > { %5036 = vmatprep.subr.bf16.mxu0 %v5035_v54  ;;  %v4314_v21 = vmul.f32 %v5887_v49, %v9818_v28  ;;  %v4313_v4 = vmul.f32 %v5887_v49, %v9819_v20 }
 0x8fd   : > { %v4218_v62 = vpop.xlane.xlu0 %4217  ;;  %5038 = vmatpush1.bf16.xpose.msra.mxu0 %v5037_v11 }
 0x8fe   : > { %5892 = vrcp.f32 %v4218_v62 }
 0x900   : > { %v5889_v63 = vpop.eup %5888 }
 0x901   : > { %v4316_v26 = vmul.f32 %v5889_v63, %v8770_v59  ;;  %v4315_v19 = vmul.f32 %v5889_v63, %v9820_v24 }
 0x903   : > { %v5039_v58 = vpack.c.bf16 %v4316_v26, %v4314_v21  ;;  %v5041_v60 = vpack.c.bf16 %v4315_v19, %v4313_v4 }
 0x904   : > { %v5891_v43 = vpop.eup %5890 }
 0x905   : > { %5040 = vmatprep.subr.bf16.mxu0 %v5039_v58  ;;  %v4318_v14 = vmul.f32 %v5891_v43, %v8782_v30  ;;  %v4317_v32 = vmul.f32 %v5891_v43, %v8776_v36  ;;  %v4224_v42 = vpop.xlane.xlu0 %4223 }
 0x906   : > { %5042 = vmatpush1.bf16.xpose.msra.mxu0 %v5041_v60  ;;  %5894 = vrcp.f32 %v4224_v42 }
 0x908   : > { %v5893_v16 = vpop.eup %5892 }
 0x909   : > { %v4320_v51 = vmul.f32 %v5893_v16, %v8790_v39  ;;  %v4319_v25 = vmul.f32 %v5893_v16, %v8787_v31 }
 0x90b   : > { %v5043_v56 = vpack.c.bf16 %v4320_v51, %v4318_v14  ;;  %v5045_v59 = vpack.c.bf16 %v4319_v25, %v4317_v32 }
 0x90d   : > { %5044 = vmatprep.subr.bf16.mxu0 %v5043_v56  ;;  %v4230_v46 = vpop.xlane.xlu0 %4229 }
 0x90e   : > { %5046 = vmatpush1.bf16.xpose.msra.mxu0 %v5045_v59 }
 0x910   : > { %v5895_v7 = vpop.eup %5894 }
 0x911   : > { %v4221_v55 = vpop.xlane.xlu1 %4220  ;;  %v4324_v36 = vmul.f32 %v5895_v7, %v8800_v35  ;;  %v4323_v37 = vmul.f32 %v5895_v7, %v8798_v5 }
 0x912   : > { %5896 = vrcp.f32 %v4221_v55 }
 0x913   : > { %5898 = vrcp.f32 %v4230_v46 }
 0x916   : > { %v4236_v52 = vpop.xlane.xlu0 %4235 }
 0x919   : > { %v4227_v15 = vpop.xlane.xlu1 %4226 }
 0x91a   : > { %5900 = vrcp.f32 %v4227_v15 }
 0x91b   : > { %5902 = vrcp.f32 %v4236_v52 }
 0x91c   : > { %v5897_v30 = vpop.eup %5896 }
 0x91d   : > { %v4322_v39 = vmul.f32 %v5897_v30, %v8820_v3  ;;  %v4321_v31 = vmul.f32 %v5897_v30, %v8818_v50  ;;  %v5899_v40 = vpop.eup %5898 }
 0x91e   : > { %v4328_v41 = vmul.f32 %v5899_v40, %v8814_v47  ;;  %v4327_v35 = vmul.f32 %v5899_v40, %v8812_v53 }
 0x91f   : > { %v5047_v22 = vpack.c.bf16 %v4324_v36, %v4322_v39  ;;  %v5049_v34 = vpack.c.bf16 %v4323_v37, %v4321_v31 }
 0x921   : > { %v4233_v29 = vpop.xlane.xlu1 %4232  ;;  %5048 = vmatprep.subr.bf16.mxu0 %v5047_v22 }
 0x922   : > { %5904 = vrcp.f32 %v4233_v29  ;;  %5050 = vmatpush1.bf16.xpose.msra.mxu0 %v5049_v34 }
 0x924   : > { %v5901_v27 = vpop.eup %5900 }
 0x925   : > { %v4326_v0 = vmul.f32 %v5901_v27, %v8838_v57  ;;  %v4325_v3 = vmul.f32 %v5901_v27, %v8836_v23  ;;  %v5903_v5 = vpop.eup %5902  ;;  %v9821_v23 = vld [vmem:[#allocation15_spill] sm:$0xff] }
 0x926   : > { %v4332_v1 = vmul.f32 %v5903_v5, %v8832_v45  ;;  %v4331_v57 = vmul.f32 %v5903_v5, %v8826_v6  ;;  %v4404_v45 = vld [vmem:[#allocation2] sm:$0xff]  ;;  %v4405_v6 = vld [vmem:[#allocation2 + $0x8] sm:$0xff] }
 0x927   : > { %v5051_v50 = vpack.c.bf16 %v4328_v41, %v4326_v0  ;;  %v5053_v9 = vpack.c.bf16 %v4327_v35, %v4325_v3 }
 0x929   : > { %5052 = vmatprep.subr.bf16.mxu0 %v5051_v50 }
 0x92a   : > { %5054 = vmatpush1.bf16.xpose.msra.mxu0 %v5053_v9 }
 0x92c   : > { %v5905_v48 = vpop.eup %5904 }
 0x92d   : > { %v4330_v18 = vmul.f32 %v5905_v48, %v8848_v8  ;;  %v4329_v17 = vmul.f32 %v5905_v48, %v8846_v12  ;;  %v9822_v12 = vmov 0.0   ;;  %v4406_v8 = vld [vmem:[#allocation2 + $0x10] sm:$0xff] }
 0x92f   : > { %v5055_v61 = vpack.c.bf16 %v4332_v1, %v4330_v18  ;;  %v5057_v47 = vpack.c.bf16 %v4331_v57, %v4329_v17 }
 0x931   : > { %5056 = vmatprep.subr.bf16.mxu0 %v5055_v61 }
 0x932   : > { %5058 = vmatpush1.bf16.xpose.msra.mxu0 %v5057_v47 }
 0x939   : > { %4398 = vmatmul.mubr.f32.vlgmr.msra.gmra.mrb[84].mxu0 %v9821_v23 }
 0x93d   : > { %v3431_v53 = vpop.f32.mrb[82].mxu0 }
 0x93e   : > { %v3433_v44 = vpop.f32.mrb[83].mxu0 }
 0xa0c   : > { %v4399_v10 = vpop.f32.mrb[84].mxu0 }
 0xa0d   : > { %v5065_v2 = vpack.c.bf16 %v4399_v10, %v3431_v53  ;;  %v4401_v33 = vpop.f32.mrb[85].mxu0 }
 0xa0e   : > { %v5063_v13 = vpack.c.bf16 %v4401_v33, %v3433_v44 }
 0xa10   : > { %5064 = vmatprep.subr.bf16.mxu1 %v5063_v13 }
 0xa11   : > { %5066 = vmatpush1.bf16.msra.mxu1 %v5065_v2 }
 0xa14   : > { %4768 = vmatmul.mubr.msk.f32.vlgmr.msra.gmra.mrb[202].mxu1 %vm211_vm0, %v4404_v45 }
 0xa15   : > { %4490 = vmatprep.mubr.f32.mxu1 %v9822_v12 }
 0xa18   : > { %4769 = vmatmul.mubr.msk.f32.gmra.mrb[204].mxu1 %vm211_vm0, %v4405_v6 }
 0xa19   : > { %4496 = vmatprep.mubr.f32.mxu1 %v9822_v12 }
 0xa1c   : > { %4770 = vmatmul.mubr.msk.f32.gmra.mrb[206].mxu1 %vm211_vm0, %v4406_v8 }
 0xa1d   : > { %4502 = vmatprep.mubr.f32.mxu1 %v9822_v12 }
 0xa20   : > { %4771 = vmatmul.mubr.msk.f32.gmra.mrb[208].mxu1 %vm211_vm0, %v4407_v38 }
 0xae7   : > { %v4486_v54 = vpop.f32.mrb[202].mxu1 }
 0xae8   : > { %4509 = vst [vmem:[%s192_s19] sm:$0xff] %v4486_v54  ;;  %v4488_v11 = vpop.f32.mrb[203].mxu1 }
 0xae9   : > { %4510 = vst [vmem:[%s192_s19 + $0x8] sm:$0xff] %v4488_v11 }
 0xaeb   : > { %v4492_v62 = vpop.f32.mrb[204].mxu1 }
 0xaec   : > { %4511 = vst [vmem:[%s192_s19 + $0x10] sm:$0xff] %v4492_v62  ;;  %v4494_v49 = vpop.f32.mrb[205].mxu1 }
 0xaed   : > { %4512 = vst [vmem:[%s192_s19 + $0x18] sm:$0xff] %v4494_v49 }
 0xaef   : > { %v4498_v63 = vpop.f32.mrb[206].mxu1 }
 0xaf0   : > { %4513 = vst [vmem:[%s192_s19 + $0x20] sm:$0xff] %v4498_v63  ;;  %v4500_v28 = vpop.f32.mrb[207].mxu1 }
 0xaf1   : > { %4514 = vst [vmem:[%s192_s19 + $0x28] sm:$0xff] %v4500_v28 }
 0xaf3   : > { %v4504_v21 = vpop.f32.mrb[208].mxu1 }
 0xaf4   : > { %4515 = vst [vmem:[%s192_s19 + $0x30] sm:$0xff] %v4504_v21  ;;  %v4506_v26 = vpop.f32.mrb[209].mxu1 }
 0xaf5   : > { %4516 = vst [vmem:[%s192_s19 + $0x38] sm:$0xff] %v4506_v26 }
 0xaf6   : > { %5947 = shalt.err (!%p5944_p6)
}
 0xaf7   : > { %s5948_s6 = scalar_lea.hbm %s8915_s29, 1024  ;;  %s5952_s9 = scalar_lea.hbm %s8966_s3, 2048 }
 0xaf8   : > { %p5949_p7 = scmp.ne.s32.totalorder %s8915_s29, %s5948_s6  ;;  %p5953_p0 = scmp.lt.u32.totalorder %s8915_s29, %s8966_s3 }
 0xaf9   : > { %p5954_p2 = scmp.lt.u32.totalorder %s5952_s9, %s5948_s6  ;;  %p5956_p8 = scmp.lt.u32.totalorder %s5948_s6, %s8915_s29 }
 0xafa   : > { %p5950_p9 = pnand %p5949_p7, %p9823_p10 }
 0xafb   : > { %p5955_p4 = por %p5954_p2, %p5953_p0 }
 0xafc   : > { %p5951_p12 = pneg %p5950_p9 }
 0xafd   : > { %p5957_p11 = por %p5956_p8, %p5955_p4 }
 0xaff   : > { %p5958_p13 = pnand %p5957_p11, %p5951_p12 }
 0xb01   : > { %5961 = shalt.err (!%p5958_p13)
}
 0xb02   : > { %s6023_s18 = smov 256   ;;  %s6024_s19 = smov 16  }
 0xb03   : > { %5071 = dma.vmem_to_hbm [thread:$0]  (%p9823_p10), %s8910_s21, 1024, %s8915_s29, %s8917_s4, %s6023_s18, %s6023_s18, %s6024_s19  }
 0xb04 PF: > { %p5083_p1 = scmp.ge.s32.totalorder %s6016_s17, 2  ;;  %s4548_s23 = sand.u32 1, %s5996_s12  }
 0xb05   : > { %p9824_p3 = scmp.ne.s32.totalorder %s9239_s24, 0  ;;  %s4549_s28 = scalar_lea.sflag [#allocation4], %s4548_s23 }
 0xb07   : > { %p5078_p5 = pnand %p5083_p1, %p9824_p3 }
 0xb09   : > { %5991 = dma.done.wait (!%p5078_p5), %s4549_s28, 1024  }
 0xb0a   : > { %5993 = vsyncadd (!%p5078_p5), %s4549_s28, 4294966272  ;;  %s17_s17 = sadd.s32 1, %s6016_s17   ;;  %s9825_s12 = smov %s6000_s13 }
 0xb0b   : > { %p14_p6 = scmp.ge.s32.totalorder %s17_s17, 4   ;;  %s9826_s13 = smov %s6004_s14 }
 0xb0c   : > { %s9827_s14 = smov %s6098_s25  ;;  %s9828_s15 = smov %s6012_s16 }
 0xb0d   : > { %s9829_s16 = smov %s9831_s20  ;;  %16 = sbr.rel (!%p14_p6) target bundleno = 5 (0x5), region = 72 }
 0xb14   :  { %4554 = vsyncpa [#allocation3], 1 }
 0xb15   :  { %4556 = vsyncpa [#allocation3 + $0x1], 1 }
 0xb16   :  { %4557 = vsyncpa [#allocation4], 1 }
 0xb17   :  { %4559 = vsyncpa [#allocation4 + $0x1], 1 }

</bundles_post_ra>
